<compile_context>
chip_gen: v7x
topology: tpu7x:2x2x1
jax: 0.10.0
libtpu: 0.0.40
codegen_flags: <defaults>
</compile_context>

<pallas_src>
import math

import jax
import jax.numpy as jnp
from jax.experimental import pallas as pl
from jax.experimental.pallas import tpu as pltpu  # noqa: F401

# ------------------------- model hyper-params (small) -------------------------
W          = 64          # hidden width (PyTorch default 256; scaled down)
PARAMS_CH  = 128         # ctrl-point channel (PyTorch default 1250; scaled down)
ORI_CH     = 1
POS_CH     = 2
OUTPUT_CH  = 3
MULTIRES   = 4           # NeRF embedder frequencies
N_POINTS   = 256         # object point count
BN_EPS     = 1e-5

ORI_EMB_DIM  = ORI_CH * (1 + 2 * MULTIRES)        # 9
POS_EMB_DIM  = POS_CH * (1 + 2 * MULTIRES)        # 18
POSE_EMB_DIM = ORI_EMB_DIM + POS_EMB_DIM          # 27
TIME_EMB_DIM = W                                  # 64
CONCAT_DIM   = W + W + POSE_EMB_DIM + W           # 219 (padded to 256 in-kernel)

# ------------------------- stacked bias/BN row layout -------------------------
R_PN_B1   = 0    # pointnet layer-1 bias            (64)
R_PN_B2   = 1    # pointnet layer-2 bias            (128)
R_PN_B3   = 2    # pointnet layer-3 bias            (64)
R_G_B1    = 3    # gripper layer-1 bias             (64)
R_G_B2    = 4    # gripper layer-2 bias             (64)
R_B0      = 5    # trunk layer-0 bias               (128)
R_G0      = 6    # trunk layer-0 BN gamma           (128)
R_BETA0   = 7    # trunk layer-0 BN beta            (128)
R_L1B     = 8    # trunk layer-1 bias               (64)
R_L1G     = 9    # trunk layer-1 BN gamma           (64)
R_L1BETA  = 10   # trunk layer-1 BN beta            (64)
R_L2_BASE = 11   # trunk layers 2..8: 3 rows each (bias, gamma, beta)
R_OB      = 32   # output-head bias (padded to 128)
VEC_ROWS  = 33
VEC_ROWS_PAD = 40


# ------------------------------ fused Pallas kernel ----------------------------
def fused_kernel(xctrl_ref, xori_ref, xpos_ref, t_ref, pts_ref,
                 pn_w1_ref, w12864_ref, w64128_ref, w0_ref, w6464_ref, vec_ref,
                 out_ref):
    batch = out_ref.shape[0]
    bn = pts_ref.shape[0]                       # batch * N_POINTS

    vec = vec_ref[...]                          # [40,128] f32: all bias/BN rows

    def row(i, width=128):
        return vec[i:i + 1, :width]

    def mxu(x, w):
        # bf16 operands, f32 accumulation on the MXU.
        return jnp.dot(x.astype(jnp.bfloat16), w,
                       preferred_element_type=jnp.float32)

    def bn_relu(x, gamma, beta):
        # BatchNorm1d, train-mode (per-call batch) statistics, single pass:
        # the two cross-sublane reductions (sum, sum-of-squares) are independent
        # and gamma is folded into one scale.
        # TODO(synk): eval-mode running_mean/running_var are not modelled.
        inv_n = 1.0 / x.shape[0]
        s1 = jnp.sum(x, axis=0, keepdims=True)
        s2 = jnp.sum(x * x, axis=0, keepdims=True)
        mean = s1 * inv_n
        var = s2 * inv_n - mean * mean
        scale = gamma * jax.lax.rsqrt(var + BN_EPS)
        return jnp.maximum(x * scale + (beta - mean * scale), 0.0)

    # ---- object encoder: shared per-point MLP (3->64->128->W) + max-pool ------
    # TODO(synk): PointNet2 is not defined in the provided snippet; a
    # PointNet-style shared MLP + global max-pool producing W features is used.
    pts3 = pts_ref[...]                                              # [B*N, 3]
    pts8 = jnp.concatenate(
        [pts3, jnp.zeros((bn, 8 - 3), jnp.float32)], axis=-1)       # [B*N, 8]
    h = jnp.maximum(mxu(pts8, pn_w1_ref[...]) + row(R_PN_B1, 64), 0.0)   # [B*N,64]
    h = jnp.maximum(mxu(h, w64128_ref[0]) + row(R_PN_B2, 128), 0.0)      # [B*N,128]
    h = mxu(h, w12864_ref[0]) + row(R_PN_B3, 64)                         # [B*N,64]
    x_obj = jnp.max(h.reshape(batch, N_POINTS, W), axis=1)               # [B,64]

    # ---- gripper encoder: Linear -> ReLU -> Linear on x_ctrl[:, 1, :] ---------
    ctrl_all = xctrl_ref[...]                                        # [3B, PARAMS_CH]
    ctrl = jnp.concatenate(
        [ctrl_all[3 * b + 1:3 * b + 2, :] for b in range(batch)], axis=0)  # [B,128]
    xc = jnp.maximum(mxu(ctrl, w12864_ref[1]) + row(R_G_B1, 64), 0.0)
    xc = mxu(xc, w6464_ref[0]) + row(R_G_B2, 64)                     # [B,64]

    # ---- pose embedding (NeRF-style), zero-padded to 64 lanes ------------------
    def nerf_parts(x):
        parts = [x]
        for k in range(MULTIRES):
            f = float(2 ** k)
            parts += [jnp.sin(x * f), jnp.cos(x * f)]
        return parts

    pose = jnp.concatenate(
        nerf_parts(xori_ref[...]) + nerf_parts(xpos_ref[...])
        + [jnp.zeros((batch, W - POSE_EMB_DIM), jnp.float32)], axis=-1)  # [B,64]

    # ---- timestep embedding (EUP sin/cos/exp) ----------------------------------
    half = TIME_EMB_DIM // 2
    idx = jax.lax.broadcasted_iota(jnp.int32, (1, half), 1).astype(jnp.float32)
    freqs = jnp.exp(idx * (-math.log(10000.0) / half))               # [1,32]
    args = t_ref[...] * freqs                                        # [B,32]
    temb = jnp.concatenate([jnp.cos(args), jnp.sin(args)], axis=-1)  # [B,64]

    # ---- trunk layer 0: ONE K=256 matmul over [obj | ctrl | pose_pad | time] ---
    x_cat = jnp.concatenate([x_obj, xc, pose, temb], axis=-1)        # [B,256]
    x = mxu(x_cat, w0_ref[...]) + row(R_B0, 128)                     # [B,128]
    x = bn_relu(x, row(R_G0, 128), row(R_BETA0, 128))

    # ---- trunk layer 1: 128 -> 64 ----------------------------------------------
    x = bn_relu(mxu(x, w12864_ref[2]) + row(R_L1B, 64),
                row(R_L1G, 64), row(R_L1BETA, 64))

    # ---- trunk layers 2..8: 64 -> 64 --------------------------------------------
    for i in range(7):
        base = R_L2_BASE + 3 * i
        x = bn_relu(mxu(x, w6464_ref[1 + i]) + row(base, 64),
                    row(base + 1, 64), row(base + 2, 64))

    # ---- output head (weights lane-padded to 128; slice folded into the store) --
    out = mxu(x, w64128_ref[1]) + row(R_OB, 128)                     # [B,128]
    out_ref[...] = out[:, :OUTPUT_CH].astype(out_ref.dtype)


# ------------------------------- forward wrapper --------------------------------
def profile_forward_3d(params, x_ctrl, x_ori, x_pos, timesteps, object_vertices):
    B = x_ctrl.shape[0]
    # Only free (bitcast) reshapes outside the kernel; all embeddings, the
    # x_ctrl[:,1,:] row select and the output slice happen inside the kernel.
    x_ctrl_flat = x_ctrl.reshape(B * 3, PARAMS_CH)
    pts = object_vertices.reshape(B * N_POINTS, 3)
    t = timesteps.reshape(B, 1).astype(jnp.float32)

    # Whole model in one un-gridded pallas_call: every operand fits in VMEM as a
    # full-array block, so no grid / BlockSpec / accumulator scratch is needed.
    return pl.pallas_call(
        fused_kernel,
        out_shape=jax.ShapeDtypeStruct((B, OUTPUT_CH), jnp.float32),
    )(x_ctrl_flat, x_ori, x_pos, t, pts,
      params['pn_w1'], params['w_12864'], params['w_64128'],
      params['w0'], params['w_6464'], params['vec'])


# ------------------------------- parameter init ---------------------------------
def init_params(key):
    def linear(k, fan_in, fan_out):
        kw, kb = jax.random.split(k)
        lim = 1.0 / (fan_in ** 0.5)
        w = jax.random.uniform(kw, (fan_in, fan_out), jnp.float32, -lim, lim)
        b = jax.random.uniform(kb, (fan_out,), jnp.float32, -lim, lim)
        return w, b

    def row128(v):
        return jnp.pad(v, (0, 128 - v.shape[0]))

    bf16 = lambda a: a.astype(jnp.bfloat16)
    keys = iter(jax.random.split(key, 32))

    # PointNet-style shared MLP 3 -> 64 -> 128 -> W
    pn_w1, pn_b1 = linear(next(keys), 3, 64)
    pn_w2, pn_b2 = linear(next(keys), 64, 128)
    pn_w3, pn_b3 = linear(next(keys), 128, W)
    # Gripper encoder PARAMS_CH -> W -> W
    g_w1, g_b1 = linear(next(keys), PARAMS_CH, W)
    g_w2, g_b2 = linear(next(keys), W, W)
    # Trunk layer 0 (219 -> 128), reorganized to K=256 with pose rows padded to 64
    w0, b0 = linear(next(keys), CONCAT_DIM, 2 * W)
    w0_reorg = jnp.concatenate([
        w0[0:W],                                                     # object rows
        w0[W:2 * W],                                                 # gripper rows
        jnp.pad(w0[2 * W:2 * W + POSE_EMB_DIM],
                ((0, W - POSE_EMB_DIM), (0, 0))),                    # pose rows + pad
        w0[2 * W + POSE_EMB_DIM:],                                   # time rows
    ], axis=0)                                                       # [256,128]
    # Trunk layer 1 (128 -> 64) and layers 2..8 (64 -> 64)
    l_w1, l_b1 = linear(next(keys), 2 * W, W)
    lws, lbs = [], []
    for _ in range(7):
        w, b = linear(next(keys), W, W)
        lws.append(w)
        lbs.append(b)
    # Output head (64 -> 3), zero-padded to 128 output lanes
    o_w, o_b = linear(next(keys), W, OUTPUT_CH)
    o_w_pad = jnp.pad(o_w, ((0, 0), (0, 128 - OUTPUT_CH)))

    ones_w, zeros_w = jnp.ones((W,), jnp.float32), jnp.zeros((W,), jnp.float32)
    ones_2w, zeros_2w = jnp.ones((2 * W,), jnp.float32), jnp.zeros((2 * W,), jnp.float32)

    rows = [pn_b1, pn_b2, pn_b3, g_b1, g_b2, b0, ones_2w, zeros_2w,
            l_b1, ones_w, zeros_w]
    for i in range(7):
        rows += [lbs[i], ones_w, zeros_w]
    rows += [o_b]
    assert len(rows) == VEC_ROWS
    vec = jnp.stack([row128(r) for r in rows], axis=0)               # [33,128]
    vec = jnp.pad(vec, ((0, VEC_ROWS_PAD - VEC_ROWS), (0, 0)))       # [40,128]

    return {
        'pn_w1':   bf16(jnp.pad(pn_w1, ((0, 8 - 3), (0, 0)))),       # [8,64]
        'w_12864': bf16(jnp.stack([pn_w3, g_w1, l_w1])),             # [3,128,64]
        'w_64128': bf16(jnp.stack([pn_w2, o_w_pad])),                # [2,64,128]
        'w0':      bf16(w0_reorg),                                   # [256,128]
        'w_6464':  bf16(jnp.stack([g_w2] + lws)),                    # [8,64,64]
        'vec':     vec,                                              # [40,128] f32
    }


# ------------------------------------ main ---------------------------------------
if __name__ == "__main__":
    B = 2
    key = jax.random.PRNGKey(0)
    kp, k1, k2, k3, k4, k5 = jax.random.split(key, 6)

    params = init_params(kp)
    x_ctrl = jax.random.normal(k1, (B, 3, PARAMS_CH), jnp.float32)
    x_ori = jax.random.normal(k2, (B, ORI_CH), jnp.float32)
    x_pos = jax.random.normal(k3, (B, POS_CH), jnp.float32)
    timesteps = jax.random.uniform(k4, (B,), jnp.float32) * 1000.0
    object_vertices = jax.random.normal(k5, (B, N_POINTS, 3), jnp.float32)

    out = jax.jit(profile_forward_3d)(
        params, x_ctrl, x_ori, x_pos, timesteps, object_vertices)
    jax.block_until_ready(out)
    assert out.shape == (B, OUTPUT_CH)
    print("KERNEL_OK")
</pallas_src>

<mosaic_0001>
module attributes {stable_mosaic.version = 11 : i64} {
  func.func @fused_kernel(%arg0: memref<6x128xf32, #tpu.memory_space<vmem>>, %arg1: memref<2x1xf32, #tpu.memory_space<vmem>>, %arg2: memref<2x2xf32, #tpu.memory_space<vmem>>, %arg3: memref<2x1xf32, #tpu.memory_space<vmem>>, %arg4: memref<512x3xf32, #tpu.memory_space<vmem>>, %arg5: memref<8x64xbf16, #tpu.memory_space<vmem>>, %arg6: memref<3x128x64xbf16, #tpu.memory_space<vmem>>, %arg7: memref<2x64x128xbf16, #tpu.memory_space<vmem>>, %arg8: memref<256x128xbf16, #tpu.memory_space<vmem>>, %arg9: memref<8x64x64xbf16, #tpu.memory_space<vmem>>, %arg10: memref<40x128xf32, #tpu.memory_space<vmem>>, %arg11: memref<2x3xf32, #tpu.memory_space<vmem>>) attributes {dimension_semantics = [], scalar_prefetch = 0 : i64, scratch_operands = 0 : i64, tpu.core_type = #tpu.core_type<tc>} {
    %c0 = arith.constant 0 : index
    %c0_0 = arith.constant 0 : index
    %0 = vector.load %arg10[%c0, %c0_0] : memref<40x128xf32, #tpu.memory_space<vmem>>, vector<40x128xf32>
    %c0_1 = arith.constant 0 : index
    %c0_2 = arith.constant 0 : index
    %1 = vector.load %arg4[%c0_1, %c0_2] : memref<512x3xf32, #tpu.memory_space<vmem>>, vector<512x3xf32>
    %cst = arith.constant 0.000000e+00 : f32
    %2 = vector.broadcast %cst : f32 to vector<512x5xf32>
    %3 = tpu.concatenate %1, %2 in 1 : vector<512x3xf32>, vector<512x5xf32> -> vector<512x8xf32>
    %c0_3 = arith.constant 0 : index
    %c0_4 = arith.constant 0 : index
    %4 = vector.load %arg5[%c0_3, %c0_4] : memref<8x64xbf16, #tpu.memory_space<vmem>>, vector<8x64xbf16>
    %5 = arith.truncf %3 : vector<512x8xf32> to vector<512x8xbf16>
    %cst_5 = arith.constant dense<0.000000e+00> : vector<512x64xf32>
    %6 = tpu.matmul %5, %4, %cst_5 {dimension_numbers = #tpu.dot_dimension_numbers<[1], [0], [0], [1], [0, 0, 1, 1], [], []>} : vector<512x8xbf16>, vector<8x64xbf16>, vector<512x64xf32> -> vector<512x64xf32>
    %7 = vector.extract_strided_slice %0 {offsets = [0, 0], sizes = [1, 64], strides = [1, 1]} : vector<40x128xf32> to vector<1x64xf32>
    %8 = vector.broadcast %7 : vector<1x64xf32> to vector<512x64xf32>
    %9 = arith.addf %6, %8 : vector<512x64xf32>
    %cst_6 = arith.constant 0.000000e+00 : f32
    %10 = vector.broadcast %cst_6 : f32 to vector<512x64xf32>
    %11 = arith.maximumf %9, %10 : vector<512x64xf32>
    %c0_7 = arith.constant 0 : index
    %c0_8 = arith.constant 0 : index
    %c0_9 = arith.constant 0 : index
    %12 = vector.load %arg7[%c0_7, %c0_8, %c0_9] : memref<2x64x128xbf16, #tpu.memory_space<vmem>>, vector<1x64x128xbf16>
    %13 = vector.shape_cast %12 : vector<1x64x128xbf16> to vector<64x128xbf16>
    %14 = arith.truncf %11 : vector<512x64xf32> to vector<512x64xbf16>
    %cst_10 = arith.constant dense<0.000000e+00> : vector<512x128xf32>
    %15 = tpu.matmul %14, %13, %cst_10 {dimension_numbers = #tpu.dot_dimension_numbers<[1], [0], [0], [1], [0, 0, 1, 1], [], []>} : vector<512x64xbf16>, vector<64x128xbf16>, vector<512x128xf32> -> vector<512x128xf32>
    %16 = vector.extract_strided_slice %0 {offsets = [1, 0], sizes = [1, 128], strides = [1, 1]} : vector<40x128xf32> to vector<1x128xf32>
    %17 = vector.broadcast %16 : vector<1x128xf32> to vector<512x128xf32>
    %18 = arith.addf %15, %17 : vector<512x128xf32>
    %cst_11 = arith.constant 0.000000e+00 : f32
    %19 = vector.broadcast %cst_11 : f32 to vector<512x128xf32>
    %20 = arith.maximumf %18, %19 : vector<512x128xf32>
    %c0_12 = arith.constant 0 : index
    %c0_13 = arith.constant 0 : index
    %c0_14 = arith.constant 0 : index
    %21 = vector.load %arg6[%c0_12, %c0_13, %c0_14] : memref<3x128x64xbf16, #tpu.memory_space<vmem>>, vector<1x128x64xbf16>
    %22 = vector.shape_cast %21 : vector<1x128x64xbf16> to vector<128x64xbf16>
    %23 = arith.truncf %20 : vector<512x128xf32> to vector<512x128xbf16>
    %cst_15 = arith.constant dense<0.000000e+00> : vector<512x64xf32>
    %24 = tpu.matmul %23, %22, %cst_15 {dimension_numbers = #tpu.dot_dimension_numbers<[1], [0], [0], [1], [0, 0, 1, 1], [], []>} : vector<512x128xbf16>, vector<128x64xbf16>, vector<512x64xf32> -> vector<512x64xf32>
    %25 = vector.extract_strided_slice %0 {offsets = [2, 0], sizes = [1, 64], strides = [1, 1]} : vector<40x128xf32> to vector<1x64xf32>
    %26 = vector.broadcast %25 : vector<1x64xf32> to vector<512x64xf32>
    %27 = arith.addf %24, %26 : vector<512x64xf32>
    %28 = vector.shape_cast %27 : vector<512x64xf32> to vector<2x256x64xf32>
    %cst_16 = arith.constant dense<0xFF800000> : vector<2x64xf32>
    %29 = vector.multi_reduction <maximumf>, %28, %cst_16 [1] : vector<2x256x64xf32> to vector<2x64xf32>
    %c0_17 = arith.constant 0 : index
    %c0_18 = arith.constant 0 : index
    %30 = vector.load %arg0[%c0_17, %c0_18] : memref<6x128xf32, #tpu.memory_space<vmem>>, vector<6x128xf32>
    %31 = vector.extract_strided_slice %30 {offsets = [1, 0], sizes = [1, 128], strides = [1, 1]} : vector<6x128xf32> to vector<1x128xf32>
    %32 = vector.extract_strided_slice %30 {offsets = [4, 0], sizes = [1, 128], strides = [1, 1]} : vector<6x128xf32> to vector<1x128xf32>
    %33 = tpu.concatenate %31, %32 in 0 : vector<1x128xf32>, vector<1x128xf32> -> vector<2x128xf32>
    %c1 = arith.constant 1 : index
    %c0_19 = arith.constant 0 : index
    %c0_20 = arith.constant 0 : index
    %34 = vector.load %arg6[%c1, %c0_19, %c0_20] : memref<3x128x64xbf16, #tpu.memory_space<vmem>>, vector<1x128x64xbf16>
    %35 = vector.shape_cast %34 : vector<1x128x64xbf16> to vector<128x64xbf16>
    %36 = arith.truncf %33 : vector<2x128xf32> to vector<2x128xbf16>
    %cst_21 = arith.constant dense<0.000000e+00> : vector<2x64xf32>
    %37 = tpu.matmul %36, %35, %cst_21 {dimension_numbers = #tpu.dot_dimension_numbers<[1], [0], [0], [1], [0, 0, 1, 1], [], []>} : vector<2x128xbf16>, vector<128x64xbf16>, vector<2x64xf32> -> vector<2x64xf32>
    %38 = vector.extract_strided_slice %0 {offsets = [3, 0], sizes = [1, 64], strides = [1, 1]} : vector<40x128xf32> to vector<1x64xf32>
    %39 = vector.broadcast %38 : vector<1x64xf32> to vector<2x64xf32>
    %40 = arith.addf %37, %39 : vector<2x64xf32>
    %cst_22 = arith.constant 0.000000e+00 : f32
    %41 = vector.broadcast %cst_22 : f32 to vector<2x64xf32>
    %42 = arith.maximumf %40, %41 : vector<2x64xf32>
    %c0_23 = arith.constant 0 : index
    %c0_24 = arith.constant 0 : index
    %c0_25 = arith.constant 0 : index
    %43 = vector.load %arg9[%c0_23, %c0_24, %c0_25] : memref<8x64x64xbf16, #tpu.memory_space<vmem>>, vector<1x64x64xbf16>
    %44 = vector.shape_cast %43 : vector<1x64x64xbf16> to vector<64x64xbf16>
    %45 = arith.truncf %42 : vector<2x64xf32> to vector<2x64xbf16>
    %cst_26 = arith.constant dense<0.000000e+00> : vector<2x64xf32>
    %46 = tpu.matmul %45, %44, %cst_26 {dimension_numbers = #tpu.dot_dimension_numbers<[1], [0], [0], [1], [0, 0, 1, 1], [], []>} : vector<2x64xbf16>, vector<64x64xbf16>, vector<2x64xf32> -> vector<2x64xf32>
    %47 = vector.extract_strided_slice %0 {offsets = [4, 0], sizes = [1, 64], strides = [1, 1]} : vector<40x128xf32> to vector<1x64xf32>
    %48 = vector.broadcast %47 : vector<1x64xf32> to vector<2x64xf32>
    %49 = arith.addf %46, %48 : vector<2x64xf32>
    %c0_27 = arith.constant 0 : index
    %c0_28 = arith.constant 0 : index
    %50 = vector.load %arg1[%c0_27, %c0_28] : memref<2x1xf32, #tpu.memory_space<vmem>>, vector<2x1xf32>
    %cst_29 = arith.constant 1.000000e+00 : f32
    %51 = vector.broadcast %cst_29 : f32 to vector<2x1xf32>
    %52 = arith.mulf %50, %51 : vector<2x1xf32>
    %53 = math.sin %52 : vector<2x1xf32>
    %cst_30 = arith.constant 1.000000e+00 : f32
    %54 = vector.broadcast %cst_30 : f32 to vector<2x1xf32>
    %55 = arith.mulf %50, %54 : vector<2x1xf32>
    %56 = math.cos %55 : vector<2x1xf32>
    %cst_31 = arith.constant 2.000000e+00 : f32
    %57 = vector.broadcast %cst_31 : f32 to vector<2x1xf32>
    %58 = arith.mulf %50, %57 : vector<2x1xf32>
    %59 = math.sin %58 : vector<2x1xf32>
    %cst_32 = arith.constant 2.000000e+00 : f32
    %60 = vector.broadcast %cst_32 : f32 to vector<2x1xf32>
    %61 = arith.mulf %50, %60 : vector<2x1xf32>
    %62 = math.cos %61 : vector<2x1xf32>
    %cst_33 = arith.constant 4.000000e+00 : f32
    %63 = vector.broadcast %cst_33 : f32 to vector<2x1xf32>
    %64 = arith.mulf %50, %63 : vector<2x1xf32>
    %65 = math.sin %64 : vector<2x1xf32>
    %cst_34 = arith.constant 4.000000e+00 : f32
    %66 = vector.broadcast %cst_34 : f32 to vector<2x1xf32>
    %67 = arith.mulf %50, %66 : vector<2x1xf32>
    %68 = math.cos %67 : vector<2x1xf32>
    %cst_35 = arith.constant 8.000000e+00 : f32
    %69 = vector.broadcast %cst_35 : f32 to vector<2x1xf32>
    %70 = arith.mulf %50, %69 : vector<2x1xf32>
    %71 = math.sin %70 : vector<2x1xf32>
    %cst_36 = arith.constant 8.000000e+00 : f32
    %72 = vector.broadcast %cst_36 : f32 to vector<2x1xf32>
    %73 = arith.mulf %50, %72 : vector<2x1xf32>
    %74 = math.cos %73 : vector<2x1xf32>
    %c0_37 = arith.constant 0 : index
    %c0_38 = arith.constant 0 : index
    %75 = vector.load %arg2[%c0_37, %c0_38] : memref<2x2xf32, #tpu.memory_space<vmem>>, vector<2x2xf32>
    %cst_39 = arith.constant 1.000000e+00 : f32
    %76 = vector.broadcast %cst_39 : f32 to vector<2x2xf32>
    %77 = arith.mulf %75, %76 : vector<2x2xf32>
    %78 = math.sin %77 : vector<2x2xf32>
    %cst_40 = arith.constant 1.000000e+00 : f32
    %79 = vector.broadcast %cst_40 : f32 to vector<2x2xf32>
    %80 = arith.mulf %75, %79 : vector<2x2xf32>
    %81 = math.cos %80 : vector<2x2xf32>
    %cst_41 = arith.constant 2.000000e+00 : f32
    %82 = vector.broadcast %cst_41 : f32 to vector<2x2xf32>
    %83 = arith.mulf %75, %82 : vector<2x2xf32>
    %84 = math.sin %83 : vector<2x2xf32>
    %cst_42 = arith.constant 2.000000e+00 : f32
    %85 = vector.broadcast %cst_42 : f32 to vector<2x2xf32>
    %86 = arith.mulf %75, %85 : vector<2x2xf32>
    %87 = math.cos %86 : vector<2x2xf32>
    %cst_43 = arith.constant 4.000000e+00 : f32
    %88 = vector.broadcast %cst_43 : f32 to vector<2x2xf32>
    %89 = arith.mulf %75, %88 : vector<2x2xf32>
    %90 = math.sin %89 : vector<2x2xf32>
    %cst_44 = arith.constant 4.000000e+00 : f32
    %91 = vector.broadcast %cst_44 : f32 to vector<2x2xf32>
    %92 = arith.mulf %75, %91 : vector<2x2xf32>
    %93 = math.cos %92 : vector<2x2xf32>
    %cst_45 = arith.constant 8.000000e+00 : f32
    %94 = vector.broadcast %cst_45 : f32 to vector<2x2xf32>
    %95 = arith.mulf %75, %94 : vector<2x2xf32>
    %96 = math.sin %95 : vector<2x2xf32>
    %cst_46 = arith.constant 8.000000e+00 : f32
    %97 = vector.broadcast %cst_46 : f32 to vector<2x2xf32>
    %98 = arith.mulf %75, %97 : vector<2x2xf32>
    %99 = math.cos %98 : vector<2x2xf32>
    %cst_47 = arith.constant 0.000000e+00 : f32
    %100 = vector.broadcast %cst_47 : f32 to vector<2x37xf32>
    %101 = tpu.concatenate %50, %53, %56, %59, %62, %65, %68, %71, %74, %75, %78, %81, %84, %87, %90, %93 in 1 : vector<2x1xf32>, vector<2x1xf32>, vector<2x1xf32>, vector<2x1xf32>, vector<2x1xf32>, vector<2x1xf32>, vector<2x1xf32>, vector<2x1xf32>, vector<2x1xf32>, vector<2x2xf32>, vector<2x2xf32>, vector<2x2xf32>, vector<2x2xf32>, vector<2x2xf32>, vector<2x2xf32>, vector<2x2xf32> -> vector<2x23xf32>
    %102 = tpu.concatenate %96, %99, %100 in 1 : vector<2x2xf32>, vector<2x2xf32>, vector<2x37xf32> -> vector<2x41xf32>
    %103 = tpu.concatenate %101, %102 in 1 : vector<2x23xf32>, vector<2x41xf32> -> vector<2x64xf32>
    %104 = tpu.iota {dimensions = array<i32: 1>} : vector<1x32xi32>
    %105 = arith.sitofp %104 : vector<1x32xi32> to vector<1x32xf32>
    %cst_48 = arith.constant -0.287823141 : f32
    %106 = vector.broadcast %cst_48 : f32 to vector<1x32xf32>
    %107 = arith.mulf %105, %106 : vector<1x32xf32>
    %108 = math.exp %107 : vector<1x32xf32>
    %c0_49 = arith.constant 0 : index
    %c0_50 = arith.constant 0 : index
    %109 = vector.load %arg3[%c0_49, %c0_50] : memref<2x1xf32, #tpu.memory_space<vmem>>, vector<2x1xf32>
    %110 = vector.broadcast %109 : vector<2x1xf32> to vector<2x32xf32>
    %111 = vector.broadcast %108 : vector<1x32xf32> to vector<2x32xf32>
    %112 = arith.mulf %110, %111 : vector<2x32xf32>
    %113 = math.cos %112 : vector<2x32xf32>
    %114 = math.sin %112 : vector<2x32xf32>
    %115 = tpu.concatenate %113, %114 in 1 : vector<2x32xf32>, vector<2x32xf32> -> vector<2x64xf32>
    %116 = tpu.concatenate %29, %49, %103, %115 in 1 : vector<2x64xf32>, vector<2x64xf32>, vector<2x64xf32>, vector<2x64xf32> -> vector<2x256xf32>
    %c0_51 = arith.constant 0 : index
    %c0_52 = arith.constant 0 : index
    %117 = vector.load %arg8[%c0_51, %c0_52] : memref<256x128xbf16, #tpu.memory_space<vmem>>, vector<256x128xbf16>
    %118 = arith.truncf %116 : vector<2x256xf32> to vector<2x256xbf16>
    %cst_53 = arith.constant dense<0.000000e+00> : vector<2x128xf32>
    %119 = tpu.matmul %118, %117, %cst_53 {dimension_numbers = #tpu.dot_dimension_numbers<[1], [0], [0], [1], [0, 0, 1, 1], [], []>} : vector<2x256xbf16>, vector<256x128xbf16>, vector<2x128xf32> -> vector<2x128xf32>
    %120 = vector.extract_strided_slice %0 {offsets = [5, 0], sizes = [1, 128], strides = [1, 1]} : vector<40x128xf32> to vector<1x128xf32>
    %121 = vector.broadcast %120 : vector<1x128xf32> to vector<2x128xf32>
    %122 = arith.addf %119, %121 : vector<2x128xf32>
    %123 = vector.extract_strided_slice %0 {offsets = [6, 0], sizes = [1, 128], strides = [1, 1]} : vector<40x128xf32> to vector<1x128xf32>
    %124 = vector.extract_strided_slice %0 {offsets = [7, 0], sizes = [1, 128], strides = [1, 1]} : vector<40x128xf32> to vector<1x128xf32>
    %cst_54 = arith.constant dense<0.000000e+00> : vector<128xf32>
    %125 = vector.multi_reduction <add>, %122, %cst_54 [0] : vector<2x128xf32> to vector<128xf32>
    %126 = vector.shape_cast %125 : vector<128xf32> to vector<1x128xf32>
    %127 = arith.mulf %122, %122 : vector<2x128xf32>
    %cst_55 = arith.constant dense<0.000000e+00> : vector<128xf32>
    %128 = vector.multi_reduction <add>, %127, %cst_55 [0] : vector<2x128xf32> to vector<128xf32>
    %129 = vector.shape_cast %128 : vector<128xf32> to vector<1x128xf32>
    %cst_56 = arith.constant 5.000000e-01 : f32
    %130 = vector.broadcast %cst_56 : f32 to vector<1x128xf32>
    %131 = arith.mulf %126, %130 : vector<1x128xf32>
    %cst_57 = arith.constant 5.000000e-01 : f32
    %132 = vector.broadcast %cst_57 : f32 to vector<1x128xf32>
    %133 = arith.mulf %129, %132 : vector<1x128xf32>
    %134 = arith.mulf %131, %131 : vector<1x128xf32>
    %135 = arith.subf %133, %134 : vector<1x128xf32>
    %cst_58 = arith.constant 9.99999974E-6 : f32
    %136 = vector.broadcast %cst_58 : f32 to vector<1x128xf32>
    %137 = arith.addf %135, %136 : vector<1x128xf32>
    %138 = math.rsqrt %137 : vector<1x128xf32>
    %139 = arith.mulf %123, %138 : vector<1x128xf32>
    %140 = vector.broadcast %139 : vector<1x128xf32> to vector<2x128xf32>
    %141 = arith.mulf %122, %140 : vector<2x128xf32>
    %142 = arith.mulf %131, %139 : vector<1x128xf32>
    %143 = arith.subf %124, %142 : vector<1x128xf32>
    %144 = vector.broadcast %143 : vector<1x128xf32> to vector<2x128xf32>
    %145 = arith.addf %141, %144 : vector<2x128xf32>
    %cst_59 = arith.constant 0.000000e+00 : f32
    %146 = vector.broadcast %cst_59 : f32 to vector<2x128xf32>
    %147 = arith.maximumf %145, %146 : vector<2x128xf32>
    %c2 = arith.constant 2 : index
    %c0_60 = arith.constant 0 : index
    %c0_61 = arith.constant 0 : index
    %148 = vector.load %arg6[%c2, %c0_60, %c0_61] : memref<3x128x64xbf16, #tpu.memory_space<vmem>>, vector<1x128x64xbf16>
    %149 = vector.shape_cast %148 : vector<1x128x64xbf16> to vector<128x64xbf16>
    %150 = arith.truncf %147 : vector<2x128xf32> to vector<2x128xbf16>
    %cst_62 = arith.constant dense<0.000000e+00> : vector<2x64xf32>
    %151 = tpu.matmul %150, %149, %cst_62 {dimension_numbers = #tpu.dot_dimension_numbers<[1], [0], [0], [1], [0, 0, 1, 1], [], []>} : vector<2x128xbf16>, vector<128x64xbf16>, vector<2x64xf32> -> vector<2x64xf32>
    %152 = vector.extract_strided_slice %0 {offsets = [8, 0], sizes = [1, 64], strides = [1, 1]} : vector<40x128xf32> to vector<1x64xf32>
    %153 = vector.broadcast %152 : vector<1x64xf32> to vector<2x64xf32>
    %154 = arith.addf %151, %153 : vector<2x64xf32>
    %155 = vector.extract_strided_slice %0 {offsets = [9, 0], sizes = [1, 64], strides = [1, 1]} : vector<40x128xf32> to vector<1x64xf32>
    %156 = vector.extract_strided_slice %0 {offsets = [10, 0], sizes = [1, 64], strides = [1, 1]} : vector<40x128xf32> to vector<1x64xf32>
    %cst_63 = arith.constant dense<0.000000e+00> : vector<64xf32>
    %157 = vector.multi_reduction <add>, %154, %cst_63 [0] : vector<2x64xf32> to vector<64xf32>
    %158 = vector.shape_cast %157 : vector<64xf32> to vector<1x64xf32>
    %159 = arith.mulf %154, %154 : vector<2x64xf32>
    %cst_64 = arith.constant dense<0.000000e+00> : vector<64xf32>
    %160 = vector.multi_reduction <add>, %159, %cst_64 [0] : vector<2x64xf32> to vector<64xf32>
    %161 = vector.shape_cast %160 : vector<64xf32> to vector<1x64xf32>
    %cst_65 = arith.constant 5.000000e-01 : f32
    %162 = vector.broadcast %cst_65 : f32 to vector<1x64xf32>
    %163 = arith.mulf %158, %162 : vector<1x64xf32>
    %cst_66 = arith.constant 5.000000e-01 : f32
    %164 = vector.broadcast %cst_66 : f32 to vector<1x64xf32>
    %165 = arith.mulf %161, %164 : vector<1x64xf32>
    %166 = arith.mulf %163, %163 : vector<1x64xf32>
    %167 = arith.subf %165, %166 : vector<1x64xf32>
    %cst_67 = arith.constant 9.99999974E-6 : f32
    %168 = vector.broadcast %cst_67 : f32 to vector<1x64xf32>
    %169 = arith.addf %167, %168 : vector<1x64xf32>
    %170 = math.rsqrt %169 : vector<1x64xf32>
    %171 = arith.mulf %155, %170 : vector<1x64xf32>
    %172 = vector.broadcast %171 : vector<1x64xf32> to vector<2x64xf32>
    %173 = arith.mulf %154, %172 : vector<2x64xf32>
    %174 = arith.mulf %163, %171 : vector<1x64xf32>
    %175 = arith.subf %156, %174 : vector<1x64xf32>
    %176 = vector.broadcast %175 : vector<1x64xf32> to vector<2x64xf32>
    %177 = arith.addf %173, %176 : vector<2x64xf32>
    %cst_68 = arith.constant 0.000000e+00 : f32
    %178 = vector.broadcast %cst_68 : f32 to vector<2x64xf32>
    %179 = arith.maximumf %177, %178 : vector<2x64xf32>
    %c1_69 = arith.constant 1 : index
    %c0_70 = arith.constant 0 : index
    %c0_71 = arith.constant 0 : index
    %180 = vector.load %arg9[%c1_69, %c0_70, %c0_71] : memref<8x64x64xbf16, #tpu.memory_space<vmem>>, vector<1x64x64xbf16>
    %181 = vector.shape_cast %180 : vector<1x64x64xbf16> to vector<64x64xbf16>
    %182 = arith.truncf %179 : vector<2x64xf32> to vector<2x64xbf16>
    %cst_72 = arith.constant dense<0.000000e+00> : vector<2x64xf32>
    %183 = tpu.matmul %182, %181, %cst_72 {dimension_numbers = #tpu.dot_dimension_numbers<[1], [0], [0], [1], [0, 0, 1, 1], [], []>} : vector<2x64xbf16>, vector<64x64xbf16>, vector<2x64xf32> -> vector<2x64xf32>
    %184 = vector.extract_strided_slice %0 {offsets = [11, 0], sizes = [1, 64], strides = [1, 1]} : vector<40x128xf32> to vector<1x64xf32>
    %185 = vector.broadcast %184 : vector<1x64xf32> to vector<2x64xf32>
    %186 = arith.addf %183, %185 : vector<2x64xf32>
    %187 = vector.extract_strided_slice %0 {offsets = [12, 0], sizes = [1, 64], strides = [1, 1]} : vector<40x128xf32> to vector<1x64xf32>
    %188 = vector.extract_strided_slice %0 {offsets = [13, 0], sizes = [1, 64], strides = [1, 1]} : vector<40x128xf32> to vector<1x64xf32>
    %cst_73 = arith.constant dense<0.000000e+00> : vector<64xf32>
    %189 = vector.multi_reduction <add>, %186, %cst_73 [0] : vector<2x64xf32> to vector<64xf32>
    %190 = vector.shape_cast %189 : vector<64xf32> to vector<1x64xf32>
    %191 = arith.mulf %186, %186 : vector<2x64xf32>
    %cst_74 = arith.constant dense<0.000000e+00> : vector<64xf32>
    %192 = vector.multi_reduction <add>, %191, %cst_74 [0] : vector<2x64xf32> to vector<64xf32>
    %193 = vector.shape_cast %192 : vector<64xf32> to vector<1x64xf32>
    %cst_75 = arith.constant 5.000000e-01 : f32
    %194 = vector.broadcast %cst_75 : f32 to vector<1x64xf32>
    %195 = arith.mulf %190, %194 : vector<1x64xf32>
    %cst_76 = arith.constant 5.000000e-01 : f32
    %196 = vector.broadcast %cst_76 : f32 to vector<1x64xf32>
    %197 = arith.mulf %193, %196 : vector<1x64xf32>
    %198 = arith.mulf %195, %195 : vector<1x64xf32>
    %199 = arith.subf %197, %198 : vector<1x64xf32>
    %cst_77 = arith.constant 9.99999974E-6 : f32
    %200 = vector.broadcast %cst_77 : f32 to vector<1x64xf32>
    %201 = arith.addf %199, %200 : vector<1x64xf32>
    %202 = math.rsqrt %201 : vector<1x64xf32>
    %203 = arith.mulf %187, %202 : vector<1x64xf32>
    %204 = vector.broadcast %203 : vector<1x64xf32> to vector<2x64xf32>
    %205 = arith.mulf %186, %204 : vector<2x64xf32>
    %206 = arith.mulf %195, %203 : vector<1x64xf32>
    %207 = arith.subf %188, %206 : vector<1x64xf32>
    %208 = vector.broadcast %207 : vector<1x64xf32> to vector<2x64xf32>
    %209 = arith.addf %205, %208 : vector<2x64xf32>
    %cst_78 = arith.constant 0.000000e+00 : f32
    %210 = vector.broadcast %cst_78 : f32 to vector<2x64xf32>
    %211 = arith.maximumf %209, %210 : vector<2x64xf32>
    %c2_79 = arith.constant 2 : index
    %c0_80 = arith.constant 0 : index
    %c0_81 = arith.constant 0 : index
    %212 = vector.load %arg9[%c2_79, %c0_80, %c0_81] : memref<8x64x64xbf16, #tpu.memory_space<vmem>>, vector<1x64x64xbf16>
    %213 = vector.shape_cast %212 : vector<1x64x64xbf16> to vector<64x64xbf16>
    %214 = arith.truncf %211 : vector<2x64xf32> to vector<2x64xbf16>
    %cst_82 = arith.constant dense<0.000000e+00> : vector<2x64xf32>
    %215 = tpu.matmul %214, %213, %cst_82 {dimension_numbers = #tpu.dot_dimension_numbers<[1], [0], [0], [1], [0, 0, 1, 1], [], []>} : vector<2x64xbf16>, vector<64x64xbf16>, vector<2x64xf32> -> vector<2x64xf32>
    %216 = vector.extract_strided_slice %0 {offsets = [14, 0], sizes = [1, 64], strides = [1, 1]} : vector<40x128xf32> to vector<1x64xf32>
    %217 = vector.broadcast %216 : vector<1x64xf32> to vector<2x64xf32>
    %218 = arith.addf %215, %217 : vector<2x64xf32>
    %219 = vector.extract_strided_slice %0 {offsets = [15, 0], sizes = [1, 64], strides = [1, 1]} : vector<40x128xf32> to vector<1x64xf32>
    %220 = vector.extract_strided_slice %0 {offsets = [16, 0], sizes = [1, 64], strides = [1, 1]} : vector<40x128xf32> to vector<1x64xf32>
    %cst_83 = arith.constant dense<0.000000e+00> : vector<64xf32>
    %221 = vector.multi_reduction <add>, %218, %cst_83 [0] : vector<2x64xf32> to vector<64xf32>
    %222 = vector.shape_cast %221 : vector<64xf32> to vector<1x64xf32>
    %223 = arith.mulf %218, %218 : vector<2x64xf32>
    %cst_84 = arith.constant dense<0.000000e+00> : vector<64xf32>
    %224 = vector.multi_reduction <add>, %223, %cst_84 [0] : vector<2x64xf32> to vector<64xf32>
    %225 = vector.shape_cast %224 : vector<64xf32> to vector<1x64xf32>
    %cst_85 = arith.constant 5.000000e-01 : f32
    %226 = vector.broadcast %cst_85 : f32 to vector<1x64xf32>
    %227 = arith.mulf %222, %226 : vector<1x64xf32>
    %cst_86 = arith.constant 5.000000e-01 : f32
    %228 = vector.broadcast %cst_86 : f32 to vector<1x64xf32>
    %229 = arith.mulf %225, %228 : vector<1x64xf32>
    %230 = arith.mulf %227, %227 : vector<1x64xf32>
    %231 = arith.subf %229, %230 : vector<1x64xf32>
    %cst_87 = arith.constant 9.99999974E-6 : f32
    %232 = vector.broadcast %cst_87 : f32 to vector<1x64xf32>
    %233 = arith.addf %231, %232 : vector<1x64xf32>
    %234 = math.rsqrt %233 : vector<1x64xf32>
    %235 = arith.mulf %219, %234 : vector<1x64xf32>
    %236 = vector.broadcast %235 : vector<1x64xf32> to vector<2x64xf32>
    %237 = arith.mulf %218, %236 : vector<2x64xf32>
    %238 = arith.mulf %227, %235 : vector<1x64xf32>
    %239 = arith.subf %220, %238 : vector<1x64xf32>
    %240 = vector.broadcast %239 : vector<1x64xf32> to vector<2x64xf32>
    %241 = arith.addf %237, %240 : vector<2x64xf32>
    %cst_88 = arith.constant 0.000000e+00 : f32
    %242 = vector.broadcast %cst_88 : f32 to vector<2x64xf32>
    %243 = arith.maximumf %241, %242 : vector<2x64xf32>
    %c3 = arith.constant 3 : index
    %c0_89 = arith.constant 0 : index
    %c0_90 = arith.constant 0 : index
    %244 = vector.load %arg9[%c3, %c0_89, %c0_90] : memref<8x64x64xbf16, #tpu.memory_space<vmem>>, vector<1x64x64xbf16>
    %245 = vector.shape_cast %244 : vector<1x64x64xbf16> to vector<64x64xbf16>
    %246 = arith.truncf %243 : vector<2x64xf32> to vector<2x64xbf16>
    %cst_91 = arith.constant dense<0.000000e+00> : vector<2x64xf32>
    %247 = tpu.matmul %246, %245, %cst_91 {dimension_numbers = #tpu.dot_dimension_numbers<[1], [0], [0], [1], [0, 0, 1, 1], [], []>} : vector<2x64xbf16>, vector<64x64xbf16>, vector<2x64xf32> -> vector<2x64xf32>
    %248 = vector.extract_strided_slice %0 {offsets = [17, 0], sizes = [1, 64], strides = [1, 1]} : vector<40x128xf32> to vector<1x64xf32>
    %249 = vector.broadcast %248 : vector<1x64xf32> to vector<2x64xf32>
    %250 = arith.addf %247, %249 : vector<2x64xf32>
    %251 = vector.extract_strided_slice %0 {offsets = [18, 0], sizes = [1, 64], strides = [1, 1]} : vector<40x128xf32> to vector<1x64xf32>
    %252 = vector.extract_strided_slice %0 {offsets = [19, 0], sizes = [1, 64], strides = [1, 1]} : vector<40x128xf32> to vector<1x64xf32>
    %cst_92 = arith.constant dense<0.000000e+00> : vector<64xf32>
    %253 = vector.multi_reduction <add>, %250, %cst_92 [0] : vector<2x64xf32> to vector<64xf32>
    %254 = vector.shape_cast %253 : vector<64xf32> to vector<1x64xf32>
    %255 = arith.mulf %250, %250 : vector<2x64xf32>
    %cst_93 = arith.constant dense<0.000000e+00> : vector<64xf32>
    %256 = vector.multi_reduction <add>, %255, %cst_93 [0] : vector<2x64xf32> to vector<64xf32>
    %257 = vector.shape_cast %256 : vector<64xf32> to vector<1x64xf32>
    %cst_94 = arith.constant 5.000000e-01 : f32
    %258 = vector.broadcast %cst_94 : f32 to vector<1x64xf32>
    %259 = arith.mulf %254, %258 : vector<1x64xf32>
    %cst_95 = arith.constant 5.000000e-01 : f32
    %260 = vector.broadcast %cst_95 : f32 to vector<1x64xf32>
    %261 = arith.mulf %257, %260 : vector<1x64xf32>
    %262 = arith.mulf %259, %259 : vector<1x64xf32>
    %263 = arith.subf %261, %262 : vector<1x64xf32>
    %cst_96 = arith.constant 9.99999974E-6 : f32
    %264 = vector.broadcast %cst_96 : f32 to vector<1x64xf32>
    %265 = arith.addf %263, %264 : vector<1x64xf32>
    %266 = math.rsqrt %265 : vector<1x64xf32>
    %267 = arith.mulf %251, %266 : vector<1x64xf32>
    %268 = vector.broadcast %267 : vector<1x64xf32> to vector<2x64xf32>
    %269 = arith.mulf %250, %268 : vector<2x64xf32>
    %270 = arith.mulf %259, %267 : vector<1x64xf32>
    %271 = arith.subf %252, %270 : vector<1x64xf32>
    %272 = vector.broadcast %271 : vector<1x64xf32> to vector<2x64xf32>
    %273 = arith.addf %269, %272 : vector<2x64xf32>
    %cst_97 = arith.constant 0.000000e+00 : f32
    %274 = vector.broadcast %cst_97 : f32 to vector<2x64xf32>
    %275 = arith.maximumf %273, %274 : vector<2x64xf32>
    %c4 = arith.constant 4 : index
    %c0_98 = arith.constant 0 : index
    %c0_99 = arith.constant 0 : index
    %276 = vector.load %arg9[%c4, %c0_98, %c0_99] : memref<8x64x64xbf16, #tpu.memory_space<vmem>>, vector<1x64x64xbf16>
    %277 = vector.shape_cast %276 : vector<1x64x64xbf16> to vector<64x64xbf16>
    %278 = arith.truncf %275 : vector<2x64xf32> to vector<2x64xbf16>
    %cst_100 = arith.constant dense<0.000000e+00> : vector<2x64xf32>
    %279 = tpu.matmul %278, %277, %cst_100 {dimension_numbers = #tpu.dot_dimension_numbers<[1], [0], [0], [1], [0, 0, 1, 1], [], []>} : vector<2x64xbf16>, vector<64x64xbf16>, vector<2x64xf32> -> vector<2x64xf32>
    %280 = vector.extract_strided_slice %0 {offsets = [20, 0], sizes = [1, 64], strides = [1, 1]} : vector<40x128xf32> to vector<1x64xf32>
    %281 = vector.broadcast %280 : vector<1x64xf32> to vector<2x64xf32>
    %282 = arith.addf %279, %281 : vector<2x64xf32>
    %283 = vector.extract_strided_slice %0 {offsets = [21, 0], sizes = [1, 64], strides = [1, 1]} : vector<40x128xf32> to vector<1x64xf32>
    %284 = vector.extract_strided_slice %0 {offsets = [22, 0], sizes = [1, 64], strides = [1, 1]} : vector<40x128xf32> to vector<1x64xf32>
    %cst_101 = arith.constant dense<0.000000e+00> : vector<64xf32>
    %285 = vector.multi_reduction <add>, %282, %cst_101 [0] : vector<2x64xf32> to vector<64xf32>
    %286 = vector.shape_cast %285 : vector<64xf32> to vector<1x64xf32>
    %287 = arith.mulf %282, %282 : vector<2x64xf32>
    %cst_102 = arith.constant dense<0.000000e+00> : vector<64xf32>
    %288 = vector.multi_reduction <add>, %287, %cst_102 [0] : vector<2x64xf32> to vector<64xf32>
    %289 = vector.shape_cast %288 : vector<64xf32> to vector<1x64xf32>
    %cst_103 = arith.constant 5.000000e-01 : f32
    %290 = vector.broadcast %cst_103 : f32 to vector<1x64xf32>
    %291 = arith.mulf %286, %290 : vector<1x64xf32>
    %cst_104 = arith.constant 5.000000e-01 : f32
    %292 = vector.broadcast %cst_104 : f32 to vector<1x64xf32>
    %293 = arith.mulf %289, %292 : vector<1x64xf32>
    %294 = arith.mulf %291, %291 : vector<1x64xf32>
    %295 = arith.subf %293, %294 : vector<1x64xf32>
    %cst_105 = arith.constant 9.99999974E-6 : f32
    %296 = vector.broadcast %cst_105 : f32 to vector<1x64xf32>
    %297 = arith.addf %295, %296 : vector<1x64xf32>
    %298 = math.rsqrt %297 : vector<1x64xf32>
    %299 = arith.mulf %283, %298 : vector<1x64xf32>
    %300 = vector.broadcast %299 : vector<1x64xf32> to vector<2x64xf32>
    %301 = arith.mulf %282, %300 : vector<2x64xf32>
    %302 = arith.mulf %291, %299 : vector<1x64xf32>
    %303 = arith.subf %284, %302 : vector<1x64xf32>
    %304 = vector.broadcast %303 : vector<1x64xf32> to vector<2x64xf32>
    %305 = arith.addf %301, %304 : vector<2x64xf32>
    %cst_106 = arith.constant 0.000000e+00 : f32
    %306 = vector.broadcast %cst_106 : f32 to vector<2x64xf32>
    %307 = arith.maximumf %305, %306 : vector<2x64xf32>
    %c5 = arith.constant 5 : index
    %c0_107 = arith.constant 0 : index
    %c0_108 = arith.constant 0 : index
    %308 = vector.load %arg9[%c5, %c0_107, %c0_108] : memref<8x64x64xbf16, #tpu.memory_space<vmem>>, vector<1x64x64xbf16>
    %309 = vector.shape_cast %308 : vector<1x64x64xbf16> to vector<64x64xbf16>
    %310 = arith.truncf %307 : vector<2x64xf32> to vector<2x64xbf16>
    %cst_109 = arith.constant dense<0.000000e+00> : vector<2x64xf32>
    %311 = tpu.matmul %310, %309, %cst_109 {dimension_numbers = #tpu.dot_dimension_numbers<[1], [0], [0], [1], [0, 0, 1, 1], [], []>} : vector<2x64xbf16>, vector<64x64xbf16>, vector<2x64xf32> -> vector<2x64xf32>
    %312 = vector.extract_strided_slice %0 {offsets = [23, 0], sizes = [1, 64], strides = [1, 1]} : vector<40x128xf32> to vector<1x64xf32>
    %313 = vector.broadcast %312 : vector<1x64xf32> to vector<2x64xf32>
    %314 = arith.addf %311, %313 : vector<2x64xf32>
    %315 = vector.extract_strided_slice %0 {offsets = [24, 0], sizes = [1, 64], strides = [1, 1]} : vector<40x128xf32> to vector<1x64xf32>
    %316 = vector.extract_strided_slice %0 {offsets = [25, 0], sizes = [1, 64], strides = [1, 1]} : vector<40x128xf32> to vector<1x64xf32>
    %cst_110 = arith.constant dense<0.000000e+00> : vector<64xf32>
    %317 = vector.multi_reduction <add>, %314, %cst_110 [0] : vector<2x64xf32> to vector<64xf32>
    %318 = vector.shape_cast %317 : vector<64xf32> to vector<1x64xf32>
    %319 = arith.mulf %314, %314 : vector<2x64xf32>
    %cst_111 = arith.constant dense<0.000000e+00> : vector<64xf32>
    %320 = vector.multi_reduction <add>, %319, %cst_111 [0] : vector<2x64xf32> to vector<64xf32>
    %321 = vector.shape_cast %320 : vector<64xf32> to vector<1x64xf32>
    %cst_112 = arith.constant 5.000000e-01 : f32
    %322 = vector.broadcast %cst_112 : f32 to vector<1x64xf32>
    %323 = arith.mulf %318, %322 : vector<1x64xf32>
    %cst_113 = arith.constant 5.000000e-01 : f32
    %324 = vector.broadcast %cst_113 : f32 to vector<1x64xf32>
    %325 = arith.mulf %321, %324 : vector<1x64xf32>
    %326 = arith.mulf %323, %323 : vector<1x64xf32>
    %327 = arith.subf %325, %326 : vector<1x64xf32>
    %cst_114 = arith.constant 9.99999974E-6 : f32
    %328 = vector.broadcast %cst_114 : f32 to vector<1x64xf32>
    %329 = arith.addf %327, %328 : vector<1x64xf32>
    %330 = math.rsqrt %329 : vector<1x64xf32>
    %331 = arith.mulf %315, %330 : vector<1x64xf32>
    %332 = vector.broadcast %331 : vector<1x64xf32> to vector<2x64xf32>
    %333 = arith.mulf %314, %332 : vector<2x64xf32>
    %334 = arith.mulf %323, %331 : vector<1x64xf32>
    %335 = arith.subf %316, %334 : vector<1x64xf32>
    %336 = vector.broadcast %335 : vector<1x64xf32> to vector<2x64xf32>
    %337 = arith.addf %333, %336 : vector<2x64xf32>
    %cst_115 = arith.constant 0.000000e+00 : f32
    %338 = vector.broadcast %cst_115 : f32 to vector<2x64xf32>
    %339 = arith.maximumf %337, %338 : vector<2x64xf32>
    %c6 = arith.constant 6 : index
    %c0_116 = arith.constant 0 : index
    %c0_117 = arith.constant 0 : index
    %340 = vector.load %arg9[%c6, %c0_116, %c0_117] : memref<8x64x64xbf16, #tpu.memory_space<vmem>>, vector<1x64x64xbf16>
    %341 = vector.shape_cast %340 : vector<1x64x64xbf16> to vector<64x64xbf16>
    %342 = arith.truncf %339 : vector<2x64xf32> to vector<2x64xbf16>
    %cst_118 = arith.constant dense<0.000000e+00> : vector<2x64xf32>
    %343 = tpu.matmul %342, %341, %cst_118 {dimension_numbers = #tpu.dot_dimension_numbers<[1], [0], [0], [1], [0, 0, 1, 1], [], []>} : vector<2x64xbf16>, vector<64x64xbf16>, vector<2x64xf32> -> vector<2x64xf32>
    %344 = vector.extract_strided_slice %0 {offsets = [26, 0], sizes = [1, 64], strides = [1, 1]} : vector<40x128xf32> to vector<1x64xf32>
    %345 = vector.broadcast %344 : vector<1x64xf32> to vector<2x64xf32>
    %346 = arith.addf %343, %345 : vector<2x64xf32>
    %347 = vector.extract_strided_slice %0 {offsets = [27, 0], sizes = [1, 64], strides = [1, 1]} : vector<40x128xf32> to vector<1x64xf32>
    %348 = vector.extract_strided_slice %0 {offsets = [28, 0], sizes = [1, 64], strides = [1, 1]} : vector<40x128xf32> to vector<1x64xf32>
    %cst_119 = arith.constant dense<0.000000e+00> : vector<64xf32>
    %349 = vector.multi_reduction <add>, %346, %cst_119 [0] : vector<2x64xf32> to vector<64xf32>
    %350 = vector.shape_cast %349 : vector<64xf32> to vector<1x64xf32>
    %351 = arith.mulf %346, %346 : vector<2x64xf32>
    %cst_120 = arith.constant dense<0.000000e+00> : vector<64xf32>
    %352 = vector.multi_reduction <add>, %351, %cst_120 [0] : vector<2x64xf32> to vector<64xf32>
    %353 = vector.shape_cast %352 : vector<64xf32> to vector<1x64xf32>
    %cst_121 = arith.constant 5.000000e-01 : f32
    %354 = vector.broadcast %cst_121 : f32 to vector<1x64xf32>
    %355 = arith.mulf %350, %354 : vector<1x64xf32>
    %cst_122 = arith.constant 5.000000e-01 : f32
    %356 = vector.broadcast %cst_122 : f32 to vector<1x64xf32>
    %357 = arith.mulf %353, %356 : vector<1x64xf32>
    %358 = arith.mulf %355, %355 : vector<1x64xf32>
    %359 = arith.subf %357, %358 : vector<1x64xf32>
    %cst_123 = arith.constant 9.99999974E-6 : f32
    %360 = vector.broadcast %cst_123 : f32 to vector<1x64xf32>
    %361 = arith.addf %359, %360 : vector<1x64xf32>
    %362 = math.rsqrt %361 : vector<1x64xf32>
    %363 = arith.mulf %347, %362 : vector<1x64xf32>
    %364 = vector.broadcast %363 : vector<1x64xf32> to vector<2x64xf32>
    %365 = arith.mulf %346, %364 : vector<2x64xf32>
    %366 = arith.mulf %355, %363 : vector<1x64xf32>
    %367 = arith.subf %348, %366 : vector<1x64xf32>
    %368 = vector.broadcast %367 : vector<1x64xf32> to vector<2x64xf32>
    %369 = arith.addf %365, %368 : vector<2x64xf32>
    %cst_124 = arith.constant 0.000000e+00 : f32
    %370 = vector.broadcast %cst_124 : f32 to vector<2x64xf32>
    %371 = arith.maximumf %369, %370 : vector<2x64xf32>
    %c7 = arith.constant 7 : index
    %c0_125 = arith.constant 0 : index
    %c0_126 = arith.constant 0 : index
    %372 = vector.load %arg9[%c7, %c0_125, %c0_126] : memref<8x64x64xbf16, #tpu.memory_space<vmem>>, vector<1x64x64xbf16>
    %373 = vector.shape_cast %372 : vector<1x64x64xbf16> to vector<64x64xbf16>
    %374 = arith.truncf %371 : vector<2x64xf32> to vector<2x64xbf16>
    %cst_127 = arith.constant dense<0.000000e+00> : vector<2x64xf32>
    %375 = tpu.matmul %374, %373, %cst_127 {dimension_numbers = #tpu.dot_dimension_numbers<[1], [0], [0], [1], [0, 0, 1, 1], [], []>} : vector<2x64xbf16>, vector<64x64xbf16>, vector<2x64xf32> -> vector<2x64xf32>
    %376 = vector.extract_strided_slice %0 {offsets = [29, 0], sizes = [1, 64], strides = [1, 1]} : vector<40x128xf32> to vector<1x64xf32>
    %377 = vector.broadcast %376 : vector<1x64xf32> to vector<2x64xf32>
    %378 = arith.addf %375, %377 : vector<2x64xf32>
    %379 = vector.extract_strided_slice %0 {offsets = [30, 0], sizes = [1, 64], strides = [1, 1]} : vector<40x128xf32> to vector<1x64xf32>
    %380 = vector.extract_strided_slice %0 {offsets = [31, 0], sizes = [1, 64], strides = [1, 1]} : vector<40x128xf32> to vector<1x64xf32>
    %cst_128 = arith.constant dense<0.000000e+00> : vector<64xf32>
    %381 = vector.multi_reduction <add>, %378, %cst_128 [0] : vector<2x64xf32> to vector<64xf32>
    %382 = vector.shape_cast %381 : vector<64xf32> to vector<1x64xf32>
    %383 = arith.mulf %378, %378 : vector<2x64xf32>
    %cst_129 = arith.constant dense<0.000000e+00> : vector<64xf32>
    %384 = vector.multi_reduction <add>, %383, %cst_129 [0] : vector<2x64xf32> to vector<64xf32>
    %385 = vector.shape_cast %384 : vector<64xf32> to vector<1x64xf32>
    %cst_130 = arith.constant 5.000000e-01 : f32
    %386 = vector.broadcast %cst_130 : f32 to vector<1x64xf32>
    %387 = arith.mulf %382, %386 : vector<1x64xf32>
    %cst_131 = arith.constant 5.000000e-01 : f32
    %388 = vector.broadcast %cst_131 : f32 to vector<1x64xf32>
    %389 = arith.mulf %385, %388 : vector<1x64xf32>
    %390 = arith.mulf %387, %387 : vector<1x64xf32>
    %391 = arith.subf %389, %390 : vector<1x64xf32>
    %cst_132 = arith.constant 9.99999974E-6 : f32
    %392 = vector.broadcast %cst_132 : f32 to vector<1x64xf32>
    %393 = arith.addf %391, %392 : vector<1x64xf32>
    %394 = math.rsqrt %393 : vector<1x64xf32>
    %395 = arith.mulf %379, %394 : vector<1x64xf32>
    %396 = vector.broadcast %395 : vector<1x64xf32> to vector<2x64xf32>
    %397 = arith.mulf %378, %396 : vector<2x64xf32>
    %398 = arith.mulf %387, %395 : vector<1x64xf32>
    %399 = arith.subf %380, %398 : vector<1x64xf32>
    %400 = vector.broadcast %399 : vector<1x64xf32> to vector<2x64xf32>
    %401 = arith.addf %397, %400 : vector<2x64xf32>
    %cst_133 = arith.constant 0.000000e+00 : f32
    %402 = vector.broadcast %cst_133 : f32 to vector<2x64xf32>
    %403 = arith.maximumf %401, %402 : vector<2x64xf32>
    %c1_134 = arith.constant 1 : index
    %c0_135 = arith.constant 0 : index
    %c0_136 = arith.constant 0 : index
    %404 = vector.load %arg7[%c1_134, %c0_135, %c0_136] : memref<2x64x128xbf16, #tpu.memory_space<vmem>>, vector<1x64x128xbf16>
    %405 = vector.shape_cast %404 : vector<1x64x128xbf16> to vector<64x128xbf16>
    %406 = arith.truncf %403 : vector<2x64xf32> to vector<2x64xbf16>
    %cst_137 = arith.constant dense<0.000000e+00> : vector<2x128xf32>
    %407 = tpu.matmul %406, %405, %cst_137 {dimension_numbers = #tpu.dot_dimension_numbers<[1], [0], [0], [1], [0, 0, 1, 1], [], []>} : vector<2x64xbf16>, vector<64x128xbf16>, vector<2x128xf32> -> vector<2x128xf32>
    %408 = vector.extract_strided_slice %0 {offsets = [32, 0], sizes = [1, 128], strides = [1, 1]} : vector<40x128xf32> to vector<1x128xf32>
    %409 = vector.broadcast %408 : vector<1x128xf32> to vector<2x128xf32>
    %410 = arith.addf %407, %409 : vector<2x128xf32>
    %411 = vector.extract_strided_slice %410 {offsets = [0, 0], sizes = [2, 3], strides = [1, 1]} : vector<2x128xf32> to vector<2x3xf32>
    %c0_138 = arith.constant 0 : index
    %c0_139 = arith.constant 0 : index
    %412 = vector.load %arg11[%c0_138, %c0_139] : memref<2x3xf32, #tpu.memory_space<vmem>>, vector<2x3xf32>
    tpu.vector_store %arg11[%c0_138, %c0_139], %411 {strides = array<i32>} : memref<2x3xf32, #tpu.memory_space<vmem>>, vector<2x3xf32>,
    return
  }
}

</mosaic_0001>

<bundles_post_ra>
// kernel: profile_forward_3d.1
= control target key start
LH: loop header
LB: loop body
LE: loop exit
PB: predicated region body
PF: predicated region fallthrough
CT: control target
= control target key end

     0   :  { %vm308_vm0 = vcmask 1043456   ;;  %vm109_vm1 = vcmask 23552   ;;  %vm211_vm2 = vcmask 64512   ;;  %s8398_s0 = inlined_call_operand.vmem [shape: f32[6,128], index: 0, kind: input, shape index: {}]   ;;  %s8399_s1 = inlined_call_operand.vmem [shape: f32[2,1], index: 1, kind: input, shape index: {}]   ;;  %s8400_s2 = inlined_call_operand.vmem [shape: f32[2,2], index: 2, kind: input, shape index: {}]   ;;  %s8401_s3 = inlined_call_operand.vmem [shape: f32[2,1], index: 3, kind: input, shape index: {}]   ;;  %s8402_s4 = inlined_call_operand.vmem [shape: f32[512,3], index: 4, kind: input, shape index: {}]   ;;  %s8403_s5 = inlined_call_operand.vmem [shape: bf16[8,64], index: 5, kind: input, shape index: {}]   ;;  %s8404_s6 = inlined_call_operand.vmem [shape: bf16[3,128,64], index: 6, kind: input, shape index: {}]   ;;  %s8405_s7 = inlined_call_operand.vmem [shape: bf16[2,64,128], index: 7, kind: input, shape index: {}]   ;;  %s8406_s8 = inlined_call_operand.vmem [shape: bf16[256,128], index: 8, kind: input, shape index: {}]   ;;  %s8407_s9 = inlined_call_operand.vmem [shape: bf16[8,64,64], index: 9, kind: input, shape index: {}]   ;;  %s8408_s10 = inlined_call_operand.vmem [shape: f32[40,128], index: 10, kind: input, shape index: {}]   ;;  %s8409_s11 = inlined_call_operand.hbm [shape: f32[2,3], index: 11, kind: output, shape index: {}]  }
   0x1   :  { %v174_v0 = vld [vmem:[%s8403_s5] sm:$0xf]  ;;  %v46_v2 = vld [vmem:[%s8402_s4 + $0x8] sm:$0xff]  ;;  %v47_v6 = vld [vmem:[%s8402_s4 + $0x10] sm:$0xff] }
   0x2   :  { %v45_v1 = vld [vmem:[%s8402_s4] sm:$0xff]  ;;  %6087 = vmatprep.subr.msk.bf16.mxu0 %vm308_vm0, %v174_v0  ;;  %v310_v3 = vsel %vm308_vm0, %v174_v0, 0  ;;  %v111_v5 = vsel %vm109_vm1, %v46_v2, 0.0  ;;  %v48_v7 = vld [vmem:[%s8402_s4 + $0x18] sm:$0xff]  ;;  %v112_v9 = vsel %vm109_vm1, %v47_v6, 0.0  ;;  %v50_v12 = vld [vmem:[%s8402_s4 + $0x28] sm:$0xff] }
   0x3   :  { %v110_v4 = vsel %vm109_vm1, %v45_v1, 0.0  ;;  %5722 = vmatpush3.bf16.msra.mxu0 %v310_v3  ;;  %v113_v10 = vsel %vm109_vm1, %v48_v7, 0.0  ;;  %v49_v11 = vld [vmem:[%s8402_s4 + $0x20] sm:$0xff]  ;;  %v115_v15 = vsel %vm109_vm1, %v50_v12, 0.0  ;;  %v51_v16 = vld [vmem:[%s8402_s4 + $0x30] sm:$0xff]  ;;  %v52_v17 = vld [vmem:[%s8402_s4 + $0x38] sm:$0xff] }
   0x4   :  { %v175_v8 = vpack.c.bf16 %v111_v5, %v110_v4  ;;  %v176_v13 = vpack.c.bf16 %v113_v10, %v112_v9  ;;  %v114_v14 = vsel %vm109_vm1, %v49_v11, 0.0  ;;  %v53_v19 = vld [vmem:[%s8402_s4 + $0x40] sm:$0xff]  ;;  %v54_v20 = vld [vmem:[%s8402_s4 + $0x48] sm:$0xff]  ;;  %v116_v21 = vsel %vm109_vm1, %v51_v16, 0.0  ;;  %v55_v27 = vld [vmem:[%s8402_s4 + $0x50] sm:$0xff] }
   0x5   :  { %v177_v18 = vpack.c.bf16 %v115_v15, %v114_v14  ;;  %v117_v22 = vsel %vm109_vm1, %v52_v17, 0.0  ;;  %v118_v23 = vsel %vm109_vm1, %v53_v19, 0.0  ;;  %v119_v24 = vsel %vm109_vm1, %v54_v20, 0.0  ;;  %v56_v28 = vld [vmem:[%s8402_s4 + $0x58] sm:$0xff]  ;;  %v57_v29 = vld [vmem:[%s8402_s4 + $0x60] sm:$0xff]  ;;  %v58_v30 = vld [vmem:[%s8402_s4 + $0x68] sm:$0xff] }
   0x6   :  { %5723 = vmatprep.mubr.msk.bf16.mxu0 %vm211_vm2, %v175_v8  ;;  %v178_v25 = vpack.c.bf16 %v117_v22, %v116_v21  ;;  %v179_v26 = vpack.c.bf16 %v119_v24, %v118_v23  ;;  %v59_v31 = vld [vmem:[%s8402_s4 + $0x70] sm:$0xff]  ;;  %v60_v32 = vld [vmem:[%s8402_s4 + $0x78] sm:$0xff]  ;;  %v61_v33 = vld [vmem:[%s8402_s4 + $0x80] sm:$0xff]  ;;  %v120_v34 = vsel %vm109_vm1, %v55_v27, 0.0  ;;  %v121_v35 = vsel %vm109_vm1, %v56_v28, 0.0 }
   0x7   :  { %5724 = vmatmul.mubr.msk.bf16.vlgmr.msra.gmra.mrb[0].mxu0 %vm211_vm2, %v176_v13  ;;  %v62_v36 = vld [vmem:[%s8402_s4 + $0x88] sm:$0xff]  ;;  %v63_v37 = vld [vmem:[%s8402_s4 + $0x90] sm:$0xff]  ;;  %v64_v38 = vld [vmem:[%s8402_s4 + $0x98] sm:$0xff]  ;;  %v122_v39 = vsel %vm109_vm1, %v57_v29, 0.0  ;;  %v123_v40 = vsel %vm109_vm1, %v58_v30, 0.0  ;;  %v124_v44 = vsel %vm109_vm1, %v59_v31, 0.0  ;;  %v180_v49 = vpack.c.bf16 %v121_v35, %v120_v34 }
   0x8   :  { %5727 = vmatprep.mubr.msk.bf16.mxu0 %vm211_vm2, %v177_v18  ;;  %v65_v41 = vld [vmem:[%s8402_s4 + $0xa0] sm:$0xff]  ;;  %v66_v42 = vld [vmem:[%s8402_s4 + $0xa8] sm:$0xff]  ;;  %v67_v43 = vld [vmem:[%s8402_s4 + $0xb0] sm:$0xff]  ;;  %v125_v45 = vsel %vm109_vm1, %v60_v32, 0.0  ;;  %v126_v50 = vsel %vm109_vm1, %v61_v33, 0.0  ;;  %v127_v51 = vsel %vm109_vm1, %v62_v36, 0.0  ;;  %v181_v56 = vpack.c.bf16 %v123_v40, %v122_v39 }
   0x9   :  { %v68_v46 = vld [vmem:[%s8402_s4 + $0xb8] sm:$0xff]  ;;  %v69_v47 = vld [vmem:[%s8402_s4 + $0xc0] sm:$0xff]  ;;  %v70_v48 = vld [vmem:[%s8402_s4 + $0xc8] sm:$0xff]  ;;  %v128_v52 = vsel %vm109_vm1, %v63_v37, 0.0  ;;  %v129_v57 = vsel %vm109_vm1, %v64_v38, 0.0  ;;  %v130_v58 = vsel %vm109_vm1, %v65_v41, 0.0  ;;  %v182_v23 = vpack.c.bf16 %v125_v45, %v124_v44 }
   0xa   :  { %v71_v53 = vld [vmem:[%s8402_s4 + $0xd0] sm:$0xff]  ;;  %v72_v54 = vld [vmem:[%s8402_s4 + $0xd8] sm:$0xff]  ;;  %v73_v55 = vld [vmem:[%s8402_s4 + $0xe0] sm:$0xff]  ;;  %v131_v59 = vsel %vm109_vm1, %v66_v42, 0.0  ;;  %v132_v63 = vsel %vm109_vm1, %v67_v43, 0.0  ;;  %v133_v0 = vsel %vm109_vm1, %v68_v46, 0.0  ;;  %v183_v32 = vpack.c.bf16 %v127_v51, %v126_v50 }
   0xb   :  { %v74_v60 = vld [vmem:[%s8402_s4 + $0xe8] sm:$0xff]  ;;  %v75_v61 = vld [vmem:[%s8402_s4 + $0xf0] sm:$0xff]  ;;  %v76_v62 = vld [vmem:[%s8402_s4 + $0xf8] sm:$0xff]  ;;  %v134_v1 = vsel %vm109_vm1, %v69_v47, 0.0  ;;  %v135_v5 = vsel %vm109_vm1, %v70_v48, 0.0  ;;  %v136_v6 = vsel %vm109_vm1, %v71_v53, 0.0  ;;  %v184_v33 = vpack.c.bf16 %v129_v57, %v128_v52 }
   0xc   :  { %v77_v2 = vld [vmem:[%s8402_s4 + $0x100] sm:$0xff]  ;;  %v78_v3 = vld [vmem:[%s8402_s4 + $0x108] sm:$0xff]  ;;  %v79_v4 = vld [vmem:[%s8402_s4 + $0x110] sm:$0xff]  ;;  %v137_v7 = vsel %vm109_vm1, %v72_v54, 0.0  ;;  %v138_v11 = vsel %vm109_vm1, %v73_v55, 0.0  ;;  %v139_v12 = vsel %vm109_vm1, %v74_v60, 0.0  ;;  %v185_v34 = vpack.c.bf16 %v131_v59, %v130_v58 }
   0xd   :  { %v80_v8 = vld [vmem:[%s8402_s4 + $0x118] sm:$0xff]  ;;  %v81_v9 = vld [vmem:[%s8402_s4 + $0x120] sm:$0xff]  ;;  %v82_v10 = vld [vmem:[%s8402_s4 + $0x128] sm:$0xff]  ;;  %v140_v13 = vsel %vm109_vm1, %v75_v61, 0.0  ;;  %v141_v17 = vsel %vm109_vm1, %v76_v62, 0.0  ;;  %v142_v18 = vsel %vm109_vm1, %v77_v2, 0.0  ;;  %v186_v35 = vpack.c.bf16 %v133_v0, %v132_v63 }
   0xe   :  { %v83_v14 = vld [vmem:[%s8402_s4 + $0x130] sm:$0xff]  ;;  %v84_v15 = vld [vmem:[%s8402_s4 + $0x138] sm:$0xff]  ;;  %v85_v16 = vld [vmem:[%s8402_s4 + $0x140] sm:$0xff]  ;;  %v143_v21 = vsel %vm109_vm1, %v78_v3, 0.0  ;;  %v144_v22 = vsel %vm109_vm1, %v79_v4, 0.0  ;;  %v145_v24 = vsel %vm109_vm1, %v80_v8, 0.0  ;;  %v187_v36 = vpack.c.bf16 %v135_v5, %v134_v1 }
   0xf   :  { %5728 = vmatmul.mubr.msk.bf16.gmra.mrb[4].mxu0 %vm211_vm2, %v178_v25  ;;  %v86_v19 = vld [vmem:[%s8402_s4 + $0x148] sm:$0xff]  ;;  %v6158_v20 = vld [vmem:[%s8405_s7] sm:$0xff]   ;;  %v146_v25 = vsel %vm109_vm1, %v81_v9, 0.0  ;;  %v148_v28 = vsel %vm109_vm1, %v83_v14, 0.0  ;;  %v149_v29 = vsel %vm109_vm1, %v84_v15, 0.0  ;;  %v150_v30 = vsel %vm109_vm1, %v85_v16, 0.0 }
  0x10   :  { %5731 = vmatprep.mubr.msk.bf16.mxu0 %vm211_vm2, %v179_v26  ;;  %v147_v26 = vsel %vm109_vm1, %v82_v10, 0.0  ;;  %5787 = vmatprep.subr.bf16.mxu1 %v6158_v20  ;;  %v6159_v27 = vld [vmem:[%s8405_s7 + $0x8] sm:$0xff]   ;;  %v151_v31 = vsel %vm109_vm1, %v86_v19, 0.0  ;;  %v188_v37 = vpack.c.bf16 %v137_v7, %v136_v6  ;;  %v189_v38 = vpack.c.bf16 %v139_v12, %v138_v11  ;;  %v87_v44 = vld [vmem:[%s8402_s4 + $0x150] sm:$0xff]  ;;  %v88_v45 = vld [vmem:[%s8402_s4 + $0x158] sm:$0xff] }
  0x11   :  { %5788 = vmatpush3.bf16.msra.mxu1 %v6158_v20  ;;  %v190_v39 = vpack.c.bf16 %v141_v17, %v140_v13  ;;  %v191_v40 = vpack.c.bf16 %v143_v21, %v142_v18  ;;  %v192_v41 = vpack.c.bf16 %v145_v24, %v144_v22  ;;  %v193_v42 = vpack.c.bf16 %v147_v26, %v146_v25  ;;  %v89_v47 = vld [vmem:[%s8402_s4 + $0x160] sm:$0xff]  ;;  %v90_v48 = vld [vmem:[%s8402_s4 + $0x168] sm:$0xff] }
  0x12   :  { %5789 = vmatprep.subr.bf16.mxu1 %v6159_v27  ;;  %v194_v43 = vpack.c.bf16 %v149_v29, %v148_v28  ;;  %v195_v46 = vpack.c.bf16 %v151_v31, %v150_v30 }
  0x15   :  { %5790 = vmatpush3.bf16.msra.mxu1 %v6159_v27 }
  0x17   :  { %5732 = vmatmul.mubr.msk.bf16.gmra.mrb[8].mxu0 %vm211_vm2, %v180_v49 }
  0x18   :  { %5735 = vmatprep.mubr.msk.bf16.mxu0 %vm211_vm2, %v181_v56 }
  0x1f   :  { %5736 = vmatmul.mubr.msk.bf16.gmra.mrb[12].mxu0 %vm211_vm2, %v182_v23 }
  0x20   :  { %5739 = vmatprep.mubr.msk.bf16.mxu0 %vm211_vm2, %v183_v32 }
  0x27   :  { %5740 = vmatmul.mubr.msk.bf16.gmra.mrb[16].mxu0 %vm211_vm2, %v184_v33 }
  0x28   :  { %5743 = vmatprep.mubr.msk.bf16.mxu0 %vm211_vm2, %v185_v34 }
  0x2f   :  { %5744 = vmatmul.mubr.msk.bf16.gmra.mrb[20].mxu0 %vm211_vm2, %v186_v35 }
  0x30   :  { %5747 = vmatprep.mubr.msk.bf16.mxu0 %vm211_vm2, %v187_v36 }
  0x37   :  { %5748 = vmatmul.mubr.msk.bf16.gmra.mrb[24].mxu0 %vm211_vm2, %v188_v37 }
  0x38   :  { %5751 = vmatprep.mubr.msk.bf16.mxu0 %vm211_vm2, %v189_v38 }
  0x3f   :  { %5752 = vmatmul.mubr.msk.bf16.gmra.mrb[28].mxu0 %vm211_vm2, %v190_v39 }
  0x40   :  { %5755 = vmatprep.mubr.msk.bf16.mxu0 %vm211_vm2, %v191_v40 }
  0x47   :  { %5756 = vmatmul.mubr.msk.bf16.gmra.mrb[32].mxu0 %vm211_vm2, %v192_v41 }
  0x48   :  { %5759 = vmatprep.mubr.msk.bf16.mxu0 %vm211_vm2, %v193_v42 }
  0x4f   :  { %5760 = vmatmul.mubr.msk.bf16.gmra.mrb[36].mxu0 %vm211_vm2, %v194_v43 }
  0x50   :  { %16 = vsyncpa [#allocation3], 0  ;;  %5763 = vmatprep.mubr.msk.bf16.mxu0 %vm211_vm2, %v195_v46  ;;  %v152_v49 = vsel %vm109_vm1, %v87_v44, 0.0  ;;  %v153_v50 = vsel %vm109_vm1, %v88_v45, 0.0  ;;  %v154_v51 = vsel %vm109_vm1, %v89_v47, 0.0  ;;  %v155_v52 = vsel %vm109_vm1, %v90_v48, 0.0 }
  0x51   :  { %v196_v53 = vpack.c.bf16 %v153_v50, %v152_v49  ;;  %v197_v54 = vpack.c.bf16 %v155_v52, %v154_v51  ;;  %v91_v55 = vld [vmem:[%s8402_s4 + $0x170] sm:$0xff]  ;;  %v92_v56 = vld [vmem:[%s8402_s4 + $0x178] sm:$0xff]  ;;  %v93_v57 = vld [vmem:[%s8402_s4 + $0x180] sm:$0xff]  ;;  %v6322_v21 = vmov 0.0   ;;  %v6323_v39 = vmov 0   ;;  %s6334_s24 = smov 3  }
  0x52   :  { %v94_v58 = vld [vmem:[%s8402_s4 + $0x188] sm:$0xff]  ;;  %v156_v59 = vsel %vm109_vm1, %v91_v55, 0.0  ;;  %v157_v60 = vsel %vm109_vm1, %v92_v56, 0.0  ;;  %v158_v61 = vsel %vm109_vm1, %v93_v57, 0.0  ;;  %v6160_v0 = vld [vmem:[%s8405_s7 + $0x10] sm:$0xff]   ;;  %v96_v3 = vld [vmem:[%s8402_s4 + $0x198] sm:$0xff]  ;;  %6152 = vset.pattern.permute.xlu0 %v6323_v39  ;;  %v207_v41 = vlaneseq }
  0x53   :  { %v159_v62 = vsel %vm109_vm1, %v94_v58, 0.0  ;;  %v198_v63 = vpack.c.bf16 %v157_v60, %v156_v59  ;;  %v95_v2 = vld [vmem:[%s8402_s4 + $0x190] sm:$0xff]  ;;  %5791 = vmatprep.subr.bf16.mxu1 %v6160_v0  ;;  %v97_v4 = vld [vmem:[%s8402_s4 + $0x1a0] sm:$0xff]  ;;  %v98_v5 = vld [vmem:[%s8402_s4 + $0x1a8] sm:$0xff]  ;;  %v161_v8 = vsel %vm109_vm1, %v96_v3, 0.0  ;;  %vm733_vm3 = vcmask 523264  }
  0x54   :  { %v199_v1 = vpack.c.bf16 %v159_v62, %v158_v61  ;;  %5792 = vmatpush3.bf16.msra.mxu1 %v6160_v0  ;;  %v6161_v6 = vld [vmem:[%s8405_s7 + $0x18] sm:$0xff]   ;;  %v160_v7 = vsel %vm109_vm1, %v95_v2, 0.0  ;;  %v162_v9 = vsel %vm109_vm1, %v97_v4, 0.0  ;;  %v163_v10 = vsel %vm109_vm1, %v98_v5, 0.0  ;;  %v99_v13 = vld [vmem:[%s8402_s4 + $0x1b0] sm:$0xff]  ;;  %v101_v15 = vld [vmem:[%s8402_s4 + $0x1c0] sm:$0xff] }
  0x55   :  { %5793 = vmatprep.subr.bf16.mxu1 %v6161_v6  ;;  %v200_v11 = vpack.c.bf16 %v161_v8, %v160_v7  ;;  %v201_v12 = vpack.c.bf16 %v163_v10, %v162_v9  ;;  %v100_v14 = vld [vmem:[%s8402_s4 + $0x1b8] sm:$0xff]  ;;  %v102_v16 = vld [vmem:[%s8402_s4 + $0x1c8] sm:$0xff]  ;;  %v164_v17 = vsel %vm109_vm1, %v99_v13, 0.0  ;;  %v166_v19 = vsel %vm109_vm1, %v101_v15, 0.0  ;;  %v103_v24 = vld [vmem:[%s8402_s4 + $0x1d0] sm:$0xff]  ;;  %s6335_s5 = smov 4  }
  0x56   :  { %v165_v18 = vsel %vm109_vm1, %v100_v14, 0.0  ;;  %v167_v20 = vsel %vm109_vm1, %v102_v16, 0.0  ;;  %v104_v25 = vld [vmem:[%s8402_s4 + $0x1d8] sm:$0xff]  ;;  %v105_v26 = vld [vmem:[%s8402_s4 + $0x1e0] sm:$0xff]  ;;  %v106_v27 = vld [vmem:[%s8402_s4 + $0x1e8] sm:$0xff]  ;;  %v168_v28 = vsel %vm109_vm1, %v103_v24, 0.0 }
  0x57   :  { %5764 = vmatmul.mubr.msk.bf16.gmra.mrb[40].mxu0 %vm211_vm2, %v196_v53  ;;  %v202_v22 = vpack.c.bf16 %v165_v18, %v164_v17  ;;  %v203_v23 = vpack.c.bf16 %v167_v20, %v166_v19  ;;  %v169_v29 = vsel %vm109_vm1, %v104_v25, 0.0  ;;  %v170_v30 = vsel %vm109_vm1, %v105_v26, 0.0  ;;  %v107_v34 = vld [vmem:[%s8402_s4 + $0x1f0] sm:$0xff]  ;;  %v108_v35 = vld [vmem:[%s8402_s4 + $0x1f8] sm:$0xff]  ;;  %v3679_v40 = vld [vmem:[%s8401_s3] sm:$0x3] }
  0x58   :  { %5767 = vmatprep.mubr.msk.bf16.mxu0 %vm211_vm2, %v197_v54  ;;  %5794 = vmatpush3.bf16.msra.mxu1 %v6161_v6  ;;  %v171_v31 = vsel %vm109_vm1, %v106_v27, 0.0  ;;  %v204_v32 = vpack.c.bf16 %v169_v29, %v168_v28  ;;  %v172_v36 = vsel %vm109_vm1, %v107_v34, 0.0  ;;  %v173_v37 = vsel %vm109_vm1, %v108_v35, 0.0  ;;  %v6726_v44 = vld [vmem:[%s8408_s10] sm:$0xff]  ;;  %v6163_v5 = vld [vmem:[%s8404_s6 + $0x48] sm:$0xff]   ;;  %v6164_v15 = vld [vmem:[%s8404_s6 + $0x50] sm:$0xff]  }
  0x59   :  { %5939 = vmatprep.subr.bf16.mxu1 %v6322_v21  ;;  %v205_v33 = vpack.c.bf16 %v171_v31, %v170_v30  ;;  %v206_v38 = vpack.c.bf16 %v173_v37, %v172_v36  ;;  %3682 = vperm.xlu0 %6152, %v3679_v40   ;;  %v6718_v42 = vshrl.u32 %v207_v41, 7  ;;  %v6162_v61 = vld [vmem:[%s8404_s6 + $0x40] sm:$0xff]   ;;  %v6171_v7 = vld [vmem:[%s8404_s6 + $0x8] sm:$0xff]   ;;  %v6172_v16 = vld [vmem:[%s8404_s6 + $0x10] sm:$0xff]   ;;  %vm1716_vm13 = vcmask 1040384   ;;  %s6332_s3 = smov 2  }
  0x5a   :  { %v6170_v6 = vld [vmem:[%s8404_s6] sm:$0xff]   ;;  %v6165_v25 = vld [vmem:[%s8404_s6 + $0x58] sm:$0xff]   ;;  %vm8410_vm14 = vmmov 0   ;;  %s6336_s25 = smov 5   ;;  %s6337_s26 = smov 6  }
  0x5b   :  { %v6721_v43 = vsub.s32 0, %v6718_v42  ;;  %5859 = vmatprep.subr.bf16.mxu0 %v6170_v6  ;;  %v6173_v26 = vld [vmem:[%s8404_s6 + $0x18] sm:$0xff]   ;;  %v6166_v35 = vld [vmem:[%s8404_s6 + $0x60] sm:$0xff]   ;;  %s6338_s27 = smov 7   ;;  %s6340_s28 = smov 9  }
  0x5c   :  { %5860 = vmatpush3.bf16.msra.mxu0 %v6170_v6  ;;  %v6174_v36 = vld [vmem:[%s8404_s6 + $0x20] sm:$0xff]   ;;  %s6341_s29 = smov 11   ;;  %s6342_s30 = smov 13  }
  0x5d   :  { %v6730_v45 = vrot.slane %v6726_v44, %v6721_v43  ;;  %5861 = vmatprep.subr.bf16.mxu0 %v6171_v7  ;;  %s6344_s17 = smov 17   ;;  %s6345_s4 = smov 19  }
  0x5e   :  { %s6347_s20 = smov 23   ;;  %s6348_s21 = smov 64  }
  0x5f   :  { %5768 = vmatmul.mubr.msk.bf16.gmra.mrb[44].mxu0 %vm211_vm2, %v198_v63 }
  0x60   :  { %5771 = vmatprep.mubr.msk.bf16.mxu0 %vm211_vm2, %v199_v1  ;;  %5862 = vmatpush3.bf16.msra.mxu0 %v6171_v7 }
  0x61   :  { %5863 = vmatprep.subr.bf16.mxu0 %v6172_v16 }
  0x64   :  { %5864 = vmatpush3.bf16.msra.mxu0 %v6172_v16 }
  0x65   :  { %5865 = vmatprep.subr.bf16.mxu0 %v6173_v26 }
  0x67   :  { %5772 = vmatmul.mubr.msk.bf16.gmra.mrb[48].mxu0 %vm211_vm2, %v200_v11 }
  0x68   :  { %5775 = vmatprep.mubr.msk.bf16.mxu0 %vm211_vm2, %v201_v12  ;;  %5866 = vmatpush3.bf16.msra.mxu0 %v6173_v26 }
  0x69   :  { %5867 = vmatprep.subr.bf16.mxu0 %v6174_v36 }
  0x6c   :  { %5868 = vmatpush3.bf16.msra.mxu0 %v6174_v36 }
  0x6f   :  { %5776 = vmatmul.mubr.msk.bf16.gmra.mrb[52].mxu0 %vm211_vm2, %v202_v22 }
  0x70   :  { %5779 = vmatprep.mubr.msk.bf16.mxu0 %vm211_vm2, %v203_v23 }
  0x77   :  { %5780 = vmatmul.mubr.msk.bf16.gmra.mrb[56].mxu0 %vm211_vm2, %v204_v32  ;;  %v3674_v32 = vand.u32 127, %v207_v41 }
  0x78   :  { %5783 = vmatprep.mubr.msk.bf16.mxu0 %vm211_vm2, %v205_v33 }
  0x7f   :  { %5784 = vmatmul.mubr.msk.bf16.gmra.mrb[60].mxu0 %vm211_vm2, %v206_v38 }
  0xda   :  { %v5725_v46 = vpop.f32.mrb[0].mxu0 }
  0xdb   :  { %v355_v47 = vadd.f32 %v5725_v46, %v6730_v45  ;;  %v346_v48 = vpop.f32.mrb[1].mxu0 }
  0xdc   :  { %v347_v49 = vadd.f32 %v346_v48, %v6730_v45  ;;  %v5726_v50 = vpop.f32.mrb[2].mxu0 }
  0xdd   :  { %v358_v51 = vadd.f32 %v5726_v50, %v6730_v45  ;;  %v349_v52 = vpop.f32.mrb[3].mxu0  ;;  %v603_v54 = vmax.f32 %v355_v47, 0.0  ;;  %v3675_v47 = vcvt.s32.f32 %v3674_v32  ;;  %v6175_v50 = vld [vmem:[%s8404_s6 + $0x28] sm:$0xff]  }
  0xde   :  { %v350_v53 = vadd.f32 %v349_v52, %v6730_v45  ;;  %v601_v56 = vmax.f32 %v347_v49, 0.0  ;;  %v6167_v49 = vld [vmem:[%s8404_s6 + $0x68] sm:$0xff]   ;;  %5869 = vmatprep.subr.bf16.mxu0 %v6175_v50 }
  0xdf   :  { %v604_v55 = vmax.f32 %v358_v51, 0.0  ;;  %5870 = vmatpush3.bf16.msra.mxu0 %v6175_v50 }
  0xe0   :  { %v602_v57 = vmax.f32 %v350_v53, 0.0 }
  0xe1   :  { %v674_v58 = vpack.c.bf16 %v604_v55, %v603_v54 }
  0xe2   :  { %v5729_v59 = vpop.f32.mrb[4].mxu0  ;;  %v673_v60 = vpack.c.bf16 %v602_v57, %v601_v56  ;;  %v3676_v56 = vmul.f32 -0.28782314, %v3675_v47 }
  0xe3   :  { %v371_v62 = vadd.f32 %v5729_v59, %v6730_v45  ;;  %v362_v63 = vpop.f32.mrb[5].mxu0  ;;  %v6168_v59 = vld [vmem:[%s8404_s6 + $0x70] sm:$0xff]  }
  0xe4   :  { %v363_v0 = vadd.f32 %v362_v63, %v6730_v45  ;;  %v5730_v1 = vpop.f32.mrb[6].mxu0  ;;  %5795 = vmatprep.mubr.msk.bf16.mxu1 %vm733_vm3, %v673_v60 }
  0xe5   :  { %v374_v2 = vadd.f32 %v5730_v1, %v6730_v45  ;;  %v365_v3 = vpop.f32.mrb[7].mxu0  ;;  %5796 = vmatmul.mubr.msk.bf16.vlgmr.msra.gmra.mrb[0].mxu1 %vm733_vm3, %v674_v58  ;;  %v607_v8 = vmax.f32 %v371_v62, 0.0 }
  0xe6   :  { %v366_v4 = vadd.f32 %v365_v3, %v6730_v45  ;;  %5940 = vmatpush3.bf16.msra.mxu1 %v6162_v61  ;;  %v605_v10 = vmax.f32 %v363_v0, 0.0 }
  0xe7   :  { %v608_v9 = vmax.f32 %v374_v2, 0.0  ;;  %5941 = vmatprep.subr.bf16.mxu1 %v6322_v21  ;;  %v3677_v2 = vmul.f32 1.442695, %v3676_v56 }
  0xe8   :  { %v606_v11 = vmax.f32 %v366_v4, 0.0  ;;  %v6169_v4 = vld [vmem:[%s8404_s6 + $0x78] sm:$0xff]  }
  0xe9   :  { %v676_v12 = vpack.c.bf16 %v608_v9, %v607_v8  ;;  %6238 = vpow2.f32 %v3677_v2 }
  0xea   :  { %v675_v13 = vpack.c.bf16 %v606_v11, %v605_v10  ;;  %v5733_v14 = vpop.f32.mrb[8].mxu0  ;;  %5942 = vmatpush3.bf16.msra.mxu1 %v6163_v5 }
  0xeb   :  { %v387_v17 = vadd.f32 %v5733_v14, %v6730_v45  ;;  %v378_v18 = vpop.f32.mrb[9].mxu0  ;;  %5943 = vmatprep.subr.bf16.mxu1 %v6322_v21 }
  0xec   :  { %v379_v19 = vadd.f32 %v378_v18, %v6730_v45  ;;  %v5734_v20 = vpop.f32.mrb[10].mxu0  ;;  %5799 = vmatprep.mubr.msk.bf16.mxu1 %vm733_vm3, %v675_v13 }
  0xed   :  { %v390_v22 = vadd.f32 %v5734_v20, %v6730_v45  ;;  %v381_v23 = vpop.f32.mrb[11].mxu0  ;;  %5800 = vmatmul.mubr.msk.bf16.gmra.mrb[4].mxu1 %vm733_vm3, %v676_v12  ;;  %v611_v27 = vmax.f32 %v387_v17, 0.0 }
  0xee   :  { %v382_v24 = vadd.f32 %v381_v23, %v6730_v45  ;;  %5944 = vmatpush3.bf16.msra.mxu1 %v6164_v15  ;;  %v609_v29 = vmax.f32 %v379_v19, 0.0 }
  0xef   :  { %v612_v28 = vmax.f32 %v390_v22, 0.0  ;;  %5945 = vmatprep.subr.bf16.mxu1 %v6322_v21 }
  0xf0   :  { %v610_v30 = vmax.f32 %v382_v24, 0.0 }
  0xf1   :  { %v678_v31 = vpack.c.bf16 %v612_v28, %v611_v27 }
  0xf2   :  { %v677_v33 = vpack.c.bf16 %v610_v30, %v609_v29  ;;  %v5737_v34 = vpop.f32.mrb[12].mxu0  ;;  %5946 = vmatpush3.bf16.msra.mxu1 %v6165_v25 }
  0xf3   :  { %v403_v37 = vadd.f32 %v5737_v34, %v6730_v45  ;;  %v394_v38 = vpop.f32.mrb[13].mxu0  ;;  %5947 = vmatprep.subr.bf16.mxu1 %v6322_v21  ;;  %v6239_v27 = vpop.eup %6238 }
  0xf4   :  { %v395_v39 = vadd.f32 %v394_v38, %v6730_v45  ;;  %v5738_v40 = vpop.f32.mrb[14].mxu0  ;;  %5803 = vmatprep.mubr.msk.bf16.mxu1 %vm733_vm3, %v677_v33  ;;  %v3683_v34 = vpop.permute.xlu0 %3682 }
  0xf5   :  { %v406_v41 = vadd.f32 %v5738_v40, %v6730_v45  ;;  %v397_v46 = vpop.f32.mrb[15].mxu0  ;;  %5804 = vmatmul.mubr.msk.bf16.gmra.mrb[8].mxu1 %vm733_vm3, %v678_v31  ;;  %v615_v51 = vmax.f32 %v403_v37, 0.0  ;;  %v6823_v36 = vmul.f32 %v6239_v27, %v3683_v34 }
  0xf6   :  { %v398_v48 = vadd.f32 %v397_v46, %v6730_v45  ;;  %5948 = vmatpush3.bf16.msra.mxu1 %v6166_v35  ;;  %v613_v53 = vmax.f32 %v395_v39, 0.0 }
  0xf7   :  { %v616_v52 = vmax.f32 %v406_v41, 0.0  ;;  %5949 = vmatprep.subr.bf16.mxu1 %v6322_v21  ;;  %v3689_v41 = vand.u32 2139095040, %v6823_v36  ;;  %vm3688_vm11 = vcmp.lt.s32.totalorder %v6823_v36, 0 }
  0xf8   :  { %v614_v54 = vmax.f32 %v398_v48, 0.0 }
  0xf9   :  { %v680_v55 = vpack.c.bf16 %v616_v52, %v615_v51 }
  0xfa   :  { %v679_v57 = vpack.c.bf16 %v614_v54, %v613_v53  ;;  %v5741_v58 = vpop.f32.mrb[16].mxu0  ;;  %5950 = vmatpush3.bf16.msra.mxu1 %v6167_v49  ;;  %v3690_v49 = vshrl.u32 %v3689_v41, 23 }
  0xfb   :  { %v419_v60 = vadd.f32 %v5741_v58, %v6730_v45  ;;  %v410_v61 = vpop.f32.mrb[17].mxu0  ;;  %5951 = vmatprep.subr.bf16.mxu1 %v6322_v21 }
  0xfc   :  { %v411_v62 = vadd.f32 %v410_v61, %v6730_v45  ;;  %v5742_v63 = vpop.f32.mrb[18].mxu0  ;;  %5807 = vmatprep.mubr.msk.bf16.mxu1 %vm733_vm3, %v679_v57  ;;  %v5375_v54 = vadd.s32 4294967169, %v3690_v49  ;;  %v6329_v49 = vmov 2131351028  }
  0xfd   :  { %v422_v0 = vadd.f32 %v5742_v63, %v6730_v45  ;;  %v413_v1 = vpop.f32.mrb[19].mxu0  ;;  %5808 = vmatmul.mubr.msk.bf16.gmra.mrb[12].mxu1 %vm733_vm3, %v680_v55  ;;  %v619_v5 = vmax.f32 %v419_v60, 0.0 }
  0xfe   :  { %v414_v3 = vadd.f32 %v413_v1, %v6730_v45  ;;  %5952 = vmatpush3.bf16.msra.mxu1 %v6168_v59  ;;  %v617_v7 = vmax.f32 %v411_v62, 0.0  ;;  %v3696_v58 = vadd.s32 1, %v5375_v54 }
  0xff   :  { %v620_v6 = vmax.f32 %v422_v0, 0.0  ;;  %5953 = vmatprep.subr.bf16.mxu1 %v6322_v21 }
 0x100   :  { %v618_v8 = vmax.f32 %v414_v3, 0.0  ;;  %vm3697_vm4 = vcmp.gt.s32.totalorder %v3696_v58, 0 }
 0x101   :  { %v682_v9 = vpack.c.bf16 %v620_v6, %v619_v5  ;;  %v3698_v0 = vsel %vm3697_vm4, %v3696_v58, 0 }
 0x102   :  { %v681_v10 = vpack.c.bf16 %v618_v8, %v617_v7  ;;  %v5745_v11 = vpop.f32.mrb[20].mxu0  ;;  %5954 = vmatpush3.bf16.msra.mxu1 %v6169_v4  ;;  %v6832_v3 = vshrl.u32 %v3698_v0, 5  ;;  %v3700_v4 = vand.u32 31, %v3698_v0 }
 0x103   :  { %v435_v12 = vadd.f32 %v5745_v11, %v6730_v45  ;;  %v426_v13 = vpop.f32.mrb[21].mxu0  ;;  %5959 = vmatprep.subr.bf16.mxu1 %v6322_v21 }
 0x104   :  { %v427_v14 = vadd.f32 %v426_v13, %v6730_v45  ;;  %v5746_v15 = vpop.f32.mrb[22].mxu0  ;;  %5811 = vmatprep.mubr.msk.bf16.mxu1 %vm733_vm3, %v681_v10  ;;  %v6324_v10 = vmov 2102212464   ;;  %vm3721_vm5 = vcmp.lt.s32.totalorder %v6832_v3, 4  ;;  %vm3718_vm6 = vcmp.lt.s32.totalorder %v6832_v3, 1 }
 0x105   :  { %v438_v16 = vadd.f32 %v5746_v15, %v6730_v45  ;;  %v429_v17 = vpop.f32.mrb[23].mxu0  ;;  %5812 = vmatmul.mubr.msk.bf16.gmra.mrb[16].mxu1 %vm733_vm3, %v682_v9  ;;  %v623_v19 = vmax.f32 %v435_v12, 0.0  ;;  %v3701_v9 = vsub.s32 32, %v3700_v4  ;;  %v3712_v11 = vshll.u32 %v6324_v10, %v3700_v4 }
 0x106   :  { %v430_v18 = vadd.f32 %v429_v17, %v6730_v45  ;;  %v621_v22 = vmax.f32 %v427_v14, 0.0  ;;  %v6325_v12 = vmov 920167782   ;;  %v3686_v17 = vand.u32 2147483647, %v6823_v36 }
 0x107   :  { %v624_v20 = vmax.f32 %v438_v16, 0.0  ;;  %v3715_v13 = vshll.u32 %v6325_v12, %v3700_v4  ;;  %vm3719_vm7 = vcmp.lt.s32.totalorder %v6832_v3, 2  ;;  %vm3720_vm8 = vcmp.lt.s32.totalorder %v6832_v3, 3 }
 0x108   :  { %v622_v23 = vmax.f32 %v430_v18, 0.0  ;;  %vm6939_vm12 = vcmp.le.f32.partialorder %v3686_v17, 0.7853982 }
 0x109   :  { %v684_v24 = vpack.c.bf16 %v624_v20, %v623_v19  ;;  %v3713_v20 = vshrl.u32 %v6325_v12, %v3701_v9 }
 0x10a   :  { %v683_v25 = vpack.c.bf16 %v622_v23, %v621_v22  ;;  %v5749_v26 = vpop.f32.mrb[24].mxu0  ;;  %v6326_v22 = vmov 1326507024  }
 0x10b   :  { %v451_v28 = vadd.f32 %v5749_v26, %v6730_v45  ;;  %v442_v29 = vpop.f32.mrb[25].mxu0  ;;  %v3716_v23 = vshrl.u32 %v6326_v22, %v3701_v9  ;;  %v3714_v27 = vor.u32 %v3713_v20, %v3712_v11 }
 0x10c   :  { %v443_v30 = vadd.f32 %v442_v29, %v6730_v45  ;;  %v5750_v31 = vpop.f32.mrb[26].mxu0  ;;  %5815 = vmatprep.mubr.msk.bf16.mxu1 %vm733_vm3, %v683_v25  ;;  %v3710_v25 = vshrl.u32 %v6324_v10, %v3701_v9 }
 0x10d   :  { %v454_v32 = vadd.f32 %v5750_v31, %v6730_v45  ;;  %v445_v33 = vpop.f32.mrb[27].mxu0  ;;  %5816 = vmatmul.mubr.msk.bf16.gmra.mrb[20].mxu1 %vm733_vm3, %v684_v24  ;;  %v627_v37 = vmax.f32 %v451_v28, 0.0  ;;  %v3717_v28 = vor.u32 %v3716_v23, %v3715_v13  ;;  %v6327_v31 = vmov 683565275  }
 0x10e   :  { %v446_v35 = vadd.f32 %v445_v33, %v6730_v45  ;;  %v625_v39 = vmax.f32 %v443_v30, 0.0  ;;  %v3693_v30 = vand.u32 8388607, %v3686_v17  ;;  %v6328_v33 = vmov 2475754826  }
 0x10f   :  { %v628_v38 = vmax.f32 %v454_v32, 0.0  ;;  %v3703_v32 = vshll.u32 %v6327_v31, %v3700_v4  ;;  %v3704_v34 = vshrl.u32 %v6328_v33, %v3701_v9 }
 0x110   :  { %v626_v40 = vmax.f32 %v446_v35, 0.0 }
 0x111   :  { %v686_v46 = vpack.c.bf16 %v628_v38, %v627_v37  ;;  %v3727_v38 = vsel %vm3721_vm5, %v3714_v27, 920167782 }
 0x112   :  { %v685_v47 = vpack.c.bf16 %v626_v40, %v625_v39  ;;  %v5753_v48 = vpop.f32.mrb[28].mxu0  ;;  %v3731_v39 = vsel %vm3721_vm5, %v3717_v28, 1326507024  ;;  %v3706_v40 = vshll.u32 %v6328_v33, %v3700_v4 }
 0x113   :  { %v467_v50 = vadd.f32 %v5753_v48, %v6730_v45  ;;  %v458_v51 = vpop.f32.mrb[29].mxu0  ;;  %v3705_v48 = vor.u32 %v3704_v34, %v3703_v32  ;;  %v3732_v0 = vsel %vm3720_vm8, %v3714_v27, %v3731_v39 }
 0x114   :  { %v459_v52 = vadd.f32 %v458_v51, %v6730_v45  ;;  %v5754_v53 = vpop.f32.mrb[30].mxu0  ;;  %5819 = vmatprep.mubr.msk.bf16.mxu1 %vm733_vm3, %v685_v47  ;;  %v3694_v47 = vor.u32 8388608, %v3693_v30 }
 0x115   :  { %v470_v55 = vadd.f32 %v5754_v53, %v6730_v45  ;;  %v461_v56 = vpop.f32.mrb[31].mxu0  ;;  %5820 = vmatmul.mubr.msk.bf16.gmra.mrb[24].mxu1 %vm733_vm3, %v686_v46  ;;  %v631_v59 = vmax.f32 %v467_v50, 0.0  ;;  %v3707_v50 = vshrl.u32 %v6329_v49, %v3701_v9  ;;  %v3709_v53 = vshll.u32 %v6329_v49, %v3700_v4 }
 0x116   :  { %v462_v57 = vadd.f32 %v461_v56, %v6730_v45  ;;  %v629_v61 = vmax.f32 %v459_v52, 0.0 }
 0x117   :  { %v632_v60 = vmax.f32 %v470_v55, 0.0 }
 0x118   :  { %v630_v62 = vmax.f32 %v462_v57, 0.0  ;;  %v3708_v57 = vor.u32 %v3707_v50, %v3706_v40 }
 0x119   :  { %v688_v63 = vpack.c.bf16 %v632_v60, %v631_v59  ;;  %v3702_v60 = vshrl.u32 %v6327_v31, %v3701_v9 }
 0x11a   :  { %v687_v1 = vpack.c.bf16 %v630_v62, %v629_v61  ;;  %v5757_v2 = vpop.f32.mrb[32].mxu0  ;;  %v3711_v61 = vor.u32 %v3710_v25, %v3709_v53 }
 0x11b   :  { %v483_v5 = vadd.f32 %v5757_v2, %v6730_v45  ;;  %v474_v6 = vpop.f32.mrb[33].mxu0  ;;  %v3722_v4 = vsel %vm3718_vm6, %v3702_v60, %v3705_v48 }
 0x11c   :  { %v475_v7 = vadd.f32 %v474_v6, %v6730_v45  ;;  %v5758_v8 = vpop.f32.mrb[34].mxu0  ;;  %5823 = vmatprep.mubr.msk.bf16.mxu1 %vm733_vm3, %v687_v1  ;;  %v3734_v1 = vshll.u32 %v3694_v47, 8  ;;  %v3728_v6 = vsel %vm3720_vm8, %v3711_v61, %v3727_v38  ;;  %v3730_v11 = vsel %vm3718_vm6, %v3708_v57, %v3711_v61 }
 0x11d   :  { %v635_v14 = vmax.f32 %v483_v5, 0.0  ;;  %v486_v15 = vadd.f32 %v5758_v8, %v6730_v45  ;;  %v477_v16 = vpop.f32.mrb[35].mxu0  ;;  %5824 = vmatmul.mubr.msk.bf16.gmra.mrb[28].mxu1 %vm733_vm3, %v688_v63  ;;  %v3726_v63 = vsel %vm3718_vm6, %v3705_v48, %v3708_v57  ;;  %v3723_v5 = vsel %vm3721_vm5, %v3711_v61, 2102212464 }
 0x11e   :  { %v633_v18 = vmax.f32 %v475_v7, 0.0  ;;  %v478_v19 = vadd.f32 %v477_v16, %v6730_v45  ;;  %v3724_v8 = vsel %vm3720_vm8, %v3708_v57, %v3723_v5  ;;  %v3729_v9 = vsel %vm3719_vm7, %v3726_v63, %v3728_v6  ;;  %v6176_v63 = vld [vmem:[%s8404_s6 + $0x30] sm:$0xff]  }
 0x11f   :  { %v636_v24 = vmax.f32 %v486_v15, 0.0  ;;  %v3733_v15 = vsel %vm3719_vm7, %v3730_v11, %v3732_v0  ;;  %v3725_v25 = vsel %vm3719_vm7, %v3722_v4, %v3724_v8  ;;  %5871 = vmatprep.subr.bf16.mxu0 %v6176_v63  ;;  %vm3778_vm8 = vweird.f32 %v6823_v36 }
 0x120   :  { %v634_v26 = vmax.f32 %v478_v19, 0.0  ;;  %v6881_v19 = vmul.u32.u64.low %v3734_v1, %v3733_v15  ;;  %v6882_v20 = vmul.u32.u64.high %v3734_v1, %v3733_v15, %v6881_v19  ;;  %5872 = vmatpush3.bf16.msra.mxu0 %v6176_v63 }
 0x121   :  { %v690_v29 = vpack.c.bf16 %v636_v24, %v635_v14 }
 0x122   :  { %v689_v35 = vpack.c.bf16 %v634_v26, %v633_v18  ;;  %v5761_v37 = vpop.f32.mrb[36].mxu0  ;;  %v6888_v26 = vmul.u32.u64.low %v3734_v1, %v3729_v9  ;;  %v6889_v27 = vmul.u32.u64.high %v3734_v1, %v3729_v9, %v6888_v26 }
 0x123   :  { %v499_v41 = vadd.f32 %v5761_v37, %v6730_v45  ;;  %v490_v46 = vpop.f32.mrb[37].mxu0 }
 0x124   :  { %v491_v51 = vadd.f32 %v490_v46, %v6730_v45  ;;  %v5762_v52 = vpop.f32.mrb[38].mxu0  ;;  %5827 = vmatprep.mubr.msk.bf16.mxu1 %vm733_vm3, %v689_v35  ;;  %v3741_v35 = vmul.u32 %v3734_v1, %v3725_v25  ;;  %vm3743_vm9 = vc.u32 %v6882_v20, %v6888_v26  ;;  %v3744_v38 = vadd.s32 1, %v6889_v27 }
 0x125   :  { %v639_v54 = vmax.f32 %v499_v41, 0.0  ;;  %v502_v55 = vadd.f32 %v5762_v52, %v6730_v45  ;;  %v493_v56 = vpop.f32.mrb[39].mxu0  ;;  %5828 = vmatmul.mubr.msk.bf16.gmra.mrb[32].mxu1 %vm733_vm3, %v690_v29 }
 0x126   :  { %v637_v58 = vmax.f32 %v491_v51, 0.0  ;;  %v494_v59 = vadd.f32 %v493_v56, %v6730_v45  ;;  %v3745_v46 = vsel %vm3743_vm9, %v3744_v38, %v6889_v27 }
 0x127   :  { %v640_v62 = vmax.f32 %v502_v55, 0.0  ;;  %v3746_v50 = vadd.s32 %v3745_v46, %v3741_v35 }
 0x128   :  { %v638_v2 = vmax.f32 %v494_v59, 0.0 }
 0x129   :  { %v692_v7 = vpack.c.bf16 %v640_v62, %v639_v54  ;;  %v3747_v55 = vadd.s32 536870912, %v3746_v50 }
 0x12a   :  { %v691_v13 = vpack.c.bf16 %v638_v2, %v637_v58  ;;  %v5765_v14 = vpop.f32.mrb[40].mxu0 }
 0x12b   :  { %v515_v16 = vadd.f32 %v5765_v14, %v6730_v45  ;;  %v506_v18 = vpop.f32.mrb[41].mxu0  ;;  %v6905_v59 = vshrl.u32 %v3747_v55, 30 }
 0x12c   :  { %v507_v23 = vadd.f32 %v506_v18, %v6730_v45  ;;  %v5766_v24 = vpop.f32.mrb[42].mxu0  ;;  %5831 = vmatprep.mubr.msk.bf16.mxu1 %vm733_vm3, %v691_v13  ;;  %v6177_v13 = vld [vmem:[%s8404_s6 + $0x38] sm:$0xff]  }
 0x12d   :  { %v518_v28 = vadd.f32 %v5766_v24, %v6730_v45  ;;  %v509_v29 = vpop.f32.mrb[43].mxu0  ;;  %5832 = vmatmul.mubr.msk.bf16.gmra.mrb[36].mxu1 %vm733_vm3, %v692_v7  ;;  %v643_v32 = vmax.f32 %v515_v16, 0.0  ;;  %v3749_v0 = vshll.u32 %v6905_v59, 30  ;;  %5873 = vmatprep.subr.bf16.mxu0 %v6177_v13 }
 0x12e   :  { %v510_v30 = vadd.f32 %v509_v29, %v6730_v45  ;;  %v641_v37 = vmax.f32 %v507_v23, 0.0  ;;  %5874 = vmatpush3.bf16.msra.mxu0 %v6177_v13 }
 0x12f   :  { %v644_v34 = vmax.f32 %v518_v28, 0.0  ;;  %v3750_v6 = vsub.s32 %v3746_v50, %v3749_v0  ;;  %6015 = vmatprep.subr.bf16.mxu0 %v6322_v21 }
 0x130   :  { %v642_v3 = vmax.f32 %v510_v30, 0.0 }
 0x131   :  { %v694_v39 = vpack.c.bf16 %v644_v34, %v643_v32  ;;  %v3752_v14 = vsub.s32 0, %v3750_v6 }
 0x132   :  { %v693_v40 = vpack.c.bf16 %v642_v3, %v641_v37  ;;  %v5769_v41 = vpop.f32.mrb[44].mxu0 }
 0x133   :  { %v531_v47 = vadd.f32 %v5769_v41, %v6730_v45  ;;  %v522_v48 = vpop.f32.mrb[45].mxu0  ;;  %v5376_v19 = vmin.u32 %v3752_v14, %v3750_v6 }
 0x134   :  { %v523_v51 = vadd.f32 %v522_v48, %v6730_v45  ;;  %v5770_v52 = vpop.f32.mrb[46].mxu0  ;;  %5835 = vmatprep.mubr.msk.bf16.mxu1 %vm733_vm3, %v693_v40 }
 0x135   :  { %v534_v53 = vadd.f32 %v5770_v52, %v6730_v45  ;;  %v525_v54 = vpop.f32.mrb[47].mxu0  ;;  %5836 = vmatmul.mubr.msk.bf16.gmra.mrb[40].mxu1 %vm733_vm3, %v694_v39  ;;  %v647_v57 = vmax.f32 %v531_v47, 0.0  ;;  %v3754_v27 = vclz %v5376_v19  ;;  %v3742_v39 = vadd.s32 %v6888_v26, %v6882_v20 }
 0x136   :  { %v526_v56 = vadd.f32 %v525_v54, %v6730_v45  ;;  %v645_v60 = vmax.f32 %v523_v51, 0.0 }
 0x137   :  { %v648_v58 = vmax.f32 %v534_v53, 0.0  ;;  %v5377_v34 = vadd.s32 4294967294, %v3754_v27 }
 0x138   :  { %v646_v61 = vmax.f32 %v526_v56, 0.0 }
 0x139   :  { %v696_v62 = vpack.c.bf16 %v648_v58, %v647_v57  ;;  %vm5378_vm10 = vcmp.lt.s32.totalorder %v5377_v34, 0 }
 0x13a   :  { %v695_v1 = vpack.c.bf16 %v646_v61, %v645_v60  ;;  %v5773_v2 = vpop.f32.mrb[48].mxu0  ;;  %v3757_v46 = vsel %vm5378_vm10, 0, %v5377_v34 }
 0x13b   :  { %v547_v4 = vadd.f32 %v5773_v2, %v6730_v45  ;;  %v538_v5 = vpop.f32.mrb[49].mxu0  ;;  %v3758_v48 = vsub.s32 32, %v3757_v46  ;;  %v3759_v50 = vshll.u32 %v3750_v6, %v3757_v46  ;;  %v3762_v51 = vsub.s32 4294967266, %v3757_v46 }
 0x13c   :  { %v539_v7 = vadd.f32 %v538_v5, %v6730_v45  ;;  %v5774_v8 = vpop.f32.mrb[50].mxu0  ;;  %5839 = vmatprep.mubr.msk.bf16.mxu1 %vm733_vm3, %v695_v1 }
 0x13d   :  { %v550_v9 = vadd.f32 %v5774_v8, %v6730_v45  ;;  %v541_v11 = vpop.f32.mrb[51].mxu0  ;;  %5840 = vmatmul.mubr.msk.bf16.gmra.mrb[44].mxu1 %vm733_vm3, %v696_v62  ;;  %v651_v16 = vmax.f32 %v547_v4, 0.0  ;;  %v3760_v55 = vshrl.u32 %v3742_v39, %v3758_v48  ;;  %v3763_v56 = vadd.s32 127, %v3762_v51 }
 0x13e   :  { %v542_v15 = vadd.f32 %v541_v11, %v6730_v45  ;;  %v649_v23 = vmax.f32 %v539_v7, 0.0 }
 0x13f   :  { %v652_v18 = vmax.f32 %v550_v9, 0.0  ;;  %v3761_v20 = vor.u32 %v3760_v55, %v3759_v50  ;;  %v3764_v26 = vshll.u32 %v3763_v56, 23 }
 0x140   :  { %v650_v24 = vmax.f32 %v542_v15, 0.0 }
 0x141   :  { %v698_v25 = vpack.c.bf16 %v652_v18, %v651_v16  ;;  %v3765_v2 = vor.u32 4788187, %v3764_v26  ;;  %v3768_v5 = vcvt.s32.f32 %v3761_v20 }
 0x142   :  { %v697_v28 = vpack.c.bf16 %v650_v24, %v649_v23  ;;  %v5777_v29 = vpop.f32.mrb[52].mxu0 }
 0x143   :  { %v563_v30 = vadd.f32 %v5777_v29, %v6730_v45  ;;  %v554_v32 = vpop.f32.mrb[53].mxu0  ;;  %v3766_v8 = vand.u32 2147483647, %v3765_v2  ;;  %v6179_v2 = vld [vmem:[%s8407_s9 + $0x8] sm:$0xff]  }
 0x144   :  { %v555_v35 = vadd.f32 %v554_v32, %v6730_v45  ;;  %v5778_v37 = vpop.f32.mrb[54].mxu0  ;;  %5843 = vmatprep.mubr.msk.bf16.mxu1 %vm733_vm3, %v697_v28  ;;  %v3772_v28 = vsub.s32 4, %v6905_v59 }
 0x145   :  { %v566_v3 = vadd.f32 %v5778_v37, %v6730_v45  ;;  %v557_v38 = vpop.f32.mrb[55].mxu0  ;;  %5844 = vmatmul.mubr.msk.bf16.gmra.mrb[48].mxu1 %vm733_vm3, %v698_v25  ;;  %v655_v40 = vmax.f32 %v563_v30, 0.0  ;;  %v3769_v14 = vmul.f32 %v3768_v5, %v3766_v8  ;;  %v6180_v5 = vld [vmem:[%s8407_s9 + $0x10] sm:$0xff]  }
 0x146   :  { %v558_v41 = vadd.f32 %v557_v38, %v6730_v45  ;;  %v653_v52 = vmax.f32 %v555_v35, 0.0  ;;  %v3773_v17 = vsel %vm3688_vm11, %v3772_v28, %v6905_v59  ;;  %v1710_v38 = vld [vmem:[%s8398_s0] sm:$0x3f]  ;;  %s6331_s0 = smov 32  }
 0x147   :  { %v656_v47 = vmax.f32 %v566_v3, 0.0  ;;  %v3770_v24 = vxor.u32 2147483648, %v3769_v14  ;;  %v3775_v39 = vsel %vm6939_vm12, 0, %v3773_v17  ;;  %v1714_v48 = vrot.slane %v1710_v38, 3 }
 0x148   :  { %v654_v53 = vmax.f32 %v558_v41, 0.0  ;;  %v3882_v46 = vadd.s32 3, %v3775_v39 }
 0x149   :  { %v700_v54 = vpack.c.bf16 %v656_v47, %v655_v40  ;;  %v3771_v32 = vsel %vm3688_vm11, %v3770_v24, %v3769_v14  ;;  %v1712_v47 = vrot.slane %v1710_v38, 1  ;;  %v2741_v24 = vld [vmem:[%s8400_s2] sm:$0x3] }
 0x14a   :  { %v699_v57 = vpack.c.bf16 %v654_v53, %v653_v52  ;;  %v5781_v58 = vpop.f32.mrb[56].mxu0  ;;  %v3774_v35 = vsel %vm6939_vm12, %v6823_v36, %v3771_v32  ;;  %v3883_v50 = vand.u32 3, %v3882_v46  ;;  %v3779_v52 = vand.u32 3, %v3775_v39 }
 0x14b   :  { %v579_v60 = vadd.f32 %v5781_v58, %v6730_v45  ;;  %v570_v61 = vpop.f32.mrb[57].mxu0  ;;  %6240 = vcosq.f32 %v3774_v35  ;;  %v1717_v51 = vsel %vm1716_vm13, %v1712_v47, %v1714_v48  ;;  %v6971_v36 = vsub.s32 1, %v6718_v42 }
 0x14c   :  { %v571_v62 = vadd.f32 %v570_v61, %v6730_v45  ;;  %v5782_v63 = vpop.f32.mrb[58].mxu0  ;;  %5847 = vmatprep.mubr.msk.bf16.mxu1 %vm733_vm3, %v699_v57  ;;  %6242 = vsinq.f32 %v3774_v35  ;;  %vm3888_vm15 = vcmp.eq.s32.totalorder %v3883_v50, 2  ;;  %vm3781_vm0 = vcmp.eq.s32.totalorder %v3779_v52, 0 }
 0x14d   :  { %v582_v0 = vadd.f32 %v5782_v63, %v6730_v45  ;;  %v573_v1 = vpop.f32.mrb[59].mxu0  ;;  %5848 = vmatmul.mubr.msk.bf16.gmra.mrb[52].mxu1 %vm733_vm3, %v700_v54  ;;  %v659_v6 = vmax.f32 %v579_v60, 0.0  ;;  %v1735_v54 = vpack.c.bf16 %v1717_v51, %v1717_v51  ;;  %vm3784_vm4 = vcmp.eq.s32.totalorder %v3779_v52, 2 }
 0x14e   :  { %v574_v4 = vadd.f32 %v573_v1, %v6730_v45  ;;  %v657_v9 = vmax.f32 %v571_v62, 0.0  ;;  %vm3885_vm5 = vcmp.eq.s32.totalorder %v3883_v50, 0  ;;  %vm3780_vm6 = vcmp.lt.s32.totalorder %v3779_v52, 2  ;;  %v6178_v1 = vld [vmem:[%s8407_s9] sm:$0xff]  }
 0x14f   :  { %v660_v7 = vmax.f32 %v582_v0, 0.0  ;;  %vm3884_vm7 = vcmp.lt.s32.totalorder %v3883_v50, 2 }
 0x150   :  { %v658_v11 = vmax.f32 %v574_v4, 0.0  ;;  %v6979_v4 = vrot.slane %v6726_v44, %v6971_v36  ;;  %v6181_v44 = vld [vmem:[%s8407_s9 + $0x18] sm:$0xff]  }
 0x151   :  { %v702_v13 = vpack.c.bf16 %v660_v7, %v659_v6 }
 0x152   :  { %v701_v15 = vpack.c.bf16 %v658_v11, %v657_v9  ;;  %v5785_v16 = vpop.f32.mrb[60].mxu0 }
 0x153   :  { %v595_v18 = vadd.f32 %v5785_v16, %v6730_v45  ;;  %v586_v19 = vpop.f32.mrb[61].mxu0 }
 0x154   :  { %v587_v25 = vadd.f32 %v586_v19, %v6730_v45  ;;  %v5786_v27 = vpop.f32.mrb[62].mxu0  ;;  %5851 = vmatprep.mubr.msk.bf16.mxu1 %vm733_vm3, %v701_v15 }
 0x155   :  { %v598_v29 = vadd.f32 %v5786_v27, %v6730_v45  ;;  %v589_v30 = vpop.f32.mrb[63].mxu0  ;;  %5852 = vmatmul.mubr.msk.bf16.gmra.mrb[56].mxu1 %vm733_vm3, %v702_v13  ;;  %v663_v37 = vmax.f32 %v595_v18, 0.0  ;;  %v6241_v53 = vpop.eup %6240  ;;  %v6996_v27 = vmul.f32 8.0, %v2741_v24 }
 0x156   :  { %v590_v34 = vadd.f32 %v589_v30, %v6730_v45  ;;  %v661_v40 = vmax.f32 %v587_v25, 0.0  ;;  %v6243_v55 = vpop.eup %6242  ;;  %v3785_v56 = vxor.u32 2147483648, %v6241_v53 }
 0x157   :  { %v664_v3 = vmax.f32 %v598_v29, 0.0  ;;  %v3782_v57 = vxor.u32 2147483648, %v6243_v55  ;;  %v3369_v17 = vand.u32 2139095040, %v6996_v27 }
 0x158   :  { %v662_v41 = vmax.f32 %v590_v34, 0.0  ;;  %v3890_v58 = vsel %vm3888_vm15, %v3785_v56, %v6243_v55  ;;  %v3786_v60 = vsel %vm3784_vm4, %v3785_v56, %v6243_v55  ;;  %v3366_v34 = vand.u32 2147483647, %v6996_v27 }
 0x159   :  { %v704_v45 = vpack.c.bf16 %v664_v3, %v663_v37  ;;  %v3887_v61 = vsel %vm3885_vm5, %v6241_v53, %v3782_v57  ;;  %v3783_v20 = vsel %vm3781_vm0, %v6241_v53, %v3782_v57  ;;  %v3370_v39 = vshrl.u32 %v3369_v17, 23 }
 0x15a   :  { %v703_v59 = vpack.c.bf16 %v662_v41, %v661_v40  ;;  %v3891_v26 = vsel %vm3884_vm7, %v3887_v61, %v3890_v58  ;;  %v3787_v62 = vsel %vm3780_vm6, %v3783_v20, %v3786_v60  ;;  %v3373_v41 = vand.u32 8388607, %v3366_v34 }
 0x15b   :  { %v3892_v63 = vsel %vm3778_vm8, nan, %v3891_v26  ;;  %v6965_v0 = vsel %vm3778_vm8, nan, %v3787_v62  ;;  %vm3368_vm4 = vcmp.lt.s32.totalorder %v6996_v27, 0  ;;  %vm7080_vm5 = vcmp.le.f32.partialorder %v3366_v34, 0.7853982 }
 0x15c   :  { %5855 = vmatprep.mubr.msk.bf16.mxu1 %vm733_vm3, %v703_v59  ;;  %3894 = vrot.lane.b32.xlu1 %v3892_v63, %s6331_s0  ;;  %v5367_v59 = vadd.s32 4294967169, %v3370_v39  ;;  %v3374_v51 = vor.u32 8388608, %v3373_v41  ;;  %s6339_s0 = smov 8  }
 0x15d   :  { %5856 = vmatmul.mubr.msk.bf16.gmra.mrb[60].mxu1 %vm733_vm3, %v704_v45 }
 0x15e   :  { %5955 = vmatprep.mubr.msk.bf16.mxu1 %vm8410_vm14, %v6322_v21  ;;  %v3376_v52 = vadd.s32 1, %v5367_v59  ;;  %v7009_v62 = vshll.u32 %v3374_v51, 8 }
 0x160   :  { %vm3377_vm9 = vcmp.gt.s32.totalorder %v3376_v52, 0 }
 0x161   :  { %v3378_v60 = vsel %vm3377_vm9, %v3376_v52, 0 }
 0x162   :  { %v3380_v26 = vand.u32 31, %v3378_v60 }
 0x165   :  { %5956 = vmatmul.mubr.bf16.vlgmr.msra.gmra.mrb[64].mxu1 %v1735_v54 }
 0x166   :  { %5967 = vmatprep.mubr.msk.bf16.mxu1 %vm8410_vm14, %v6322_v21  ;;  %5960 = vmatpush3.bf16.msra.mxu1 %v6178_v1 }
 0x167   :  { %5961 = vmatprep.subr.bf16.mxu1 %v6322_v21 }
 0x16a   :  { %5962 = vmatpush3.bf16.msra.mxu1 %v6179_v2 }
 0x16b   :  { %5963 = vmatprep.subr.bf16.mxu1 %v6322_v21 }
 0x16e   :  { %5964 = vmatpush3.bf16.msra.mxu1 %v6180_v5  ;;  %v3379_v5 = vshrl.u32 %v3378_v60, 5 }
 0x16f   :  { %5965 = vmatprep.subr.bf16.mxu1 %v6322_v21 }
 0x170   :  { %vm3398_vm10 = vcmp.lt.s32.totalorder %v3379_v5, 1  ;;  %vm3399_vm11 = vcmp.lt.s32.totalorder %v3379_v5, 2  ;;  %vm3400_vm12 = vcmp.lt.s32.totalorder %v3379_v5, 3  ;;  %vm3401_vm13 = vcmp.lt.s32.totalorder %v3379_v5, 4 }
 0x172   :  { %5966 = vmatpush3.bf16.msra.mxu1 %v6181_v44  ;;  %v3389_v44 = vshll.u32 %v6329_v49, %v3380_v26 }
 0x1b8   :  { %v5797_v6 = vpop.f32.mrb[0].mxu1 }
 0x1b9   :  { %v873_v7 = vadd.f32 %v5797_v6, %v6979_v4  ;;  %v864_v8 = vpop.f32.mrb[1].mxu1 }
 0x1ba   :  { %v865_v9 = vadd.f32 %v864_v8, %v6979_v4  ;;  %v5798_v11 = vpop.f32.mrb[2].mxu1  ;;  %v3383_v8 = vshll.u32 %v6327_v31, %v3380_v26 }
 0x1bb   :  { %v876_v13 = vadd.f32 %v5798_v11, %v6979_v4  ;;  %v867_v14 = vpop.f32.mrb[3].mxu1  ;;  %v1121_v16 = vmax.f32 %v873_v7, 0.0  ;;  %v3381_v7 = vsub.s32 32, %v3380_v26 }
 0x1bc   :  { %v868_v15 = vadd.f32 %v867_v14, %v6979_v4  ;;  %v1119_v19 = vmax.f32 %v865_v9, 0.0  ;;  %v3386_v9 = vshll.u32 %v6328_v33, %v3380_v26  ;;  %v3395_v14 = vshll.u32 %v6325_v12, %v3380_v26 }
 0x1bd   :  { %v1122_v18 = vmax.f32 %v876_v13, 0.0  ;;  %v3392_v13 = vshll.u32 %v6324_v10, %v3380_v26 }
 0x1be   :  { %v1120_v23 = vmax.f32 %v868_v15, 0.0 }
 0x1bf   :  { %v1200_v25 = vpack.c.bf16 %v1122_v18, %v1121_v16  ;;  %v3382_v16 = vshrl.u32 %v6327_v31, %v3381_v7  ;;  %v3384_v18 = vshrl.u32 %v6328_v33, %v3381_v7 }
 0x1c0   :  { %v1199_v28 = vpack.c.bf16 %v1120_v23, %v1119_v19  ;;  %v5801_v29 = vpop.f32.mrb[4].mxu1  ;;  %v3387_v19 = vshrl.u32 %v6329_v49, %v3381_v7 }
 0x1c1   :  { %v889_v30 = vadd.f32 %v5801_v29, %v6979_v4  ;;  %v880_v32 = vpop.f32.mrb[5].mxu1  ;;  %v3396_v29 = vshrl.u32 %v6326_v22, %v3381_v7  ;;  %v3385_v17 = vor.u32 %v3384_v18, %v3383_v8 }
 0x1c2   :  { %v881_v35 = vadd.f32 %v880_v32, %v6979_v4  ;;  %v5802_v37 = vpop.f32.mrb[6].mxu1  ;;  %5875 = vmatprep.mubr.bf16.mxu0 %v1199_v28  ;;  %v3393_v28 = vshrl.u32 %v6325_v12, %v3381_v7 }
 0x1c3   :  { %v892_v3 = vadd.f32 %v5802_v37, %v6979_v4  ;;  %v883_v38 = vpop.f32.mrb[7].mxu1  ;;  %5876 = vmatmul.mubr.bf16.vlgmr.msra.gmra.mrb[64].mxu0 %v1200_v25  ;;  %v1125_v45 = vmax.f32 %v889_v30, 0.0  ;;  %v3390_v25 = vshrl.u32 %v6324_v10, %v3381_v7 }
 0x1c4   :  { %v884_v40 = vadd.f32 %v883_v38, %v6979_v4  ;;  %v1123_v47 = vmax.f32 %v881_v35, 0.0  ;;  %v3388_v35 = vor.u32 %v3387_v19, %v3386_v9  ;;  %v3394_v39 = vor.u32 %v3393_v28, %v3392_v13 }
 0x1c5   :  { %v1126_v46 = vmax.f32 %v892_v3, 0.0  ;;  %v3391_v38 = vor.u32 %v3390_v25, %v3389_v44 }
 0x1c6   :  { %v1124_v48 = vmax.f32 %v884_v40, 0.0  ;;  %v3397_v40 = vor.u32 %v3396_v29, %v3395_v14  ;;  %v3406_v52 = vsel %vm3398_vm10, %v3385_v17, %v3388_v35 }
 0x1c7   :  { %v1202_v50 = vpack.c.bf16 %v1126_v46, %v1125_v45  ;;  %v3403_v51 = vsel %vm3401_vm13, %v3391_v38, 2102212464 }
 0x1c8   :  { %v1201_v53 = vpack.c.bf16 %v1124_v48, %v1123_v47  ;;  %v5805_v54 = vpop.f32.mrb[8].mxu1  ;;  %v3402_v48 = vsel %vm3398_vm10, %v3382_v16, %v3385_v17 }
 0x1c9   :  { %v905_v55 = vadd.f32 %v5805_v54, %v6979_v4  ;;  %v896_v56 = vpop.f32.mrb[9].mxu1 }
 0x1ca   :  { %v897_v57 = vadd.f32 %v896_v56, %v6979_v4  ;;  %v5806_v58 = vpop.f32.mrb[10].mxu1  ;;  %5879 = vmatprep.mubr.bf16.mxu0 %v1201_v53  ;;  %v3407_v53 = vsel %vm3401_vm13, %v3394_v39, 920167782 }
 0x1cb   :  { %v908_v61 = vadd.f32 %v5806_v58, %v6979_v4  ;;  %v899_v20 = vpop.f32.mrb[11].mxu1  ;;  %5880 = vmatmul.mubr.bf16.gmra.mrb[68].mxu0 %v1202_v50  ;;  %v1129_v63 = vmax.f32 %v905_v55, 0.0  ;;  %v3404_v55 = vsel %vm3400_vm12, %v3388_v35, %v3403_v51  ;;  %v3408_v56 = vsel %vm3400_vm12, %v3391_v38, %v3407_v53 }
 0x1cc   :  { %v1127_v1 = vmax.f32 %v897_v57, 0.0  ;;  %v900_v2 = vadd.f32 %v899_v20, %v6979_v4  ;;  %v3410_v57 = vsel %vm3398_vm10, %v3388_v35, %v3391_v38  ;;  %v3409_v60 = vsel %vm3399_vm11, %v3406_v52, %v3408_v56 }
 0x1cd   :  { %v1130_v6 = vmax.f32 %v908_v61, 0.0  ;;  %v3411_v61 = vsel %vm3401_vm13, %v3397_v40, 1326507024  ;;  %v3405_v8 = vsel %vm3399_vm11, %v3402_v48, %v3404_v55 }
 0x1ce   :  { %v1128_v11 = vmax.f32 %v900_v2, 0.0  ;;  %v3421_v19 = vmul.u32 %v7009_v62, %v3405_v8 }
 0x1cf   :  { %v1204_v15 = vpack.c.bf16 %v1130_v6, %v1129_v63  ;;  %v3412_v63 = vsel %vm3400_vm12, %v3394_v39, %v3411_v61  ;;  %vm3458_vm12 = vweird.f32 %v6996_v27 }
 0x1d0   :  { %v1203_v23 = vpack.c.bf16 %v1128_v11, %v1127_v1  ;;  %v5809_v24 = vpop.f32.mrb[12].mxu1  ;;  %v7035_v1 = vmul.u32.u64.low %v7009_v62, %v3409_v60  ;;  %v7036_v2 = vmul.u32.u64.high %v7009_v62, %v3409_v60, %v7035_v1  ;;  %v3413_v9 = vsel %vm3399_vm11, %v3410_v57, %v3412_v63 }
 0x1d1   :  { %v921_v30 = vadd.f32 %v5809_v24, %v6979_v4  ;;  %v912_v32 = vpop.f32.mrb[13].mxu1  ;;  %v7044_v13 = vmul.u32.u64.low %v7009_v62, %v3413_v9  ;;  %v7045_v14 = vmul.u32.u64.high %v7009_v62, %v3413_v9, %v7044_v13 }
 0x1d2   :  { %v913_v37 = vadd.f32 %v912_v32, %v6979_v4  ;;  %v5810_v3 = vpop.f32.mrb[14].mxu1  ;;  %5883 = vmatprep.mubr.bf16.mxu0 %v1203_v23  ;;  %v3424_v23 = vadd.s32 1, %v7036_v2 }
 0x1d3   :  { %v1133_v41 = vmax.f32 %v921_v30, 0.0  ;;  %v924_v45 = vadd.f32 %v5810_v3, %v6979_v4  ;;  %v915_v46 = vpop.f32.mrb[15].mxu1  ;;  %5884 = vmatmul.mubr.bf16.gmra.mrb[72].mxu0 %v1204_v15  ;;  %vm3423_vm15 = vc.u32 %v7045_v14, %v7035_v1 }
 0x1d4   :  { %v1131_v59 = vmax.f32 %v913_v37, 0.0  ;;  %v916_v47 = vadd.f32 %v915_v46, %v6979_v4  ;;  %v3425_v30 = vsel %vm3423_vm15, %v3424_v23, %v7036_v2 }
 0x1d5   :  { %v1134_v50 = vmax.f32 %v924_v45, 0.0  ;;  %v3426_v35 = vadd.s32 %v3425_v30, %v3421_v19 }
 0x1d6   :  { %v1132_v54 = vmax.f32 %v916_v47, 0.0 }
 0x1d7   :  { %v1206_v58 = vpack.c.bf16 %v1134_v50, %v1133_v41  ;;  %v3427_v39 = vadd.s32 536870912, %v3426_v35 }
 0x1d8   :  { %v1205_v20 = vpack.c.bf16 %v1132_v54, %v1131_v59  ;;  %v5813_v26 = vpop.f32.mrb[16].mxu1 }
 0x1d9   :  { %v937_v6 = vadd.f32 %v5813_v26, %v6979_v4  ;;  %v928_v7 = vpop.f32.mrb[17].mxu1  ;;  %v7058_v46 = vshrl.u32 %v3427_v39, 30 }
 0x1da   :  { %v929_v11 = vadd.f32 %v928_v7, %v6979_v4  ;;  %v5814_v44 = vpop.f32.mrb[18].mxu1  ;;  %5887 = vmatprep.mubr.bf16.mxu0 %v1205_v20 }
 0x1db   :  { %v940_v15 = vadd.f32 %v5814_v44, %v6979_v4  ;;  %v931_v16 = vpop.f32.mrb[19].mxu1  ;;  %5888 = vmatmul.mubr.bf16.gmra.mrb[76].mxu0 %v1206_v58  ;;  %v1137_v5 = vmax.f32 %v937_v6, 0.0  ;;  %v3429_v51 = vshll.u32 %v7058_v46, 30 }
 0x1dc   :  { %v932_v18 = vadd.f32 %v931_v16, %v6979_v4  ;;  %v1135_v25 = vmax.f32 %v929_v11, 0.0 }
 0x1dd   :  { %v1138_v24 = vmax.f32 %v940_v15, 0.0  ;;  %v3430_v55 = vsub.s32 %v3426_v35, %v3429_v51 }
 0x1de   :  { %v1136_v28 = vmax.f32 %v932_v18, 0.0 }
 0x1df   :  { %v1208_v29 = vpack.c.bf16 %v1138_v24, %v1137_v5  ;;  %v3432_v61 = vsub.s32 0, %v3430_v55  ;;  %v3422_v24 = vadd.s32 %v7035_v1, %v7045_v14 }
 0x1e0   :  { %v1207_v32 = vpack.c.bf16 %v1136_v28, %v1135_v25  ;;  %v5817_v17 = vpop.f32.mrb[20].mxu1 }
 0x1e1   :  { %v953_v37 = vadd.f32 %v5817_v17, %v6979_v4  ;;  %v944_v3 = vpop.f32.mrb[21].mxu1  ;;  %v5368_v2 = vmin.u32 %v3432_v61, %v3430_v55 }
 0x1e2   :  { %v945_v62 = vadd.f32 %v944_v3, %v6979_v4  ;;  %v5818_v38 = vpop.f32.mrb[22].mxu1  ;;  %5891 = vmatprep.mubr.bf16.mxu0 %v1207_v32 }
 0x1e3   :  { %v956_v40 = vadd.f32 %v5818_v38, %v6979_v4  ;;  %v947_v41 = vpop.f32.mrb[23].mxu1  ;;  %5892 = vmatmul.mubr.bf16.gmra.mrb[80].mxu0 %v1208_v29  ;;  %v1141_v59 = vmax.f32 %v953_v37, 0.0  ;;  %v3434_v11 = vclz %v5368_v2  ;;  %v3452_v2 = vsub.s32 4, %v7058_v46 }
 0x1e4   :  { %v948_v45 = vadd.f32 %v947_v41, %v6979_v4  ;;  %v1139_v48 = vmax.f32 %v945_v62, 0.0 }
 0x1e5   :  { %v1142_v47 = vmax.f32 %v956_v40, 0.0  ;;  %v5369_v16 = vadd.s32 4294967294, %v3434_v11 }
 0x1e6   :  { %v1140_v50 = vmax.f32 %v948_v45, 0.0 }
 0x1e7   :  { %v1210_v52 = vpack.c.bf16 %v1142_v47, %v1141_v59  ;;  %vm5370_vm0 = vcmp.lt.s32.totalorder %v5369_v16, 0 }
 0x1e8   :  { %v1209_v53 = vpack.c.bf16 %v1140_v50, %v1139_v48  ;;  %v5821_v54 = vpop.f32.mrb[24].mxu1  ;;  %v3437_v29 = vsel %vm5370_vm0, 0, %v5369_v16 }
 0x1e9   :  { %v969_v56 = vadd.f32 %v5821_v54, %v6979_v4  ;;  %v960_v57 = vpop.f32.mrb[25].mxu1  ;;  %v3438_v32 = vsub.s32 32, %v3437_v29  ;;  %v3439_v17 = vshll.u32 %v3430_v55, %v3437_v29  ;;  %v3442_v3 = vsub.s32 4294967266, %v3437_v29 }
 0x1ea   :  { %v961_v58 = vadd.f32 %v960_v57, %v6979_v4  ;;  %v5822_v60 = vpop.f32.mrb[26].mxu1  ;;  %5895 = vmatprep.mubr.bf16.mxu0 %v1209_v53 }
 0x1eb   :  { %v972_v20 = vadd.f32 %v5822_v60, %v6979_v4  ;;  %v963_v26 = vpop.f32.mrb[27].mxu1  ;;  %5896 = vmatmul.mubr.bf16.gmra.mrb[84].mxu0 %v1210_v52  ;;  %v1145_v6 = vmax.f32 %v969_v56, 0.0  ;;  %v3440_v39 = vshrl.u32 %v3422_v24, %v3438_v32  ;;  %v3443_v41 = vadd.s32 127, %v3442_v3 }
 0x1ec   :  { %v964_v63 = vadd.f32 %v963_v26, %v6979_v4  ;;  %v1143_v8 = vmax.f32 %v961_v58, 0.0 }
 0x1ed   :  { %v1146_v7 = vmax.f32 %v972_v20, 0.0  ;;  %v3441_v14 = vor.u32 %v3440_v39, %v3439_v17  ;;  %v3444_v48 = vshll.u32 %v3443_v41, 23 }
 0x1ee   :  { %v1144_v9 = vmax.f32 %v964_v63, 0.0 }
 0x1ef   :  { %v1212_v44 = vpack.c.bf16 %v1146_v7, %v1145_v6  ;;  %v3445_v54 = vor.u32 4788187, %v3444_v48  ;;  %v3448_v55 = vcvt.s32.f32 %v3441_v14 }
 0x1f0   :  { %v1211_v13 = vpack.c.bf16 %v1144_v9, %v1143_v8  ;;  %v5825_v15 = vpop.f32.mrb[28].mxu1 }
 0x1f1   :  { %v985_v18 = vadd.f32 %v5825_v15, %v6979_v4  ;;  %v976_v19 = vpop.f32.mrb[29].mxu1  ;;  %v3446_v60 = vand.u32 2147483647, %v3445_v54 }
 0x1f2   :  { %v977_v23 = vadd.f32 %v976_v19, %v6979_v4  ;;  %v5826_v5 = vpop.f32.mrb[30].mxu1  ;;  %5899 = vmatprep.mubr.bf16.mxu0 %v1211_v13 }
 0x1f3   :  { %v988_v25 = vadd.f32 %v5826_v5, %v6979_v4  ;;  %v979_v28 = vpop.f32.mrb[31].mxu1  ;;  %5900 = vmatmul.mubr.bf16.gmra.mrb[88].mxu0 %v1212_v44  ;;  %v1149_v35 = vmax.f32 %v985_v18, 0.0  ;;  %v3449_v63 = vmul.f32 %v3448_v55, %v3446_v60 }
 0x1f4   :  { %v980_v30 = vadd.f32 %v979_v28, %v6979_v4  ;;  %v1147_v62 = vmax.f32 %v977_v23, 0.0  ;;  %v3453_v23 = vsel %vm3368_vm4, %v3452_v2, %v7058_v46 }
 0x1f5   :  { %v1150_v37 = vmax.f32 %v988_v25, 0.0  ;;  %v3450_v44 = vxor.u32 2147483648, %v3449_v63 }
 0x1f6   :  { %v1148_v38 = vmax.f32 %v980_v30, 0.0  ;;  %v3455_v30 = vsel %vm7080_vm5, 0, %v3453_v23 }
 0x1f7   :  { %v1214_v40 = vpack.c.bf16 %v1150_v37, %v1149_v35  ;;  %v3451_v19 = vsel %vm3368_vm4, %v3450_v44, %v3449_v63  ;;  %v3459_v17 = vadd.s32 3, %v3455_v30 }
 0x1f8   :  { %v1213_v45 = vpack.c.bf16 %v1148_v38, %v1147_v62  ;;  %v5829_v1 = vpop.f32.mrb[32].mxu1  ;;  %v3454_v34 = vsel %vm7080_vm5, %v6996_v27, %v3451_v19 }
 0x1f9   :  { %v1001_v59 = vadd.f32 %v5829_v1, %v6979_v4  ;;  %v992_v47 = vpop.f32.mrb[33].mxu1  ;;  %6244 = vcosq.f32 %v3454_v34  ;;  %v3460_v41 = vand.u32 3, %v3459_v17 }
 0x1fa   :  { %v993_v50 = vadd.f32 %v992_v47, %v6979_v4  ;;  %v5830_v51 = vpop.f32.mrb[34].mxu1  ;;  %5903 = vmatprep.mubr.bf16.mxu0 %v1213_v45  ;;  %6246 = vsinq.f32 %v3454_v34  ;;  %v3563_v45 = vand.u32 3, %v3455_v30  ;;  %v7112_v34 = vld [vmem:[%s8399_s1] sm:$0x3] }
 0x1fb   :  { %v1004_v52 = vadd.f32 %v5830_v51, %v6979_v4  ;;  %v995_v53 = vpop.f32.mrb[35].mxu1  ;;  %5904 = vmatmul.mubr.bf16.gmra.mrb[92].mxu0 %v1214_v40  ;;  %v1153_v57 = vmax.f32 %v1001_v59, 0.0  ;;  %vm3465_vm6 = vcmp.eq.s32.totalorder %v3460_v41, 2  ;;  %vm3462_vm8 = vcmp.eq.s32.totalorder %v3460_v41, 0 }
 0x1fc   :  { %v996_v56 = vadd.f32 %v995_v53, %v6979_v4  ;;  %v1151_v61 = vmax.f32 %v993_v50, 0.0  ;;  %vm3568_vm7 = vcmp.eq.s32.totalorder %v3563_v45, 2  ;;  %vm3565_vm9 = vcmp.eq.s32.totalorder %v3563_v45, 0 }
 0x1fd   :  { %v1154_v58 = vmax.f32 %v1004_v52, 0.0  ;;  %vm3461_vm10 = vcmp.lt.s32.totalorder %v3460_v41, 2  ;;  %vm3564_vm11 = vcmp.lt.s32.totalorder %v3563_v45, 2 }
 0x1fe   :  { %v1152_v20 = vmax.f32 %v996_v56, 0.0 }
 0x1ff   :  { %v1216_v26 = vpack.c.bf16 %v1154_v58, %v1153_v57 }
 0x200   :  { %v1215_v6 = vpack.c.bf16 %v1152_v20, %v1151_v61  ;;  %v5833_v7 = vpop.f32.mrb[36].mxu1 }
 0x201   :  { %v1017_v8 = vadd.f32 %v5833_v7, %v6979_v4  ;;  %v1008_v9 = vpop.f32.mrb[37].mxu1 }
 0x202   :  { %v1009_v13 = vadd.f32 %v1008_v9, %v6979_v4  ;;  %v5834_v15 = vpop.f32.mrb[38].mxu1  ;;  %5907 = vmatprep.mubr.bf16.mxu0 %v1215_v6 }
 0x203   :  { %v1020_v16 = vadd.f32 %v5834_v15, %v6979_v4  ;;  %v1011_v18 = vpop.f32.mrb[39].mxu1  ;;  %5908 = vmatmul.mubr.bf16.gmra.mrb[96].mxu0 %v1216_v26  ;;  %v1157_v24 = vmax.f32 %v1017_v8, 0.0  ;;  %v6245_v50 = vpop.eup %6244 }
 0x204   :  { %v1012_v5 = vadd.f32 %v1011_v18, %v6979_v4  ;;  %v1155_v28 = vmax.f32 %v1009_v13, 0.0  ;;  %v6247_v52 = vpop.eup %6246  ;;  %v3466_v55 = vxor.u32 2147483648, %v6245_v50 }
 0x205   :  { %v1158_v25 = vmax.f32 %v1020_v16, 0.0  ;;  %v3463_v58 = vxor.u32 2147483648, %v6247_v52 }
 0x206   :  { %v1156_v29 = vmax.f32 %v1012_v5, 0.0  ;;  %v3570_v20 = vsel %vm3568_vm7, %v3466_v55, %v6247_v52  ;;  %v3467_v26 = vsel %vm3465_vm6, %v3466_v55, %v6247_v52 }
 0x207   :  { %v1218_v32 = vpack.c.bf16 %v1158_v25, %v1157_v24  ;;  %v3567_v6 = vsel %vm3565_vm9, %v6245_v50, %v3463_v58  ;;  %v3464_v7 = vsel %vm3462_vm8, %v6245_v50, %v3463_v58  ;;  %v7127_v50 = vsub.s32 3, %v6718_v42 }
 0x208   :  { %v1217_v35 = vpack.c.bf16 %v1156_v29, %v1155_v28  ;;  %v5837_v37 = vpop.f32.mrb[40].mxu1  ;;  %v3571_v9 = vsel %vm3564_vm11, %v3567_v6, %v3570_v20  ;;  %v3468_v11 = vsel %vm3461_vm10, %v3464_v7, %v3467_v26  ;;  %v1913_v28 = vand.u32 2139095040, %v7112_v34 }
 0x209   :  { %v1033_v46 = vadd.f32 %v5837_v37, %v6979_v4  ;;  %v1024_v3 = vpop.f32.mrb[41].mxu1  ;;  %v3572_v15 = vsel %vm3458_vm12, nan, %v3571_v9  ;;  %v7106_v27 = vsel %vm3458_vm12, nan, %v3468_v11  ;;  %v7119_v37 = vmul.f32 2.0, %v7112_v34 }
 0x20a   :  { %v1025_v62 = vadd.f32 %v1024_v3, %v6979_v4  ;;  %v5838_v38 = vpop.f32.mrb[42].mxu1  ;;  %5911 = vmatprep.mubr.bf16.mxu0 %v1217_v35  ;;  %3662 = vrot.lane.b32.xlu0 %v3572_v15, %s6332_s3  ;;  %v1914_v35 = vshrl.u32 %v1913_v28, 23 }
 0x20b   :  { %v1036_v39 = vadd.f32 %v5838_v38, %v6979_v4  ;;  %v1027_v40 = vpop.f32.mrb[43].mxu1  ;;  %5912 = vmatmul.mubr.bf16.gmra.mrb[100].mxu0 %v1218_v32  ;;  %v1161_v14 = vmax.f32 %v1033_v46, 0.0 }
 0x20c   :  { %v1028_v1 = vadd.f32 %v1027_v40, %v6979_v4  ;;  %v1159_v47 = vmax.f32 %v1025_v62, 0.0  ;;  %v5311_v38 = vadd.s32 4294967169, %v1914_v35 }
 0x20d   :  { %v1162_v59 = vmax.f32 %v1036_v39, 0.0  ;;  %v2121_v39 = vand.u32 2139095040, %v7119_v37 }
 0x20e   :  { %v1160_v48 = vmax.f32 %v1028_v1, 0.0  ;;  %v1920_v1 = vadd.s32 1, %v5311_v38 }
 0x20f   :  { %v1220_v51 = vpack.c.bf16 %v1162_v59, %v1161_v14  ;;  %v2122_v14 = vshrl.u32 %v2121_v39, 23  ;;  %v7124_v59 = vmul.f32 4.0, %v7112_v34 }
 0x210   :  { %v1219_v53 = vpack.c.bf16 %v1160_v48, %v1159_v47  ;;  %v5841_v54 = vpop.f32.mrb[44].mxu1  ;;  %vm1921_vm13 = vcmp.gt.s32.totalorder %v1920_v1, 0 }
 0x211   :  { %v1049_v56 = vadd.f32 %v5841_v54, %v6979_v4  ;;  %v1040_v57 = vpop.f32.mrb[45].mxu1  ;;  %v2329_v54 = vand.u32 2139095040, %v7124_v59 }
 0x212   :  { %v1041_v60 = vadd.f32 %v1040_v57, %v6979_v4  ;;  %v5842_v61 = vpop.f32.mrb[46].mxu1  ;;  %5915 = vmatprep.mubr.bf16.mxu0 %v1219_v53  ;;  %v5319_v53 = vadd.s32 4294967169, %v2122_v14  ;;  %v1922_v57 = vsel %vm1921_vm13, %v1920_v1, 0 }
 0x213   :  { %v1052_v63 = vadd.f32 %v5842_v61, %v6979_v4  ;;  %v1043_v2 = vpop.f32.mrb[47].mxu1  ;;  %5916 = vmatmul.mubr.bf16.gmra.mrb[104].mxu0 %v1220_v51  ;;  %v1165_v44 = vmax.f32 %v1049_v56, 0.0  ;;  %v1924_v61 = vand.u32 31, %v1922_v57  ;;  %v2330_v7 = vshrl.u32 %v2329_v54, 23 }
 0x214   :  { %v1044_v8 = vadd.f32 %v1043_v2, %v6979_v4  ;;  %v1163_v16 = vmax.f32 %v1041_v60, 0.0  ;;  %v2128_v20 = vadd.s32 1, %v5319_v53  ;;  %v7137_v2 = vld [vmem:[%s8408_s10] sm:$0xff] }
 0x215   :  { %v1166_v13 = vmax.f32 %v1052_v63, 0.0  ;;  %v1739_v6 = vrot.slane %v7137_v2, %v7127_v50  ;;  %v1925_v11 = vsub.s32 32, %v1924_v61 }
 0x216   :  { %v1164_v18 = vmax.f32 %v1044_v8, 0.0  ;;  %vm2129_vm15 = vcmp.gt.s32.totalorder %v2128_v20, 0 }
 0x217   :  { %v1222_v19 = vpack.c.bf16 %v1166_v13, %v1165_v44  ;;  %v1910_v13 = vand.u32 2147483647, %v7112_v34  ;;  %v7142_v15 = vsel %vm2129_vm15, %v2128_v20, 0  ;;  %v1928_v35 = vshrl.u32 %v6328_v33, %v1925_v11 }
 0x218   :  { %v1221_v23 = vpack.c.bf16 %v1164_v18, %v1163_v16  ;;  %v5845_v5 = vpop.f32.mrb[48].mxu1  ;;  %v7144_v16 = vadd.s32 4294967169, %v2330_v7  ;;  %v1926_v20 = vshrl.u32 %v6327_v31, %v1925_v11 }
 0x219   :  { %v1065_v24 = vadd.f32 %v5845_v5, %v6979_v4  ;;  %v1056_v25 = vpop.f32.mrb[49].mxu1  ;;  %v7149_v5 = vand.u32 31, %v7142_v15  ;;  %v1917_v28 = vand.u32 8388607, %v1910_v13 }
 0x21a   :  { %v1057_v29 = vadd.f32 %v1056_v25, %v6979_v4  ;;  %v5846_v30 = vpop.f32.mrb[50].mxu1  ;;  %5919 = vmatprep.mubr.bf16.mxu0 %v1221_v23  ;;  %v1937_v23 = vshrl.u32 %v6325_v12, %v1925_v11 }
 0x21b   :  { %v1068_v32 = vadd.f32 %v5846_v30, %v6979_v4  ;;  %v1059_v17 = vpop.f32.mrb[51].mxu1  ;;  %5920 = vmatmul.mubr.bf16.gmra.mrb[108].mxu0 %v1222_v19  ;;  %v1169_v3 = vmax.f32 %v1065_v24, 0.0  ;;  %v1936_v19 = vshll.u32 %v6324_v10, %v1924_v61  ;;  %v1927_v30 = vshll.u32 %v6327_v31, %v1924_v61 }
 0x21c   :  { %v1060_v46 = vadd.f32 %v1059_v17, %v6979_v4  ;;  %v1167_v40 = vmax.f32 %v1057_v29, 0.0  ;;  %v1923_v29 = vshrl.u32 %v1922_v57, 5  ;;  %v1918_v39 = vor.u32 8388608, %v1917_v28 }
 0x21d   :  { %v1170_v62 = vmax.f32 %v1068_v32, 0.0  ;;  %v1938_v54 = vor.u32 %v1937_v23, %v1936_v19  ;;  %v1940_v57 = vshrl.u32 %v6326_v22, %v1925_v11 }
 0x21e   :  { %v1168_v41 = vmax.f32 %v1060_v46, 0.0  ;;  %v1930_v46 = vshll.u32 %v6328_v33, %v1924_v61  ;;  %vm1942_vm0 = vcmp.lt.s32.totalorder %v1923_v29, 1  ;;  %vm1943_vm4 = vcmp.lt.s32.totalorder %v1923_v29, 2 }
 0x21f   :  { %v1224_v45 = vpack.c.bf16 %v1170_v62, %v1169_v3  ;;  %v1931_v3 = vshrl.u32 %v6329_v49, %v1925_v11  ;;  %vm1944_vm5 = vcmp.lt.s32.totalorder %v1923_v29, 3  ;;  %vm1945_vm6 = vcmp.lt.s32.totalorder %v1923_v29, 4 }
 0x220   :  { %v1223_v47 = vpack.c.bf16 %v1168_v41, %v1167_v40  ;;  %v5849_v48 = vpop.f32.mrb[52].mxu1  ;;  %v1933_v40 = vshll.u32 %v6329_v49, %v1924_v61  ;;  %v1934_v41 = vshrl.u32 %v6324_v10, %v1925_v11  ;;  %v2133_v29 = vsub.s32 32, %v7149_v5 }
 0x221   :  { %v1081_v51 = vadd.f32 %v5849_v48, %v6979_v4  ;;  %v1072_v52 = vpop.f32.mrb[53].mxu1  ;;  %v1932_v48 = vor.u32 %v1931_v3, %v1930_v46 }
 0x222   :  { %v1073_v55 = vadd.f32 %v1072_v52, %v6979_v4  ;;  %v5850_v56 = vpop.f32.mrb[54].mxu1  ;;  %5923 = vmatprep.mubr.bf16.mxu0 %v1223_v47  ;;  %v1929_v47 = vor.u32 %v1928_v35, %v1927_v30  ;;  %v1935_v53 = vor.u32 %v1934_v41, %v1933_v40 }
 0x223   :  { %v1084_v58 = vadd.f32 %v5850_v56, %v6979_v4  ;;  %v1075_v60 = vpop.f32.mrb[55].mxu1  ;;  %5924 = vmatmul.mubr.bf16.gmra.mrb[112].mxu0 %v1224_v45  ;;  %v1173_v26 = vmax.f32 %v1081_v51, 0.0  ;;  %v1939_v56 = vshll.u32 %v6325_v12, %v1924_v61 }
 0x224   :  { %v1076_v63 = vadd.f32 %v1075_v60, %v6979_v4  ;;  %v1171_v8 = vmax.f32 %v1073_v55, 0.0  ;;  %v1954_v61 = vsel %vm1942_vm0, %v1932_v48, %v1935_v53  ;;  %v1946_v23 = vsel %vm1942_vm0, %v1926_v20, %v1929_v47 }
 0x225   :  { %v1174_v9 = vmax.f32 %v1084_v58, 0.0  ;;  %v2138_v20 = vshll.u32 %v6328_v33, %v7149_v5 }
 0x226   :  { %v1172_v44 = vmax.f32 %v1076_v63, 0.0  ;;  %v1950_v63 = vsel %vm1942_vm0, %v1929_v47, %v1932_v48 }
 0x227   :  { %v1226_v18 = vpack.c.bf16 %v1174_v9, %v1173_v26  ;;  %v1941_v26 = vor.u32 %v1940_v57, %v1939_v56  ;;  %v1947_v9 = vsel %vm1945_vm6, %v1935_v53, 2102212464  ;;  %v2135_v56 = vshll.u32 %v6327_v31, %v7149_v5 }
 0x228   :  { %v1225_v24 = vpack.c.bf16 %v1172_v44, %v1171_v8  ;;  %v5853_v25 = vpop.f32.mrb[56].mxu1  ;;  %v1951_v44 = vsel %vm1945_vm6, %v1938_v54, 920167782 }
 0x229   :  { %v1097_v32 = vadd.f32 %v5853_v25, %v6979_v4  ;;  %v1088_v17 = vpop.f32.mrb[57].mxu1  ;;  %v1952_v11 = vsel %vm1944_vm5, %v1935_v53, %v1951_v44 }
 0x22a   :  { %v1089_v62 = vadd.f32 %v1088_v17, %v6979_v4  ;;  %v5854_v38 = vpop.f32.mrb[58].mxu1  ;;  %5927 = vmatprep.mubr.bf16.mxu0 %v1225_v24  ;;  %v1948_v24 = vsel %vm1944_vm5, %v1932_v48, %v1947_v9  ;;  %v1955_v17 = vsel %vm1945_vm6, %v1941_v26, 1326507024  ;;  %v2141_v26 = vshll.u32 %v6329_v49, %v7149_v5 }
 0x22b   :  { %v1177_v45 = vmax.f32 %v1097_v32, 0.0  ;;  %v1100_v1 = vadd.f32 %v5854_v38, %v6979_v4  ;;  %v1091_v14 = vpop.f32.mrb[59].mxu1  ;;  %5928 = vmatmul.mubr.bf16.gmra.mrb[116].mxu0 %v1226_v18  ;;  %v1949_v30 = vsel %vm1943_vm4, %v1946_v23, %v1948_v24  ;;  %v1953_v32 = vsel %vm1943_vm4, %v1950_v63, %v1952_v11 }
 0x22c   :  { %v1175_v51 = vmax.f32 %v1089_v62, 0.0  ;;  %v1092_v52 = vadd.f32 %v1091_v14, %v6979_v4  ;;  %v1956_v62 = vsel %vm1944_vm5, %v1938_v54, %v1955_v17  ;;  %v1958_v38 = vshll.u32 %v1918_v39, 8 }
 0x22d   :  { %v1178_v55 = vmax.f32 %v1100_v1, 0.0  ;;  %v2118_v1 = vand.u32 2147483647, %v7119_v37  ;;  %v2145_v11 = vshrl.u32 %v6325_v12, %v2133_v29  ;;  %v2148_v17 = vshrl.u32 %v6326_v22, %v2133_v29 }
 0x22e   :  { %v1176_v58 = vmax.f32 %v1092_v52, 0.0 }
 0x22f   :  { %v1228_v60 = vpack.c.bf16 %v1178_v55, %v1177_v45  ;;  %v1957_v45 = vsel %vm1943_vm4, %v1954_v61, %v1956_v62  ;;  %v7186_v53 = vmul.u32.u64.low %v1958_v38, %v1953_v32  ;;  %v7187_v55 = vmul.u32.u64.high %v1958_v38, %v1953_v32, %v7186_v53 }
 0x230   :  { %v1227_v7 = vpack.c.bf16 %v1176_v58, %v1175_v51  ;;  %v5857_v8 = vpop.f32.mrb[60].mxu1  ;;  %v7183_v47 = vmul.u32.u64.low %v1958_v38, %v1957_v45  ;;  %v7184_v48 = vmul.u32.u64.high %v1958_v38, %v1957_v45, %v7183_v47  ;;  %v1965_v51 = vmul.u32 %v1958_v38, %v1949_v30 }
 0x231   :  { %v1113_v18 = vadd.f32 %v5857_v8, %v6979_v4  ;;  %v1104_v19 = vpop.f32.mrb[61].mxu1  ;;  %v2125_v39 = vand.u32 8388607, %v2118_v1  ;;  %v2136_v8 = vshrl.u32 %v6328_v33, %v2133_v29  ;;  %v1968_v44 = vadd.s32 1, %v7187_v55 }
 0x232   :  { %v1105_v25 = vadd.f32 %v1104_v19, %v6979_v4  ;;  %v5858_v28 = vpop.f32.mrb[62].mxu1  ;;  %5931 = vmatprep.mubr.bf16.mxu0 %v1227_v7  ;;  %vm1967_vm7 = vc.u32 %v7184_v48, %v7186_v53  ;;  %v2139_v61 = vshrl.u32 %v6329_v49, %v2133_v29  ;;  %v2144_v19 = vshll.u32 %v6324_v10, %v7149_v5 }
 0x233   :  { %v1181_v35 = vmax.f32 %v1113_v18, 0.0  ;;  %v1116_v46 = vadd.f32 %v5858_v28, %v6979_v4  ;;  %v1107_v3 = vpop.f32.mrb[63].mxu1  ;;  %5932 = vmatmul.mubr.bf16.gmra.mrb[120].mxu0 %v1228_v60  ;;  %v2126_v60 = vor.u32 8388608, %v2125_v39  ;;  %v2142_v18 = vshrl.u32 %v6324_v10, %v2133_v29 }
 0x234   :  { %v1179_v40 = vmax.f32 %v1105_v25, 0.0  ;;  %v1108_v41 = vadd.f32 %v1107_v3, %v6979_v4  ;;  %v2131_v4 = vshrl.u32 %v7142_v15, 5  ;;  %v2134_v15 = vshrl.u32 %v6327_v31, %v2133_v29 }
 0x235   :  { %v1182_v14 = vmax.f32 %v1116_v46, 0.0  ;;  %v2137_v24 = vor.u32 %v2136_v8, %v2135_v56  ;;  %v2147_v25 = vshll.u32 %v6325_v12, %v7149_v5  ;;  %v1969_v28 = vsel %vm1967_vm7, %v1968_v44, %v7187_v55 }
 0x236   :  { %v1180_v52 = vmax.f32 %v1108_v41, 0.0  ;;  %v2140_v30 = vor.u32 %v2139_v61, %v2138_v20  ;;  %v2143_v32 = vor.u32 %v2142_v18, %v2141_v26  ;;  %v1970_v46 = vadd.s32 %v1969_v28, %v1965_v51 }
 0x237   :  { %v1230_v54 = vpack.c.bf16 %v1182_v14, %v1181_v35  ;;  %v2146_v3 = vor.u32 %v2145_v11, %v2144_v19  ;;  %vm2150_vm8 = vcmp.lt.s32.totalorder %v2131_v4, 1  ;;  %v2149_v62 = vor.u32 %v2148_v17, %v2147_v25 }
 0x238   :  { %v1229_v57 = vpack.c.bf16 %v1180_v52, %v1179_v40  ;;  %v1822_v58 = vpop.f32.mrb[64].mxu1  ;;  %vm2151_vm9 = vcmp.lt.s32.totalorder %v2131_v4, 2  ;;  %vm2152_vm10 = vcmp.lt.s32.totalorder %v2131_v4, 3  ;;  %vm2153_vm11 = vcmp.lt.s32.totalorder %v2131_v4, 4 }
 0x239   :  { %v1823_v63 = vadd.f32 %v1822_v58, %v1739_v6  ;;  %v5957_v7 = vpop.f32.mrb[65].mxu1  ;;  %v1971_v5 = vadd.s32 536870912, %v1970_v46  ;;  %v2154_v38 = vsel %vm2150_vm8, %v2134_v15, %v2137_v24  ;;  %v2155_v40 = vsel %vm2153_vm11, %v2143_v32, 2102212464 }
 0x23a   :  { %5935 = vmatprep.mubr.bf16.mxu0 %v1229_v57  ;;  %v1825_v9 = vpop.f32.mrb[66].mxu1  ;;  %v2158_v41 = vsel %vm2150_vm8, %v2137_v24, %v2140_v30  ;;  %v2156_v45 = vsel %vm2152_vm10, %v2140_v30, %v2155_v40  ;;  %v2159_v14 = vsel %vm2153_vm11, %v2146_v3, 920167782  ;;  %v2162_v47 = vsel %vm2150_vm8, %v2140_v30, %v2143_v32 }
 0x23b   :  { %v1828_v6 = vmax.f32 %v1823_v63, 0.0  ;;  %5936 = vmatmul.mubr.bf16.gmra.mrb[124].mxu0 %v1230_v54  ;;  %v5958_v23 = vpop.f32.mrb[67].mxu1  ;;  %v2163_v52 = vsel %vm2153_vm11, %v2149_v62, 1326507024  ;;  %v7220_v55 = vshrl.u32 %v1971_v5, 30  ;;  %v2160_v39 = vsel %vm2152_vm10, %v2143_v32, %v2159_v14 }
 0x23c   :  { %6023 = vmatprep.mubr.msk.bf16.mxu0 %vm8410_vm14, %v6322_v21  ;;  %v2164_v51 = vsel %vm2152_vm10, %v2146_v3, %v2163_v52  ;;  %v7223_v54 = vmul.f32 8.0, %v7112_v34  ;;  %v2161_v29 = vsel %vm2151_vm9, %v2158_v41, %v2160_v39  ;;  %v2166_v57 = vshll.u32 %v2126_v60, 8 }
 0x23d   :  { %v1837_v35 = vpack.c.bf16 %v1828_v6, %v1828_v6  ;;  %v2165_v56 = vsel %vm2151_vm9, %v2162_v47, %v2164_v51  ;;  %v1973_v58 = vshll.u32 %v7220_v55, 30  ;;  %v2157_v20 = vsel %vm2151_vm9, %v2154_v38, %v2156_v45 }
 0x23e   :  { %v2326_v26 = vand.u32 2147483647, %v7124_v59  ;;  %v2336_v63 = vadd.s32 1, %v7144_v16  ;;  %v7231_v7 = vmul.u32.u64.low %v2166_v57, %v2165_v56  ;;  %v7232_v15 = vmul.u32.u64.high %v2166_v57, %v2165_v56, %v7231_v7 }
 0x23f   :  { %5968 = vmatmul.mubr.msk.bf16.vlgmr.msra.gmra.mrb[68].mxu1 %vm733_vm3, %v1837_v35  ;;  %v7234_v8 = vmul.u32.u64.low %v2166_v57, %v2161_v29  ;;  %v7235_v9 = vmul.u32.u64.high %v2166_v57, %v2161_v29, %v7234_v8  ;;  %v1974_v44 = vsub.s32 %v1970_v46, %v1973_v58  ;;  %v2537_v61 = vand.u32 2139095040, %v7223_v54 }
 0x240   :  { %vm2337_vm12 = vcmp.gt.s32.totalorder %v2336_v63, 0  ;;  %v2173_v19 = vmul.u32 %v2166_v57, %v2157_v20  ;;  %v2333_v6 = vand.u32 8388607, %v2326_v26  ;;  %v1966_v39 = vadd.s32 %v7186_v53, %v7184_v48 }
 0x241   :  { %v2338_v60 = vsel %vm2337_vm12, %v2336_v63, 0  ;;  %v1976_v18 = vsub.s32 0, %v1974_v44  ;;  %vm2175_vm13 = vc.u32 %v7232_v15, %v7234_v8  ;;  %v2176_v16 = vadd.s32 1, %v7235_v9 }
 0x242   :  { %v2340_v4 = vand.u32 31, %v2338_v60  ;;  %v7244_v24 = vshrl.u32 %v2338_v60, 5  ;;  %v2538_v25 = vshrl.u32 %v2537_v61, 23  ;;  %v2334_v47 = vor.u32 8388608, %v2333_v6 }
 0x243   :  { %v5312_v23 = vmin.u32 %v1976_v18, %v1974_v44  ;;  %v2177_v28 = vsel %vm2175_vm13, %v2176_v16, %v7235_v9  ;;  %vm7294_vm7 = vcmp.le.f32.partialorder %v1910_v13, 0.7853982  ;;  %vm1912_vm8 = vcmp.lt.s32.totalorder %v7112_v34, 0 }
 0x244   :  { %v2341_v11 = vsub.s32 32, %v2340_v4  ;;  %v2343_v30 = vshll.u32 %v6327_v31, %v2340_v4  ;;  %v2346_v32 = vshll.u32 %v6328_v33, %v2340_v4  ;;  %v2352_v17 = vshll.u32 %v6324_v10, %v2340_v4 }
 0x245   :  { %v1978_v35 = vclz %v5312_v23  ;;  %v2178_v46 = vadd.s32 %v2177_v28, %v2173_v19  ;;  %v2349_v3 = vshll.u32 %v6329_v49, %v2340_v4  ;;  %v2355_v62 = vshll.u32 %v6325_v12, %v2340_v4 }
 0x246   :  { %v2344_v5 = vshrl.u32 %v6328_v33, %v2341_v11  ;;  %v2347_v38 = vshrl.u32 %v6329_v49, %v2341_v11  ;;  %v2350_v40 = vshrl.u32 %v6324_v10, %v2341_v11  ;;  %v2353_v41 = vshrl.u32 %v6325_v12, %v2341_v11 }
 0x247   :  { %v5313_v45 = vadd.s32 4294967294, %v1978_v35  ;;  %v2179_v14 = vadd.s32 536870912, %v2178_v46  ;;  %v2356_v52 = vshrl.u32 %v6326_v22, %v2341_v11  ;;  %vm2358_vm0 = vcmp.lt.s32.totalorder %v7244_v24, 1 }
 0x248   :  { %v2345_v51 = vor.u32 %v2344_v5, %v2343_v30  ;;  %v2348_v29 = vor.u32 %v2347_v38, %v2346_v32  ;;  %v2354_v56 = vor.u32 %v2353_v41, %v2352_v17  ;;  %v2351_v58 = vor.u32 %v2350_v40, %v2349_v3 }
 0x249   :  { %vm5314_vm15 = vcmp.lt.s32.totalorder %v5313_v45, 0  ;;  %v7259_v57 = vshrl.u32 %v2179_v14, 30  ;;  %v2357_v63 = vor.u32 %v2356_v52, %v2355_v62  ;;  %vm2360_vm4 = vcmp.lt.s32.totalorder %v7244_v24, 3 }
 0x24a   :  { %v1981_v20 = vsel %vm5314_vm15, 0, %v5313_v45  ;;  %vm2361_vm5 = vcmp.lt.s32.totalorder %v7244_v24, 4  ;;  %v2342_v53 = vshrl.u32 %v6327_v31, %v2341_v11  ;;  %vm2359_vm6 = vcmp.lt.s32.totalorder %v7244_v24, 2 }
 0x24b   :  { %v1982_v7 = vsub.s32 32, %v1981_v20  ;;  %v1983_v9 = vshll.u32 %v1974_v44, %v1981_v20  ;;  %v1986_v61 = vsub.s32 4294967266, %v1981_v20  ;;  %v2181_v48 = vshll.u32 %v7259_v57, 30 }
 0x24c   :  { %v2366_v60 = vsel %vm2358_vm0, %v2345_v51, %v2348_v29  ;;  %v2367_v18 = vsel %vm2361_vm5, %v2354_v56, 920167782  ;;  %v2363_v6 = vsel %vm2361_vm5, %v2351_v58, 2102212464  ;;  %v2370_v44 = vsel %vm2358_vm0, %v2348_v29, %v2351_v58 }
 0x24d   :  { %v1984_v19 = vshrl.u32 %v1966_v39, %v1982_v7  ;;  %v1987_v4 = vadd.s32 127, %v1986_v61  ;;  %v2182_v16 = vsub.s32 %v2178_v46, %v2181_v48  ;;  %v2368_v23 = vsel %vm2360_vm4, %v2351_v58, %v2367_v18 }
 0x24e   :  { %v2371_v28 = vsel %vm2361_vm5, %v2357_v63, 1326507024  ;;  %v2369_v17 = vsel %vm2359_vm6, %v2366_v60, %v2368_v23  ;;  %v2362_v35 = vsel %vm2358_vm0, %v2342_v53, %v2345_v51  ;;  %v2374_v3 = vshll.u32 %v2334_v47, 8 }
 0x24f   :  { %v1985_v30 = vor.u32 %v1984_v19, %v1983_v9  ;;  %v1988_v32 = vshll.u32 %v1987_v4, 23  ;;  %v2184_v11 = vsub.s32 0, %v2182_v16  ;;  %v2372_v46 = vsel %vm2360_vm4, %v2354_v56, %v2371_v28 }
 0x250   :  { %v5335_v62 = vadd.s32 4294967169, %v2538_v25  ;;  %v2364_v41 = vsel %vm2360_vm4, %v2348_v29, %v2363_v6  ;;  %v2373_v45 = vsel %vm2359_vm6, %v2370_v44, %v2372_v46  ;;  %v2534_v39 = vand.u32 2147483647, %v7223_v54 }
 0x251   :  { %v1989_v5 = vor.u32 4788187, %v1988_v32  ;;  %v1992_v38 = vcvt.s32.f32 %v1985_v30  ;;  %v5320_v40 = vmin.u32 %v2184_v11, %v2182_v16  ;;  %v2365_v25 = vsel %vm2359_vm6, %v2362_v35, %v2364_v41 }
 0x252   :  { %v7283_v14 = vmul.u32.u64.low %v2374_v3, %v2369_v17  ;;  %v7284_v52 = vmul.u32.u64.high %v2374_v3, %v2369_v17, %v7283_v14  ;;  %v7287_v20 = vmul.u32.u64.low %v2374_v3, %v2373_v45  ;;  %v7288_v56 = vmul.u32.u64.high %v2374_v3, %v2373_v45, %v7287_v20 }
 0x253   :  { %v1990_v51 = vand.u32 2147483647, %v1989_v5  ;;  %v2186_v58 = vclz %v5320_v40  ;;  %v2544_v47 = vadd.s32 1, %v5335_v62  ;;  %v2174_v9 = vadd.s32 %v7234_v8, %v7232_v15  ;;  %v7333_v40 = vld [vmem:[%s8400_s2] sm:$0x3]  ;;  %s6333_s2 = smov 1  }
 0x254   :  { %v2541_v61 = vand.u32 8388607, %v2534_v39  ;;  %v1996_v24 = vsub.s32 4, %v7220_v55  ;;  %v2381_v53 = vmul.u32 %v2374_v3, %v2365_v25  ;;  %vm2383_vm10 = vc.u32 %v7288_v56, %v7283_v14 }
 0x255   :  { %v1993_v63 = vmul.f32 %v1992_v38, %v1990_v51  ;;  %v5321_v7 = vadd.s32 4294967294, %v2186_v58  ;;  %v2384_v13 = vadd.s32 1, %v7284_v52  ;;  %vm2545_vm11 = vcmp.gt.s32.totalorder %v2544_v47, 0 }
 0x256   :  { %v1997_v19 = vsel %vm1912_vm8, %v1996_v24, %v7220_v55  ;;  %vm2120_vm12 = vcmp.lt.s32.totalorder %v7119_v37, 0  ;;  %v2204_v28 = vsub.s32 4, %v7259_v57  ;;  %v2546_v30 = vsel %vm2545_vm11, %v2544_v47, 0 }
 0x257   :  { %v1994_v48 = vxor.u32 2147483648, %v1993_v63  ;;  %vm5322_vm9 = vcmp.lt.s32.totalorder %v5321_v7, 0  ;;  %v1999_v8 = vsel %vm7294_vm7, 0, %v1997_v19  ;;  %vm7322_vm13 = vcmp.le.f32.partialorder %v2118_v1, 0.7853982 }
 0x258   :  { %v2189_v60 = vsel %vm5322_vm9, 0, %v5321_v7  ;;  %v2003_v32 = vadd.s32 3, %v1999_v8  ;;  %v2205_v17 = vsel %vm2120_vm12, %v2204_v28, %v7259_v57  ;;  %v2542_v62 = vor.u32 8388608, %v2541_v61 }
 0x259   :  { %v1995_v18 = vsel %vm1912_vm8, %v1994_v48, %v1993_v63  ;;  %v2190_v4 = vsub.s32 32, %v2189_v60  ;;  %v2191_v6 = vshll.u32 %v2182_v16, %v2189_v60  ;;  %v2194_v23 = vsub.s32 4294967266, %v2189_v60 }
 0x25a   :  { %v1998_v15 = vsel %vm7294_vm7, %v7112_v34, %v1995_v18  ;;  %v2385_v16 = vsel %vm2383_vm10, %v2384_v13, %v7284_v52  ;;  %v2207_v5 = vsel %vm7322_vm13, 0, %v2205_v17  ;;  %v7328_v38 = vand.u32 31, %v2546_v30 }
 0x25b   :  { %6248 = vcosq.f32 %v1998_v15  ;;  %v2192_v44 = vshrl.u32 %v2174_v9, %v2190_v4  ;;  %v2195_v55 = vadd.s32 127, %v2194_v23  ;;  %v2386_v35 = vadd.s32 %v2385_v16, %v2381_v53 }
 0x25c   :  { %6250 = vsinq.f32 %v1998_v15  ;;  %v2745_v57 = vand.u32 2139095040, %v7333_v40  ;;  %v2004_v41 = vand.u32 3, %v2003_v32  ;;  %v2107_v52 = vand.u32 3, %v1999_v8 }
 0x25d   :  { %v2193_v11 = vor.u32 %v2192_v44, %v2191_v6  ;;  %v2196_v3 = vshll.u32 %v2195_v55, 23  ;;  %v2387_v51 = vadd.s32 536870912, %v2386_v35  ;;  %v2211_v20 = vadd.s32 3, %v2207_v5 }
 0x25e   :  { %v7336_v25 = vshrl.u32 %v2546_v30, 5  ;;  %v7338_v47 = vshll.u32 %v2542_v62, 8  ;;  %v7341_v63 = vadd.s32 %v7283_v14, %v7288_v56  ;;  %v2549_v29 = vsub.s32 32, %v7328_v38 }
 0x25f   :  { %v2197_v45 = vor.u32 4788187, %v2196_v3  ;;  %v2200_v1 = vcvt.s32.f32 %v2193_v11  ;;  %v2388_v7 = vshrl.u32 %v2387_v51, 30  ;;  %v7344_v9 = vshrl.u32 %v2745_v57, 23 }
 0x260   :  { %vm2005_vm15 = vcmp.lt.s32.totalorder %v2004_v41, 2  ;;  %vm2006_vm0 = vcmp.eq.s32.totalorder %v2004_v41, 0  ;;  %vm2009_vm4 = vcmp.eq.s32.totalorder %v2004_v41, 2  ;;  %vm2002_vm5 = vweird.f32 %v7112_v34 }
 0x261   :  { %v2198_v58 = vand.u32 2147483647, %v2197_v45  ;;  %vm2109_vm6 = vcmp.eq.s32.totalorder %v2107_v52, 0  ;;  %vm2112_vm7 = vcmp.eq.s32.totalorder %v2107_v52, 2  ;;  %v2389_v24 = vshll.u32 %v2388_v7, 30 }
 0x262   :  { %vm2108_vm8 = vcmp.lt.s32.totalorder %v2107_v52, 2  ;;  %v7347_v56 = vand.u32 3, %v2211_v20  ;;  %v7349_v18 = vand.u32 3, %v2207_v5  ;;  %vm2328_vm9 = vcmp.lt.s32.totalorder %v7124_v59, 0 }
 0x263   :  { %v2201_v61 = vmul.f32 %v2200_v1, %v2198_v58  ;;  %v7352_v19 = vsub.s32 %v2386_v35, %v2389_v24  ;;  %v2550_v4 = vshrl.u32 %v6327_v31, %v2549_v29  ;;  %v2551_v23 = vshll.u32 %v6327_v31, %v7328_v38 }
 0x264   :  { %v2552_v11 = vshrl.u32 %v6328_v33, %v2549_v29  ;;  %v2412_v46 = vsub.s32 4, %v2388_v7  ;;  %v2554_v62 = vshll.u32 %v6328_v33, %v7328_v38  ;;  %v2555_v5 = vshrl.u32 %v6329_v49, %v2549_v29 }
 0x265   :  { %v6249_v48 = vpop.eup %6248  ;;  %v2202_v14 = vxor.u32 2147483648, %v2201_v61  ;;  %v2392_v32 = vsub.s32 0, %v7352_v19  ;;  %v2557_v57 = vshll.u32 %v6329_v49, %v7328_v38  ;;  %vm2214_vm10 = vcmp.eq.s32.totalorder %v7347_v56, 0 }
 0x266   :  { %v6251_v53 = vpop.eup %6250  ;;  %v2010_v60 = vxor.u32 2147483648, %v6249_v48  ;;  %v2558_v41 = vshrl.u32 %v6324_v10, %v2549_v29  ;;  %v2560_v45 = vshll.u32 %v6324_v10, %v7328_v38  ;;  %v2561_v1 = vshrl.u32 %v6325_v12, %v2549_v29 }
 0x267   :  { %v2007_v13 = vxor.u32 2147483648, %v6251_v53  ;;  %v2203_v8 = vsel %vm2120_vm12, %v2202_v14, %v2201_v61  ;;  %v5328_v3 = vmin.u32 %v2392_v32, %v7352_v19  ;;  %vm2213_vm11 = vcmp.lt.s32.totalorder %v7347_v56, 2 }
 0x268   :  { %v2011_v6 = vsel %vm2009_vm4, %v2010_v60, %v6251_v53  ;;  %v2114_v15 = vsel %vm2112_vm7, %v2010_v60, %v6251_v53  ;;  %v2206_v30 = vsel %vm7322_vm13, %v7119_v37, %v2203_v8  ;;  %vm2217_vm12 = vcmp.eq.s32.totalorder %v7347_v56, 2 }
 0x269   :  { %v2008_v44 = vsel %vm2006_vm0, %v6249_v48, %v2007_v13  ;;  %v2111_v28 = vsel %vm2109_vm6, %v6249_v48, %v2007_v13  ;;  %6252 = vcosq.f32 %v2206_v30  ;;  %v2394_v34 = vclz %v5328_v3 }
 0x26a   :  { %v2012_v55 = vsel %vm2005_vm15, %v2008_v44, %v2011_v6  ;;  %v2115_v16 = vsel %vm2108_vm8, %v2111_v28, %v2114_v15  ;;  %6254 = vsinq.f32 %v2206_v30  ;;  %vm2317_vm13 = vcmp.eq.s32.totalorder %v7349_v18, 0 }
 0x26b   :  { %v2013_v17 = vsel %vm2002_vm5, nan, %v2012_v55  ;;  %v2116_v35 = vsel %vm2002_vm5, nan, %v2115_v16  ;;  %vm2320_vm15 = vcmp.eq.s32.totalorder %v7349_v18, 2  ;;  %vm2210_vm0 = vweird.f32 %v7119_v37 }
 0x26c   :  { %3574 = vrot.lane.b32.xlu1 %v2013_v17, %s6333_s2  ;;  %3578 = vrot.lane.b32.xlu0 %v2116_v35, %s6332_s3  ;;  %vm2316_vm4 = vcmp.lt.s32.totalorder %v7349_v18, 2  ;;  %v5329_v52 = vadd.s32 4294967294, %v2394_v34  ;;  %v2563_v51 = vshll.u32 %v6325_v12, %v7328_v38  ;;  %v2413_v58 = vsel %vm2328_vm9, %v2412_v46, %v2388_v7 }
 0x26d   :  { %v2553_v20 = vor.u32 %v2552_v11, %v2551_v23  ;;  %v2562_v61 = vor.u32 %v2561_v1, %v2560_v45  ;;  %v2564_v48 = vshrl.u32 %v6326_v22, %v2549_v29  ;;  %v2556_v24 = vor.u32 %v2555_v5, %v2554_v62 }
 0x26e   :  { %vm5330_vm5 = vcmp.lt.s32.totalorder %v5329_v52, 0  ;;  %v2559_v53 = vor.u32 %v2558_v41, %v2557_v57  ;;  %vm2566_vm6 = vcmp.lt.s32.totalorder %v7336_v25, 1  ;;  %vm2568_vm7 = vcmp.lt.s32.totalorder %v7336_v25, 3 }
 0x26f   :  { %v2397_v60 = vsel %vm5330_vm5, 0, %v5329_v52  ;;  %v2565_v14 = vor.u32 %v2564_v48, %v2563_v51  ;;  %vm2569_vm8 = vcmp.lt.s32.totalorder %v7336_v25, 4  ;;  %vm2567_vm14 = vcmp.lt.s32.totalorder %v7336_v25, 2 }
 0x270   :  { %v2398_v13 = vsub.s32 32, %v2397_v60  ;;  %v2399_v38 = vshll.u32 %v7352_v19, %v2397_v60  ;;  %v2402_v6 = vsub.s32 4294967266, %v2397_v60  ;;  %v2571_v7 = vsel %vm2569_vm8, %v2559_v53, 2102212464 }
 0x271   :  { %v2570_v29 = vsel %vm2566_vm6, %v2550_v4, %v2553_v20  ;;  %v2572_v8 = vsel %vm2568_vm7, %v2556_v24, %v2571_v7  ;;  %v2575_v23 = vsel %vm2569_vm8, %v2562_v61, 920167782  ;;  %v2574_v32 = vsel %vm2566_vm6, %v2553_v20, %v2556_v24 }
 0x272   :  { %v2400_v19 = vshrl.u32 %v7341_v63, %v2398_v13  ;;  %v2403_v30 = vadd.s32 127, %v2402_v6  ;;  %v2576_v16 = vsel %vm2568_vm7, %v2559_v53, %v2575_v23  ;;  %v2578_v4 = vsel %vm2566_vm6, %v2556_v24, %v2559_v53 }
 0x273   :  { %v6253_v15 = vpop.eup %6252  ;;  %v2579_v11 = vsel %vm2569_vm8, %v2565_v14, 1326507024  ;;  %v2577_v5 = vsel %vm2567_vm14, %v2574_v32, %v2576_v16  ;;  %v5343_v60 = vadd.s32 4294967169, %v7344_v9  ;;  %v7460_v13 = vsub.s32 2, %v6718_v42 }
 0x274   :  { %v6255_v44 = vpop.eup %6254  ;;  %v2218_v28 = vxor.u32 2147483648, %v6253_v15  ;;  %v2401_v35 = vor.u32 %v2400_v19, %v2399_v38  ;;  %v2404_v3 = vshll.u32 %v2403_v30, 23  ;;  %v2580_v57 = vsel %vm2568_vm7, %v2562_v61, %v2579_v11 }
 0x275   :  { %v2215_v55 = vxor.u32 2147483648, %v6255_v44  ;;  %v2581_v56 = vsel %vm2567_vm14, %v2578_v4, %v2580_v57  ;;  %v7455_v24 = vmul.u32.u64.low %v7338_v47, %v2577_v5  ;;  %v7456_v53 = vmul.u32.u64.high %v7338_v47, %v2577_v5, %v7455_v24 }
 0x276   :  { %v2219_v17 = vsel %vm2217_vm12, %v2218_v28, %v6255_v44  ;;  %v2322_v63 = vsel %vm2320_vm15, %v2218_v28, %v6255_v44  ;;  %v2405_v45 = vor.u32 4788187, %v2404_v3  ;;  %v2408_v1 = vcvt.s32.f32 %v2401_v35 }
 0x277   :  { %v2216_v46 = vsel %vm2214_vm10, %v6253_v15, %v2215_v55  ;;  %v2319_v62 = vsel %vm2317_vm13, %v6253_v15, %v2215_v55  ;;  %vm7440_vm10 = vcmp.le.f32.partialorder %v2326_v26, 0.7853982  ;;  %v2573_v26 = vsel %vm2567_vm14, %v2570_v29, %v2572_v8 }
 0x278   :  { %v2220_v34 = vsel %vm2213_vm11, %v2216_v46, %v2219_v17  ;;  %v2323_v41 = vsel %vm2316_vm4, %v2319_v62, %v2322_v63  ;;  %v2406_v18 = vand.u32 2147483647, %v2405_v45  ;;  %v2415_v61 = vsel %vm7440_vm10, 0, %v2413_v58 }
 0x279   :  { %v2221_v52 = vsel %vm2210_vm0, nan, %v2220_v34  ;;  %v2324_v51 = vsel %vm2210_vm0, nan, %v2323_v41  ;;  %v7449_v37 = vmul.u32.u64.low %v7338_v47, %v2581_v56  ;;  %v7450_v48 = vmul.u32.u64.high %v7338_v47, %v2581_v56, %v7449_v37 }
 0x27a   :  { %3582 = vrot.lane.b32.xlu1 %v2221_v52, %s6334_s24  ;;  %3586 = vrot.lane.b32.xlu0 %v2324_v51, %s6335_s5  ;;  %v2409_v14 = vmul.f32 %v2408_v1, %v2406_v18  ;;  %v2752_v38 = vadd.s32 1, %v5343_v60  ;;  %v2419_v58 = vadd.s32 3, %v2415_v61  ;;  %v2589_v7 = vmul.u32 %v7338_v47, %v2573_v26 }
 0x27b   :  { %vm2591_vm11 = vc.u32 %v7450_v48, %v7455_v24  ;;  %v2592_v25 = vadd.s32 1, %v7456_v53  ;;  %v2742_v15 = vand.u32 2147483647, %v7333_v40  ;;  %v7468_v9 = vand.u32 3, %v2415_v61 }
 0x27c   :  { %v2410_v6 = vxor.u32 2147483648, %v2409_v14  ;;  %vm2753_vm14 = vcmp.gt.s32.totalorder %v2752_v38, 0  ;;  %v7476_v28 = vrot.slane %v7137_v2, %v7460_v13  ;;  %v7478_v19 = vand.u32 3, %v2419_v58 }
 0x27d   :  { %v2754_v8 = vsel %vm2753_vm14, %v2752_v38, 0  ;;  %v2593_v44 = vsel %vm2591_vm11, %v2592_v25, %v7456_v53  ;;  %v2749_v32 = vand.u32 8388607, %v2742_v15  ;;  %v7483_v16 = vmul.f32 2.0, %v7333_v40 }
 0x27e   :  { %v2411_v29 = vsel %vm2328_vm9, %v2410_v6, %v2409_v14  ;;  %v2756_v47 = vand.u32 31, %v2754_v8  ;;  %v2594_v30 = vadd.s32 %v2593_v44, %v2589_v7  ;;  %vm2528_vm9 = vcmp.eq.s32.totalorder %v7468_v9, 2 }
 0x27f   :  { %v2414_v23 = vsel %vm7440_vm10, %v7124_v59, %v2411_v29  ;;  %v7486_v11 = vshrl.u32 %v2754_v8, 5  ;;  %vm2525_vm12 = vcmp.eq.s32.totalorder %v7468_v9, 0  ;;  %vm2536_vm13 = vcmp.lt.s32.totalorder %v7223_v54, 0 }
 0x280   :  { %6256 = vcosq.f32 %v2414_v23  ;;  %v2757_v55 = vsub.s32 32, %v2756_v47  ;;  %v2595_v4 = vadd.s32 536870912, %v2594_v30  ;;  %v2768_v2 = vshll.u32 %v6324_v10, %v2756_v47 }
 0x281   :  { %6258 = vsinq.f32 %v2414_v23  ;;  %v2759_v17 = vshll.u32 %v6327_v31, %v2756_v47  ;;  %v2762_v35 = vshll.u32 %v6328_v33, %v2756_v47  ;;  %vm2421_vm15 = vcmp.lt.s32.totalorder %v7478_v19, 2 }
 0x282   :  { %v2760_v63 = vshrl.u32 %v6328_v33, %v2757_v55  ;;  %v2763_v3 = vshrl.u32 %v6329_v49, %v2757_v55  ;;  %vm2422_vm0 = vcmp.eq.s32.totalorder %v7478_v19, 0  ;;  %vm2524_vm4 = vcmp.lt.s32.totalorder %v7468_v9, 2 }
 0x283   :  { %v2596_v46 = vshrl.u32 %v2595_v4, 30  ;;  %v2769_v62 = vshrl.u32 %v6325_v12, %v2757_v55  ;;  %vm2418_vm5 = vweird.f32 %v7124_v59  ;;  %v2750_v5 = vor.u32 8388608, %v2749_v32 }
 0x284   :  { %v2765_v57 = vshll.u32 %v6329_v49, %v2756_v47  ;;  %v2766_v34 = vshrl.u32 %v6324_v10, %v2757_v55  ;;  %v2953_v41 = vand.u32 2139095040, %v7483_v16  ;;  %v2758_v1 = vshrl.u32 %v6327_v31, %v2757_v55 }
 0x285   :  { %v2597_v45 = vshll.u32 %v2596_v46, 30  ;;  %v2770_v52 = vor.u32 %v2769_v62, %v2768_v2  ;;  %v2771_v51 = vshll.u32 %v6325_v12, %v2756_v47  ;;  %v2761_v20 = vor.u32 %v2760_v63, %v2759_v17 }
 0x286   :  { %v2764_v56 = vor.u32 %v2763_v3, %v2762_v35  ;;  %v2772_v18 = vshrl.u32 %v6326_v22, %v2757_v55  ;;  %vm2777_vm6 = vcmp.lt.s32.totalorder %v7486_v11, 4  ;;  %vm2425_vm7 = vcmp.eq.s32.totalorder %v7478_v19, 2 }
 0x287   :  { %v7508_v61 = vsub.s32 %v2594_v30, %v2597_v45  ;;  %v2620_v37 = vsub.s32 4, %v2596_v46  ;;  %vm2774_vm8 = vcmp.lt.s32.totalorder %v7486_v11, 1  ;;  %v7512_v26 = vadd.s32 %v7455_v24, %v7450_v48 }
 0x288   :  { %v2767_v53 = vor.u32 %v2766_v34, %v2765_v57  ;;  %v7514_v60 = vshll.u32 %v2750_v5, 8  ;;  %v2954_v14 = vshrl.u32 %v2953_v41, 23  ;;  %vm2775_vm10 = vcmp.lt.s32.totalorder %v7486_v11, 2 }
 0x289   :  { %v2600_v6 = vsub.s32 0, %v7508_v61  ;;  %vm2776_vm11 = vcmp.lt.s32.totalorder %v7486_v11, 3  ;;  %v2783_v58 = vsel %vm2777_vm6, %v2770_v52, 920167782  ;;  %v2773_v29 = vor.u32 %v2772_v18, %v2771_v51 }
 0x28a   :  { %v6257_v38 = vpop.eup %6256  ;;  %v2778_v48 = vsel %vm2774_vm8, %v2758_v1, %v2761_v20  ;;  %v2782_v24 = vsel %vm2774_vm8, %v2761_v20, %v2764_v56  ;;  %v2621_v44 = vsel %vm2536_vm13, %v2620_v37, %v2596_v46  ;;  %v2779_v47 = vsel %vm2777_vm6, %v2767_v53, 2102212464 }
 0x28b   :  { %v6259_v7 = vpop.eup %6258  ;;  %v2426_v25 = vxor.u32 2147483648, %v6257_v38  ;;  %v5336_v23 = vmin.u32 %v2600_v6, %v7508_v61  ;;  %v2784_v4 = vsel %vm2776_vm11, %v2767_v53, %v2783_v58  ;;  %v2786_v2 = vsel %vm2774_vm8, %v2764_v56, %v2767_v53 }
 0x28c   :  { %v2423_v8 = vxor.u32 2147483648, %v6259_v7  ;;  %v2787_v41 = vsel %vm2777_vm6, %v2773_v29, 1326507024  ;;  %v2780_v53 = vsel %vm2776_vm11, %v2764_v56, %v2779_v47  ;;  %v2785_v58 = vsel %vm2775_vm10, %v2782_v24, %v2784_v4 }
 0x28d   :  { %v2427_v32 = vsel %vm2425_vm7, %v2426_v25, %v6259_v7  ;;  %v2530_v55 = vsel %vm2528_vm9, %v2426_v25, %v6259_v7  ;;  %v2602_v46 = vclz %v5336_v23  ;;  %v2788_v59 = vsel %vm2776_vm11, %v2770_v52, %v2787_v41 }
 0x28e   :  { %v2424_v35 = vsel %vm2422_vm0, %v6257_v38, %v2423_v8  ;;  %v2527_v3 = vsel %vm2525_vm12, %v6257_v38, %v2423_v8  ;;  %v2789_v25 = vsel %vm2775_vm10, %v2786_v2, %v2788_v59  ;;  %v5351_v29 = vadd.s32 4294967169, %v2954_v14 }
 0x28f   :  { %v2428_v57 = vsel %vm2421_vm15, %v2424_v35, %v2427_v32  ;;  %v2531_v34 = vsel %vm2524_vm4, %v2527_v3, %v2530_v55  ;;  %v5337_v9 = vadd.s32 4294967294, %v2602_v46  ;;  %v2781_v52 = vsel %vm2775_vm10, %v2778_v48, %v2780_v53 }
 0x290   :  { %v2429_v20 = vsel %vm2418_vm5, nan, %v2428_v57  ;;  %v2532_v18 = vsel %vm2418_vm5, nan, %v2531_v34  ;;  %v7569_v56 = vmul.u32.u64.low %v7514_v60, %v2789_v25  ;;  %v7570_v47 = vmul.u32.u64.high %v7514_v60, %v2789_v25, %v7569_v56 }
 0x291   :  { %3590 = vrot.lane.b32.xlu1 %v2429_v20, %s6336_s25  ;;  %3594 = vrot.lane.b32.xlu0 %v2532_v18, %s6337_s26  ;;  %vm5338_vm14 = vcmp.lt.s32.totalorder %v5337_v9, 0  ;;  %v7577_v2 = vmul.u32.u64.low %v7514_v60, %v2785_v58  ;;  %v7578_v14 = vmul.u32.u64.high %v7514_v60, %v2785_v58, %v7577_v2  ;;  %vm7584_vm9 = vcmp.le.f32.partialorder %v2534_v39, 0.7853982 }
 0x292   :  { %v2605_v23 = vsel %vm5338_vm14, 0, %v5337_v9  ;;  %v2797_v57 = vmul.u32 %v7514_v60, %v2781_v52  ;;  %vm2744_vm0 = vcmp.lt.s32.totalorder %v7333_v40, 0  ;;  %vm2626_vm10 = vweird.f32 %v7223_v54 }
 0x293   :  { %v2606_v32 = vsub.s32 32, %v2605_v23  ;;  %v2607_v24 = vshll.u32 %v7508_v61, %v2605_v23  ;;  %v2610_v55 = vsub.s32 4294967266, %v2605_v23  ;;  %vm2799_vm12 = vc.u32 %v7570_v47, %v7577_v2 }
 0x295   :  { %v2608_v11 = vshrl.u32 %v7512_v26, %v2606_v32  ;;  %v2611_v48 = vadd.s32 127, %v2610_v55 }
 0x296   :  { %v5877_v30 = vpop.f32.mrb[64].mxu0 }
 0x297   :  { %v1326_v17 = vadd.f32 %v5877_v30, %v7476_v28  ;;  %v1317_v63 = vpop.f32.mrb[65].mxu0  ;;  %v2609_v41 = vor.u32 %v2608_v11, %v2607_v24 }
 0x298   :  { %v1318_v62 = vadd.f32 %v1317_v63, %v7476_v28  ;;  %v5878_v5 = vpop.f32.mrb[66].mxu0  ;;  %v2960_v63 = vadd.s32 1, %v5351_v29  ;;  %v2950_v29 = vand.u32 2147483647, %v7483_v16 }
 0x299   :  { %v1574_v45 = vsel %vm733_vm3, %v1326_v17, -inf  ;;  %v1329_v1 = vadd.f32 %v5878_v5, %v7476_v28  ;;  %v1320_v51 = vpop.f32.mrb[67].mxu0  ;;  %v2623_v5 = vsel %vm7584_vm9, 0, %v2621_v44  ;;  %v2616_v18 = vcvt.s32.f32 %v2609_v41 }
 0x29a   :  { %v1572_v19 = vsel %vm733_vm3, %v1318_v62, -inf  ;;  %v1321_v37 = vadd.f32 %v1320_v51, %v7476_v28  ;;  %v2800_v51 = vadd.s32 1, %v7578_v14  ;;  %vm2961_vm15 = vcmp.gt.s32.totalorder %v2960_v63, 0 }
 0x29b   :  { %v1575_v38 = vmax.f32 %v1572_v19, %v1574_v45  ;;  %v1576_v6 = vsel %vm733_vm3, %v1329_v1, -inf  ;;  %v2612_v45 = vshll.u32 %v2611_v48, 23  ;;  %v7600_v60 = vsel %vm2961_vm15, %v2960_v63, 0 }
 0x29c   :  { %v1573_v7 = vsel %vm733_vm3, %v1321_v37, -inf  ;;  %v2801_v9 = vsel %vm2799_vm12, %v2800_v51, %v7578_v14  ;;  %v2627_v25 = vadd.s32 3, %v2623_v5  ;;  %v7606_v23 = vand.u32 31, %v7600_v60 }
 0x29d   :  { %v1577_v8 = vmax.f32 %v1573_v7, %v1576_v6  ;;  %v2613_v44 = vor.u32 4788187, %v2612_v45  ;;  %v2802_v59 = vadd.s32 %v2801_v9, %v2797_v57  ;;  %v2957_v48 = vand.u32 8388607, %v2950_v29 }
 0x29e   :  { %v5881_v30 = vpop.f32.mrb[68].mxu0  ;;  %v7615_v11 = vand.u32 3, %v2627_v25  ;;  %v2970_v25 = vshll.u32 %v6328_v33, %v7606_v23 }
 0x29f   :  { %v1342_v4 = vadd.f32 %v5881_v30, %v7476_v28  ;;  %v1333_v17 = vpop.f32.mrb[69].mxu0  ;;  %v2614_v58 = vand.u32 2147483647, %v2613_v44  ;;  %v2803_v24 = vadd.s32 536870912, %v2802_v59 }
 0x2a0   :  { %v1334_v35 = vadd.f32 %v1333_v17, %v7476_v28  ;;  %v5882_v3 = vpop.f32.mrb[70].mxu0  ;;  %vm2630_vm5 = vcmp.eq.s32.totalorder %v7615_v11, 0  ;;  %vm2629_vm7 = vcmp.lt.s32.totalorder %v7615_v11, 2 }
 0x2a1   :  { %v1345_v46 = vadd.f32 %v5882_v3, %v7476_v28  ;;  %v1336_v62 = vpop.f32.mrb[71].mxu0  ;;  %v1582_v26 = vsel %vm733_vm3, %v1342_v4, -inf  ;;  %v2617_v32 = vmul.f32 %v2616_v18, %v2614_v58  ;;  %v7611_v4 = vand.u32 3, %v2623_v5 }
 0x2a2   :  { %v1578_v34 = vsel %vm733_vm3, %v1334_v35, -inf  ;;  %v1337_v39 = vadd.f32 %v1336_v62, %v7476_v28  ;;  %v2804_v35 = vshrl.u32 %v2803_v24, 30  ;;  %v7663_v24 = vshrl.u32 %v7600_v60, 5 }
 0x2a3   :  { %v1579_v1 = vmax.f32 %v1575_v38, %v1578_v34  ;;  %v1584_v53 = vsel %vm733_vm3, %v1345_v46, -inf  ;;  %v2618_v63 = vxor.u32 2147483648, %v2617_v32  ;;  %v7620_v46 = vsub.s32 32, %v7606_v23 }
 0x2a4   :  { %v1580_v20 = vsel %vm733_vm3, %v1337_v39, -inf  ;;  %v2805_v34 = vshll.u32 %v2804_v35, 30  ;;  %vm2736_vm4 = vcmp.eq.s32.totalorder %v7611_v4, 2  ;;  %vm2733_vm6 = vcmp.eq.s32.totalorder %v7611_v4, 0 }
 0x2a5   :  { %v1581_v19 = vmax.f32 %v1577_v8, %v1580_v20  ;;  %v1583_v37 = vmax.f32 %v1579_v1, %v1582_v26  ;;  %v2619_v57 = vsel %vm2536_vm13, %v2618_v63, %v2617_v32  ;;  %v7634_v20 = vmul.f32 4.0, %v7333_v40 }
 0x2a6   :  { %v5885_v6 = vpop.f32.mrb[72].mxu0  ;;  %v2622_v45 = vsel %vm7584_vm9, %v7223_v54, %v2619_v57  ;;  %v7631_v51 = vsub.s32 %v2802_v59, %v2805_v34  ;;  %vm2633_vm13 = vcmp.eq.s32.totalorder %v7615_v11, 2  ;;  %v2968_v58 = vshrl.u32 %v6328_v33, %v7620_v46 }
 0x2a7   :  { %v1349_v7 = vpop.f32.mrb[73].mxu0  ;;  %v1585_v38 = vmax.f32 %v1581_v19, %v1584_v53  ;;  %v1358_v56 = vadd.f32 %v5885_v6, %v7476_v28  ;;  %6260 = vcosq.f32 %v2622_v45  ;;  %v2958_v19 = vor.u32 8388608, %v2957_v48 }
 0x2a8   :  { %v1350_v8 = vadd.f32 %v1349_v7, %v7476_v28  ;;  %v5886_v30 = vpop.f32.mrb[74].mxu0  ;;  %6262 = vsinq.f32 %v2622_v45  ;;  %v2808_v6 = vsub.s32 0, %v7631_v51  ;;  %v7649_v7 = vadd.s32 %v7577_v2, %v7570_v47 }
 0x2a9   :  { %v1361_v55 = vadd.f32 %v5886_v30, %v7476_v28  ;;  %v1352_v52 = vpop.f32.mrb[75].mxu0  ;;  %v1590_v62 = vsel %vm733_vm3, %v1358_v56, -inf  ;;  %v2971_v56 = vshrl.u32 %v6329_v49, %v7620_v46  ;;  %vm2732_vm8 = vcmp.lt.s32.totalorder %v7611_v4, 2 }
 0x2aa   :  { %v1586_v17 = vsel %vm733_vm3, %v1350_v8, -inf  ;;  %v1353_v14 = vadd.f32 %v1352_v52, %v7476_v28  ;;  %v5344_v47 = vmin.u32 %v2808_v6, %v7631_v51  ;;  %v7669_v52 = vshll.u32 %v2958_v19, 8 }
 0x2ab   :  { %v1587_v3 = vmax.f32 %v1583_v37, %v1586_v17  ;;  %v1592_v26 = vsel %vm733_vm3, %v1361_v55, -inf  ;;  %v2967_v37 = vshll.u32 %v6327_v31, %v7606_v23  ;;  %v7667_v55 = vshrl.u32 %v6327_v31, %v7620_v46 }
 0x2ac   :  { %v1588_v5 = vsel %vm733_vm3, %v1353_v14, -inf  ;;  %v2810_v63 = vclz %v5344_v47  ;;  %v7679_v60 = vor.u32 %v2971_v56, %v2970_v25  ;;  %v2974_v45 = vshrl.u32 %v6324_v10, %v7620_v46 }
 0x2ad   :  { %v1589_v39 = vmax.f32 %v1585_v38, %v1588_v5  ;;  %v1591_v41 = vmax.f32 %v1587_v3, %v1590_v62  ;;  %v2828_v38 = vsub.s32 4, %v2804_v35  ;;  %v7673_v3 = vor.u32 %v2968_v58, %v2967_v37 }
 0x2ae   :  { %v5889_v1 = vpop.f32.mrb[76].mxu0  ;;  %vm2982_vm14 = vcmp.lt.s32.totalorder %v7663_v24, 1  ;;  %vm7726_vm9 = vcmp.le.f32.partialorder %v2742_v15, 0.7853982  ;;  %vm2983_vm12 = vcmp.lt.s32.totalorder %v7663_v24, 2  ;;  %vm2984_vm15 = vcmp.lt.s32.totalorder %v7663_v24, 3 }
 0x2af   :  { %v1365_v44 = vpop.f32.mrb[77].mxu0  ;;  %v1593_v18 = vmax.f32 %v1589_v39, %v1592_v26  ;;  %v1374_v61 = vadd.f32 %v5889_v1, %v7476_v28  ;;  %v7677_v5 = vsel %vm2744_vm0, %v2828_v38, %v2804_v35  ;;  %v5345_v39 = vadd.s32 4294967294, %v2810_v63 }
 0x2b0   :  { %v1366_v9 = vadd.f32 %v1365_v44, %v7476_v28  ;;  %v5890_v53 = vpop.f32.mrb[78].mxu0  ;;  %v2976_v35 = vshll.u32 %v6324_v10, %v7606_v23 }
 0x2b1   :  { %v1368_v59 = vpop.f32.mrb[79].mxu0  ;;  %v1377_v30 = vadd.f32 %v5890_v53, %v7476_v28  ;;  %v1598_v17 = vsel %vm733_vm3, %v1374_v61, -inf  ;;  %v6261_v19 = vpop.eup %6260  ;;  %vm5346_vm11 = vcmp.lt.s32.totalorder %v5345_v39, 0  ;;  %v7698_v53 = vshrl.u32 %v6326_v22, %v7620_v46 }
 0x2b2   :  { %v1594_v8 = vsel %vm733_vm3, %v1366_v9, -inf  ;;  %v1369_v32 = vadd.f32 %v1368_v59, %v7476_v28  ;;  %v7694_v9 = vshll.u32 %v6325_v12, %v7606_v23  ;;  %v6263_v6 = vpop.eup %6262  ;;  %v2634_v25 = vxor.u32 2147483648, %v6261_v19 }
 0x2b3   :  { %v1595_v2 = vmax.f32 %v1591_v41, %v1594_v8  ;;  %v1600_v57 = vsel %vm733_vm3, %v1377_v30, -inf  ;;  %v2973_v41 = vshll.u32 %v6329_v49, %v7606_v23  ;;  %v2813_v56 = vsel %vm5346_vm11, 0, %v5345_v39 }
 0x2b4   :  { %v1596_v14 = vsel %vm733_vm3, %v1369_v32, -inf  ;;  %v2631_v23 = vxor.u32 2147483648, %v6263_v6  ;;  %v2814_v32 = vsub.s32 32, %v2813_v56  ;;  %v2818_v11 = vsub.s32 4294967266, %v2813_v56 }
 0x2b5   :  { %v1597_v48 = vmax.f32 %v1593_v18, %v1596_v14  ;;  %v1599_v62 = vmax.f32 %v1595_v2, %v1598_v17  ;;  %v2977_v18 = vshrl.u32 %v6325_v12, %v7620_v46  ;;  %v2635_v2 = vsel %vm2633_vm13, %v2634_v25, %v6263_v6 }
 0x2b6   :  { %v5893_v34 = vpop.f32.mrb[80].mxu0  ;;  %v2738_v17 = vsel %vm2736_vm4, %v2634_v25, %v6263_v6  ;;  %v2632_v63 = vsel %vm2630_vm5, %v6261_v19, %v2631_v23  ;;  %vm2985_vm13 = vcmp.lt.s32.totalorder %v7663_v24, 4 }
 0x2b7   :  { %v1390_v26 = vadd.f32 %v5893_v34, %v7476_v28  ;;  %v1381_v1 = vpop.f32.mrb[81].mxu0  ;;  %v1601_v44 = vmax.f32 %v1597_v48, %v1600_v57  ;;  %v2735_v48 = vsel %vm2733_vm6, %v6261_v19, %v2631_v23  ;;  %v2815_v57 = vshll.u32 %v7631_v51, %v2813_v56 }
 0x2b8   :  { %v1382_v37 = vadd.f32 %v1381_v1, %v7476_v28  ;;  %v5894_v61 = vpop.f32.mrb[82].mxu0  ;;  %v2636_v39 = vsel %vm2629_vm7, %v2632_v63, %v2635_v2  ;;  %v2816_v51 = vshrl.u32 %v7649_v7, %v2814_v32  ;;  %v2978_v25 = vor.u32 %v2977_v18, %v2976_v35 }
 0x2b9   :  { %v1606_v58 = vsel %vm733_vm3, %v1390_v26, -inf  ;;  %v1393_v59 = vadd.f32 %v5894_v61, %v7476_v28  ;;  %v1384_v38 = vpop.f32.mrb[83].mxu0  ;;  %v2739_v26 = vsel %vm2732_vm8, %v2735_v48, %v2738_v17  ;;  %v2986_v18 = vsel %vm2982_vm14, %v7667_v55, %v7673_v3 }
 0x2ba   :  { %v1602_v8 = vsel %vm733_vm3, %v1382_v37, -inf  ;;  %v1385_v30 = vadd.f32 %v1384_v38, %v7476_v28  ;;  %v2637_v37 = vsel %vm2626_vm10, nan, %v2636_v39  ;;  %v2740_v61 = vsel %vm2626_vm10, nan, %v2739_v26 }
 0x2bb   :  { %v1603_v47 = vmax.f32 %v1599_v62, %v1602_v8  ;;  %v1608_v46 = vsel %vm733_vm3, %v1393_v59, -inf  ;;  %3598 = vrot.lane.b32.xlu1 %v2637_v37, %s6338_s27  ;;  %3602 = vrot.lane.b32.xlu0 %v2740_v61, %s6339_s0  ;;  %v2817_v59 = vor.u32 %v2816_v51, %v2815_v57  ;;  %v2819_v38 = vadd.s32 127, %v2818_v11  ;;  %s6349_s0 = smov [#allocation2]  }
 0x2bc   :  { %v1604_v14 = vsel %vm733_vm3, %v1385_v30, -inf  ;;  %v2981_v8 = vor.u32 %v7698_v53, %v7694_v9  ;;  %v2991_v2 = vsel %vm2985_vm13, %v2978_v25, 920167782 }
 0x2bd   :  { %v1605_v34 = vmax.f32 %v1601_v44, %v1604_v14  ;;  %v1607_v62 = vmax.f32 %v1603_v47, %v1606_v58  ;;  %v2975_v58 = vor.u32 %v2974_v45, %v2973_v41  ;;  %v2820_v23 = vshll.u32 %v2819_v38, 23 }
 0x2be   :  { %v5897_v1 = vpop.f32.mrb[84].mxu0  ;;  %v2824_v35 = vcvt.s32.f32 %v2817_v59 }
 0x2bf   :  { %v1406_v44 = vadd.f32 %v5897_v1, %v7476_v28  ;;  %v1397_v4 = vpop.f32.mrb[85].mxu0  ;;  %v1609_v6 = vmax.f32 %v1605_v34, %v1608_v46  ;;  %3606 = vrot.lane.b32.xlu1 %v7333_v40, %s6340_s28  ;;  %v2987_v9 = vsel %vm2985_vm13, %v2975_v58, 2102212464  ;;  %v2821_v47 = vor.u32 4788187, %v2820_v23  ;;  %s5198_s28 = sshll.u32 %s6349_s0, 4  ;;  %s5199_s28 = int_to_ptr.vmem [resolvable:$true] %s5198_s28 }
 0x2c0   :  { %v1398_v54 = vadd.f32 %v1397_v4, %v7476_v28  ;;  %v5898_v15 = vpop.f32.mrb[86].mxu0  ;;  %v2990_v46 = vsel %vm2982_vm14, %v7673_v3, %v7679_v60  ;;  %v2992_v63 = vsel %vm2984_vm15, %v2975_v58, %v2991_v2  ;;  %v2994_v55 = vsel %vm2982_vm14, %v7679_v60, %v2975_v58  ;;  %p6303_p1 = scmp.lt.s32.totalorder %s5199_s28, %s5199_s28 }
 0x2c1   :  { %v1614_v7 = vsel %vm733_vm3, %v1406_v44, -inf  ;;  %v1400_v56 = vpop.f32.mrb[87].mxu0  ;;  %v1409_v45 = vadd.f32 %v5898_v15, %v7476_v28  ;;  %v2822_v34 = vand.u32 2147483647, %v2821_v47  ;;  %v2988_v3 = vsel %vm2984_vm15, %v7679_v60, %v2987_v9 }
 0x2c2   :  { %v1610_v41 = vsel %vm733_vm3, %v1398_v54, -inf  ;;  %v1401_v30 = vadd.f32 %v1400_v56, %v7476_v28  ;;  %v2831_v1 = vsel %vm7726_vm9, 0, %v7677_v5  ;;  %v2993_v37 = vsel %vm2983_vm12, %v2990_v46, %v2992_v63 }
 0x2c3   :  { %v1611_v32 = vmax.f32 %v1607_v62, %v1610_v41  ;;  %v1616_v48 = vsel %vm733_vm3, %v1409_v45, -inf  ;;  %v2995_v62 = vsel %vm2985_vm13, %v2981_v8, 1326507024  ;;  %v2825_v44 = vmul.f32 %v2824_v35, %v2822_v34 }
 0x2c4   :  { %v1612_v53 = vsel %vm733_vm3, %v1401_v30, -inf  ;;  %v2996_v61 = vsel %vm2984_vm15, %v2978_v25, %v2995_v62  ;;  %v2989_v58 = vsel %vm2983_vm12, %v2986_v18, %v2988_v3  ;;  %v2835_v56 = vadd.s32 3, %v2831_v1 }
 0x2c5   :  { %v1613_v17 = vmax.f32 %v1609_v6, %v1612_v53  ;;  %v1615_v14 = vmax.f32 %v1611_v32, %v1614_v7  ;;  %v2997_v4 = vsel %vm2983_vm12, %v2994_v55, %v2996_v61  ;;  %v2826_v25 = vxor.u32 2147483648, %v2825_v44 }
 0x2c6   :  { %v5901_v57 = vpop.f32.mrb[88].mxu0  ;;  %v7781_v5 = vmul.u32.u64.low %v7669_v52, %v2997_v4  ;;  %v7782_v54 = vmul.u32.u64.high %v7669_v52, %v2997_v4, %v7781_v5  ;;  %v7788_v8 = vmul.u32.u64.low %v7669_v52, %v2993_v37  ;;  %v7789_v41 = vmul.u32.u64.high %v7669_v52, %v2993_v37, %v7788_v8 }
 0x2c7   :  { %v1413_v39 = vpop.f32.mrb[89].mxu0  ;;  %v1617_v26 = vmax.f32 %v1613_v17, %v1616_v48  ;;  %v1422_v51 = vadd.f32 %v5901_v57, %v7476_v28  ;;  %v2827_v30 = vsel %vm2744_vm0, %v2826_v25, %v2825_v44  ;;  %v3161_v23 = vand.u32 2139095040, %v7634_v20 }
 0x2c8   :  { %v1414_v11 = vadd.f32 %v1413_v39, %v7476_v28  ;;  %v5902_v60 = vpop.f32.mrb[90].mxu0  ;;  %v2830_v18 = vsel %vm7726_vm9, %v7333_v40, %v2827_v30  ;;  %v3005_v9 = vmul.u32 %v7669_v52, %v2989_v58  ;;  %vm3007_vm4 = vc.u32 %v7782_v54, %v7788_v8 }
 0x2c9   :  { %v1416_v6 = vpop.f32.mrb[91].mxu0  ;;  %v1425_v59 = vadd.f32 %v5902_v60, %v7476_v28  ;;  %v1622_v24 = vsel %vm733_vm3, %v1422_v51, -inf  ;;  %6264 = vcosq.f32 %v2830_v18  ;;  %v3162_v46 = vshrl.u32 %v3161_v23, 23 }
 0x2ca   :  { %v1618_v15 = vsel %vm733_vm3, %v1414_v11, -inf  ;;  %v1417_v38 = vadd.f32 %v1416_v6, %v7476_v28  ;;  %6266 = vsinq.f32 %v2830_v18  ;;  %v2836_v57 = vand.u32 3, %v2835_v56 }
 0x2cb   :  { %v1619_v7 = vmax.f32 %v1615_v14, %v1618_v15  ;;  %v1624_v53 = vsel %vm733_vm3, %v1425_v59, -inf  ;;  %v3008_v14 = vadd.s32 1, %v7789_v41  ;;  %v5359_v48 = vadd.s32 4294967169, %v3162_v46 }
 0x2cc   :  { %v1620_v45 = vsel %vm733_vm3, %v1417_v38, -inf  ;;  %v2939_v34 = vand.u32 3, %v2831_v1  ;;  %vm2834_vm0 = vweird.f32 %v7333_v40  ;;  %v3158_v51 = vand.u32 2147483647, %v7634_v20 }
 0x2cd   :  { %v1621_v32 = vmax.f32 %v1617_v26, %v1620_v45  ;;  %v1623_v35 = vmax.f32 %v1619_v7, %v1622_v24  ;;  %v3009_v3 = vsel %vm3007_vm4, %v3008_v14, %v7789_v41  ;;  %v3168_v1 = vadd.s32 1, %v5359_v48 }
 0x2ce   :  { %v5905_v47 = vpop.f32.mrb[92].mxu0  ;;  %v3010_v37 = vadd.s32 %v3009_v3, %v3005_v9  ;;  %vm2940_vm5 = vcmp.lt.s32.totalorder %v2939_v34, 2  ;;  %vm2941_vm6 = vcmp.eq.s32.totalorder %v2939_v34, 0  ;;  %vm2837_vm7 = vcmp.lt.s32.totalorder %v2836_v57, 2 }
 0x2cf   :  { %v1429_v2 = vpop.f32.mrb[93].mxu0  ;;  %v1625_v17 = vmax.f32 %v1621_v32, %v1624_v53  ;;  %v1438_v63 = vadd.f32 %v5905_v47, %v7476_v28  ;;  %vm2838_vm8 = vcmp.eq.s32.totalorder %v2836_v57, 0  ;;  %vm2841_vm10 = vcmp.eq.s32.totalorder %v2836_v57, 2 }
 0x2d0   :  { %v1430_v19 = vadd.f32 %v1429_v2, %v7476_v28  ;;  %v5906_v55 = vpop.f32.mrb[94].mxu0  ;;  %v3011_v44 = vadd.s32 536870912, %v3010_v37  ;;  %vm2944_vm11 = vcmp.eq.s32.totalorder %v2939_v34, 2  ;;  %v3165_v45 = vand.u32 8388607, %v3158_v51 }
 0x2d1   :  { %v1432_v52 = vpop.f32.mrb[95].mxu0  ;;  %v1441_v39 = vadd.f32 %v5906_v55, %v7476_v28  ;;  %v1630_v11 = vsel %vm733_vm3, %v1438_v63, -inf  ;;  %vm3169_vm14 = vcmp.gt.s32.totalorder %v3168_v1, 0  ;;  %vm2952_vm9 = vcmp.lt.s32.totalorder %v7483_v16, 0 }
 0x2d2   :  { %v1626_v62 = vsel %vm733_vm3, %v1430_v19, -inf  ;;  %v1433_v26 = vadd.f32 %v1432_v52, %v7476_v28  ;;  %v3012_v15 = vshrl.u32 %v3011_v44, 30  ;;  %v3170_v19 = vsel %vm3169_vm14, %v3168_v1, 0 }
 0x2d3   :  { %v1627_v61 = vmax.f32 %v1623_v35, %v1626_v62  ;;  %v1632_v58 = vsel %vm733_vm3, %v1441_v39, -inf  ;;  %v6265_v7 = vpop.eup %6264  ;;  %v7842_v57 = vand.u32 31, %v3170_v19  ;;  %v3166_v40 = vor.u32 8388608, %v3165_v45 }
 0x2d4   :  { %v1628_v60 = vsel %vm733_vm3, %v1433_v26, -inf  ;;  %v3013_v24 = vshll.u32 %v3012_v15, 30  ;;  %v6267_v30 = vpop.eup %6266  ;;  %v2842_v9 = vxor.u32 2147483648, %v6265_v7  ;;  %vm7854_vm12 = vcmp.le.f32.partialorder %v2950_v29, 0.7853982 }
 0x2d5   :  { %v1631_v4 = vmax.f32 %v1627_v61, %v1630_v11  ;;  %v1629_v6 = vmax.f32 %v1625_v17, %v1628_v60  ;;  %v2839_v46 = vxor.u32 2147483648, %v6267_v30  ;;  %v3006_v45 = vadd.s32 %v7788_v8, %v7782_v54 }
 0x2d6   :  { %v5909_v5 = vpop.f32.mrb[96].mxu0  ;;  %v7826_v2 = vsub.s32 %v3010_v37, %v3013_v24  ;;  %v2843_v63 = vsel %vm2841_vm10, %v2842_v9, %v6267_v30  ;;  %v2946_v3 = vsel %vm2944_vm11, %v2842_v9, %v6267_v30  ;;  %v3036_v37 = vsub.s32 4, %v3012_v15 }
 0x2d7   :  { %v1633_v59 = vmax.f32 %v1629_v6, %v1632_v58  ;;  %v1454_v38 = vadd.f32 %v5909_v5, %v7476_v28  ;;  %v1445_v25 = vpop.f32.mrb[97].mxu0  ;;  %v2840_v48 = vsel %vm2838_vm8, %v6265_v7, %v2839_v46  ;;  %v2943_v52 = vsel %vm2941_vm6, %v6265_v7, %v2839_v46 }
 0x2d8   :  { %v1446_v56 = vadd.f32 %v1445_v25, %v7476_v28  ;;  %v5910_v41 = vpop.f32.mrb[98].mxu0  ;;  %v2844_v39 = vsel %vm2837_vm7, %v2840_v48, %v2843_v63  ;;  %v2947_v26 = vsel %vm2940_vm5, %v2943_v52, %v2946_v3  ;;  %v3016_v44 = vsub.s32 0, %v7826_v2 }
 0x2d9   :  { %v7820_v23 = vmax.f32 %v1631_v4, %v1633_v59  ;;  %v1643_v32 = vsel %vm733_vm3, %v1454_v38, -inf  ;;  %v1457_v35 = vadd.f32 %v5910_v41, %v7476_v28  ;;  %v1448_v18 = vpop.f32.mrb[99].mxu0  ;;  %v2845_v11 = vsel %vm2834_vm0, nan, %v2844_v39 }
 0x2da   :  { %v1641_v53 = vsel %vm733_vm3, %v1446_v56, -inf  ;;  %v1449_v47 = vadd.f32 %v1448_v18, %v7476_v28  ;;  %v2948_v60 = vsel %vm2834_vm0, nan, %v2947_v26  ;;  %3610 = vrot.lane.b32.xlu0 %v2845_v11, %s6341_s29  ;;  %v5352_v58 = vmin.u32 %v3016_v44, %v7826_v2  ;;  %s6298_s29 = scalar_lea.vmem %s5199_s28, 32 }
 0x2db   :  { %v1644_v17 = vmax.f32 %v1641_v53, %v1643_v32  ;;  %v1645_v14 = vsel %vm733_vm3, %v1457_v35, -inf  ;;  %3614 = vrot.lane.b32.xlu1 %v2948_v60, %s6342_s30  ;;  %v3037_v59 = vsel %vm2952_vm9, %v3036_v37, %v3012_v15  ;;  %v3173_v30 = vsub.s32 32, %v7842_v57  ;;  %p6299_p0 = scmp.ne.s32.totalorder %s5199_s28, %s6298_s29  ;;  %p6304_p2 = scmp.lt.s32.totalorder %s6298_s29, %s6298_s29 }
 0x2dc   :  { %v1642_v55 = vsel %vm733_vm3, %v1449_v47, -inf  ;;  %v3018_v56 = vclz %v5352_v58  ;;  %v7863_v18 = vshll.u32 %v3166_v40, 8  ;;  %v7867_v29 = vsel %vm7854_vm12, 0, %v3037_v59 }
 0x2dd   :  { %v1646_v62 = vmax.f32 %v1642_v55, %v1645_v14  ;;  %v7869_v47 = vshrl.u32 %v3170_v19, 5  ;;  %v3174_v8 = vshrl.u32 %v6327_v31, %v3173_v30  ;;  %v3176_v52 = vshrl.u32 %v6328_v33, %v3173_v30  ;;  %p6305_p3 = por %p6304_p2, %p6303_p1 }
 0x2de   :  { %v5913_v61 = vpop.f32.mrb[100].mxu0  ;;  %v5353_v35 = vadd.s32 4294967294, %v3018_v56  ;;  %v3179_v60 = vshrl.u32 %v6329_v49, %v3173_v30  ;;  %v3182_v40 = vshrl.u32 %v6324_v10, %v3173_v30  ;;  %vm3635_vm6 = vcmask 15360  }
 0x2df   :  { %v1461_v1 = vpop.f32.mrb[101].mxu0  ;;  %v1470_v34 = vadd.f32 %v5913_v61, %v7476_v28  ;;  %vm3190_vm13 = vcmp.lt.s32.totalorder %v7869_v47, 1  ;;  %vm3191_vm4 = vcmp.lt.s32.totalorder %v7869_v47, 2  ;;  %vm3193_vm0 = vcmp.lt.s32.totalorder %v7869_v47, 4  ;;  %p6306_p4 = pnand %p6305_p3, %p6299_p0 }
 0x2e0   :  { %v1462_v4 = vadd.f32 %v1461_v1, %v7476_v28  ;;  %v5914_v6 = vpop.f32.mrb[102].mxu0  ;;  %vm5354_vm15 = vcmp.lt.s32.totalorder %v5353_v35, 0  ;;  %vm3192_vm5 = vcmp.lt.s32.totalorder %v7869_v47, 3  ;;  %vm3638_vm7 = vcmask 31744   ;;  %v6182_v47 = vld [vmem:[%s8406_s8 + $0x40] sm:$0xff]  }
 0x2e1   :  { %v1464_v5 = vpop.f32.mrb[103].mxu0  ;;  %v1473_v25 = vadd.f32 %v5914_v6, %v7476_v28  ;;  %v1651_v15 = vsel %vm733_vm3, %v1470_v34, -inf  ;;  %v3021_v48 = vsel %vm5354_vm15, 0, %v5353_v35  ;;  %v3188_v35 = vshrl.u32 %v6326_v22, %v3173_v30  ;;  %5650 = vmatprep.subr.bf16.mxu1 %v6182_v47 }
 0x2e2   :  { %v1647_v38 = vsel %vm733_vm3, %v1462_v4, -inf  ;;  %v1465_v7 = vadd.f32 %v1464_v5, %v7476_v28  ;;  %v3023_v39 = vshll.u32 %v7826_v2, %v3021_v48  ;;  %v3026_v26 = vsub.s32 4294967266, %v3021_v48 }
 0x2e3   :  { %v1648_v41 = vmax.f32 %v1644_v17, %v1647_v38  ;;  %v1653_v46 = vsel %vm733_vm3, %v1473_v25, -inf  ;;  %v3175_v17 = vshll.u32 %v6327_v31, %v7842_v57  ;;  %v3178_v31 = vshll.u32 %v6328_v33, %v7842_v57 }
 0x2e4   :  { %v1649_v32 = vsel %vm733_vm3, %v1465_v7, -inf  ;;  %v3027_v4 = vadd.s32 127, %v3026_v26  ;;  %v3181_v2 = vshll.u32 %v6329_v49, %v7842_v57  ;;  %v3184_v33 = vshll.u32 %v6324_v10, %v7842_v57 }
 0x2e5   :  { %v1650_v9 = vmax.f32 %v1646_v62, %v1649_v32  ;;  %v1652_v53 = vmax.f32 %v1648_v41, %v1651_v15  ;;  %v3022_v62 = vsub.s32 32, %v3021_v48  ;;  %v3177_v58 = vor.u32 %v3176_v52, %v3175_v17 }
 0x2e6   :  { %v5917_v54 = vpop.f32.mrb[104].mxu0  ;;  %v3028_v38 = vshll.u32 %v3027_v4, 23  ;;  %v3185_v41 = vshrl.u32 %v6325_v12, %v3173_v30  ;;  %v3187_v49 = vshll.u32 %v6325_v12, %v7842_v57  ;;  %v3183_v10 = vor.u32 %v3182_v40, %v3181_v2  ;;  %v7906_v30 = vpop.permute.xlu1 %3894 }
 0x2e7   :  { %v1486_v14 = vadd.f32 %v5917_v54, %v7476_v28  ;;  %v1477_v63 = vpop.f32.mrb[105].mxu0  ;;  %v1654_v55 = vmax.f32 %v1650_v9, %v1653_v46  ;;  %v3024_v34 = vshrl.u32 %v3006_v45, %v3022_v62  ;;  %v3180_v54 = vor.u32 %v3179_v60, %v3178_v31  ;;  %v7918_v60 = vpop.permute.xlu0 %3662 }
 0x2e8   :  { %v1478_v3 = vadd.f32 %v1477_v63, %v7476_v28  ;;  %v5918_v19 = vpop.f32.mrb[106].mxu0  ;;  %v3029_v15 = vor.u32 4788187, %v3028_v38  ;;  %v3195_v26 = vsel %vm3193_vm0, %v3183_v10, 2102212464  ;;  %vm3633_vm8 = vcmask 7168  }
 0x2e9   :  { %v1659_v37 = vsel %vm733_vm3, %v1486_v14, -inf  ;;  %v1489_v61 = vadd.f32 %v5918_v19, %v7476_v28  ;;  %v1480_v11 = vpop.f32.mrb[107].mxu0  ;;  %v3025_v59 = vor.u32 %v3024_v34, %v3023_v39  ;;  %v3194_v39 = vsel %vm3190_vm13, %v3174_v8, %v3177_v58 }
 0x2ea   :  { %v1655_v44 = vsel %vm733_vm3, %v1478_v3, -inf  ;;  %v1481_v1 = vadd.f32 %v1480_v11, %v7476_v28  ;;  %v3030_v63 = vand.u32 2147483647, %v3029_v15  ;;  %v3189_v3 = vor.u32 %v3188_v35, %v3187_v49 }
 0x2eb   :  { %v1656_v6 = vmax.f32 %v1652_v53, %v1655_v44  ;;  %v1661_v25 = vsel %vm733_vm3, %v1489_v61, -inf  ;;  %v3032_v32 = vcvt.s32.f32 %v3025_v59  ;;  %v3198_v11 = vsel %vm3190_vm13, %v3177_v58, %v3180_v54 }
 0x2ec   :  { %v1657_v5 = vsel %vm733_vm3, %v1481_v1, -inf  ;;  %v3196_v58 = vsel %vm3192_vm5, %v3180_v54, %v3195_v26  ;;  %v3202_v2 = vsel %vm3190_vm13, %v3180_v54, %v3183_v10  ;;  %v3203_v40 = vsel %vm3193_vm0, %v3189_v3, 1326507024  ;;  %v6296_v3 = vld [vmem:[%s8399_s1] sm:$0x3]  ;;  %s6343_s1 = smov 15  }
 0x2ed   :  { %v1658_v7 = vmax.f32 %v1654_v55, %v1657_v5  ;;  %v1660_v56 = vmax.f32 %v1656_v6, %v1659_v37  ;;  %v3186_v55 = vor.u32 %v3185_v41, %v3184_v33  ;;  %v3033_v57 = vmul.f32 %v3032_v32, %v3030_v63  ;;  %v3579_v32 = vpop.permute.xlu0 %3578 }
 0x2ee   :  { %v5921_v45 = vpop.f32.mrb[108].mxu0  ;;  %v3043_v35 = vadd.s32 3, %v7867_v29  ;;  %vm3042_vm11 = vweird.f32 %v7483_v16 }
 0x2ef   :  { %v1502_v9 = vadd.f32 %v5921_v45, %v7476_v28  ;;  %v1493_v53 = vpop.f32.mrb[109].mxu0  ;;  %v1662_v46 = vmax.f32 %v1658_v7, %v1661_v25  ;;  %v3034_v61 = vxor.u32 2147483648, %v3033_v57  ;;  %v3199_v31 = vsel %vm3193_vm0, %v3186_v55, 920167782  ;;  %v3575_v7 = vpop.permute.xlu1 %3574 }
 0x2f0   :  { %v1494_v17 = vadd.f32 %v1493_v53, %v7476_v28  ;;  %v5922_v14 = vpop.f32.mrb[110].mxu0  ;;  %v3200_v8 = vsel %vm3192_vm5, %v3183_v10, %v3199_v31  ;;  %v3204_v25 = vsel %vm3192_vm5, %v3186_v55, %v3203_v40  ;;  %vm3160_vm5 = vcmp.lt.s32.totalorder %v7634_v20, 0 }
 0x2f1   :  { %v1505_v48 = vadd.f32 %v5922_v14, %v7476_v28  ;;  %v1496_v52 = vpop.f32.mrb[111].mxu0  ;;  %v1667_v19 = vsel %vm733_vm3, %v1502_v9, -inf  ;;  %v3035_v6 = vsel %vm2952_vm9, %v3034_v61, %v3033_v57  ;;  %v3201_v33 = vsel %vm3191_vm4, %v3198_v11, %v3200_v8  ;;  %v3587_v31 = vpop.permute.xlu0 %3586 }
 0x2f2   :  { %v1663_v12 = vsel %vm733_vm3, %v1494_v17, -inf  ;;  %v1497_v22 = vadd.f32 %v1496_v52, %v7476_v28  ;;  %v3038_v38 = vsel %vm7854_vm12, %v7483_v16, %v3035_v6  ;;  %v3205_v15 = vsel %vm3191_vm4, %v3202_v2, %v3204_v25 }
 0x2f3   :  { %v1664_v62 = vmax.f32 %v1660_v56, %v1663_v12  ;;  %v1669_v44 = vsel %vm733_vm3, %v1505_v48, -inf  ;;  %6268 = vcosq.f32 %v3038_v38  ;;  %v3197_v17 = vsel %vm3191_vm4, %v3194_v39, %v3196_v58  ;;  %v3583_v26 = vpop.permute.xlu1 %3582 }
 0x2f4   :  { %v1665_v37 = vsel %vm733_vm3, %v1497_v22, -inf  ;;  %6270 = vsinq.f32 %v3038_v38  ;;  %v7953_v14 = vmul.u32.u64.low %v7863_v18, %v3201_v33  ;;  %v7954_v63 = vmul.u32.u64.high %v7863_v18, %v3201_v33, %v7953_v14  ;;  %v6183_v22 = vld [vmem:[%s8406_s8] sm:$0xff]  }
 0x2f5   :  { %v1666_v1 = vmax.f32 %v1662_v46, %v1665_v37  ;;  %v1668_v34 = vmax.f32 %v1664_v62, %v1667_v19  ;;  %v7947_v46 = vmul.u32.u64.low %v7863_v18, %v3205_v15  ;;  %v7948_v54 = vmul.u32.u64.high %v7863_v18, %v3205_v15, %v7947_v46  ;;  %5651 = vmatpush3.bf16.msra.mxu1 %v6183_v22 }
 0x2f6   :  { %v5925_v4 = vpop.f32.mrb[112].mxu0  ;;  %v3147_v52 = vand.u32 3, %v7867_v29  ;;  %v3634_v12 = vsel %vm3633_vm8, %v6296_v3, %v3575_v7  ;;  %v3044_v19 = vand.u32 3, %v3043_v35  ;;  %v3213_v61 = vmul.u32 %v7863_v18, %v3197_v17 }
 0x2f7   :  { %v1509_v5 = vpop.f32.mrb[113].mxu0  ;;  %v1670_v59 = vmax.f32 %v1666_v1, %v1669_v44  ;;  %v1518_v56 = vadd.f32 %v5925_v4, %v7476_v28  ;;  %v3636_v39 = vsel %vm3635_vm6, %v3634_v12, %v3579_v32  ;;  %vm3215_vm10 = vc.u32 %v7948_v54, %v7953_v14 }
 0x2f8   :  { %v1510_v41 = vadd.f32 %v1509_v5, %v7476_v28  ;;  %v5926_v45 = vpop.f32.mrb[114].mxu0  ;;  %v3637_v11 = vsel %vm109_vm1, %v3636_v39, %v3583_v26  ;;  %vm3148_vm14 = vcmp.lt.s32.totalorder %v3147_v52, 2  ;;  %vm3045_vm9 = vcmp.lt.s32.totalorder %v3044_v19, 2 }
 0x2f9   :  { %v1521_v24 = vadd.f32 %v5926_v45, %v7476_v28  ;;  %v1512_v49 = vpop.f32.mrb[115].mxu0  ;;  %v1675_v55 = vsel %vm733_vm3, %v1518_v56, -inf  ;;  %v7977_v8 = vsel %vm3638_vm7, %v3637_v11, %v3587_v31  ;;  %vm3049_vm1 = vcmp.eq.s32.totalorder %v3044_v19, 2 }
 0x2fa   :  { %v1671_v9 = vsel %vm733_vm3, %v1510_v41, -inf  ;;  %v1513_v53 = vadd.f32 %v1512_v49, %v7476_v28  ;;  %vm3152_vm12 = vcmp.eq.s32.totalorder %v3147_v52, 2  ;;  %vm3046_vm15 = vcmp.eq.s32.totalorder %v3044_v19, 0 }
 0x2fb   :  { %v1672_v10 = vmax.f32 %v1668_v34, %v1671_v9  ;;  %v1677_v29 = vsel %vm733_vm3, %v1521_v24, -inf  ;;  %v3216_v34 = vadd.s32 1, %v7954_v63  ;;  %vm3149_vm13 = vcmp.eq.s32.totalorder %v3147_v52, 0 }
 0x2fc   :  { %v1673_v48 = vsel %vm733_vm3, %v1513_v53, -inf  ;;  %v8008_v16 = vsub.s32 4, %v6718_v42  ;;  %vm3897_vm4 = vcmask 261120   ;;  %vm3159_vm8 = vcmp.le.f32.partialorder %v3158_v51, 0.7853982 }
 0x2fd   :  { %v1674_v57 = vmax.f32 %v1670_v59, %v1673_v48  ;;  %v1676_v62 = vmax.f32 %v1672_v10, %v1675_v55  ;;  %v3217_v2 = vsel %vm3215_vm10, %v3216_v34, %v7954_v63  ;;  %v6269_v40 = vpop.eup %6268  ;;  %vm3901_vm10 = vcmask 1041409  }
 0x2fe   :  { %v5929_v37 = vpop.f32.mrb[116].mxu0  ;;  %v3218_v33 = vadd.s32 %v3217_v2, %v3213_v61  ;;  %v6271_v25 = vpop.eup %6270  ;;  %v3050_v7 = vxor.u32 2147483648, %v6269_v40 }
 0x2ff   :  { %v1525_v44 = vpop.f32.mrb[117].mxu0  ;;  %v1678_v1 = vmax.f32 %v1674_v57, %v1677_v29  ;;  %v1534_v4 = vadd.f32 %v5929_v37, %v7476_v28  ;;  %v3047_v41 = vxor.u32 2147483648, %v6271_v25 }
 0x300   :  { %v1526_v18 = vadd.f32 %v1525_v44, %v7476_v28  ;;  %v5930_v6 = vpop.f32.mrb[118].mxu0  ;;  %v3219_v32 = vadd.s32 536870912, %v3218_v33  ;;  %v3051_v24 = vsel %vm3049_vm1, %v3050_v7, %v6271_v25  ;;  %v3154_v49 = vsel %vm3152_vm12, %v3050_v7, %v6271_v25 }
 0x301   :  { %v1528_v58 = vpop.f32.mrb[119].mxu0  ;;  %v1537_v59 = vadd.f32 %v5930_v6, %v7476_v28  ;;  %v1683_v45 = vsel %vm733_vm3, %v1534_v4, -inf  ;;  %v3048_v53 = vsel %vm3046_vm15, %v6269_v40, %v3047_v41  ;;  %v3151_v10 = vsel %vm3149_vm13, %v6269_v40, %v3047_v41  ;;  %v8017_v40 = vld [vmem:[%s8408_s10] sm:$0xff] }
 0x302   :  { %v1679_v5 = vsel %vm733_vm3, %v1526_v18, -inf  ;;  %v1529_v38 = vadd.f32 %v1528_v58, %v7476_v28  ;;  %v7994_v17 = vshrl.u32 %v3219_v32, 30  ;;  %v3052_v55 = vsel %vm3045_vm9, %v3048_v53, %v3051_v24 }
 0x303   :  { %v1680_v56 = vmax.f32 %v1676_v62, %v1679_v5  ;;  %v1685_v46 = vsel %vm733_vm3, %v1537_v59, -inf  ;;  %v3155_v48 = vsel %vm3148_vm14, %v3151_v10, %v3154_v49  ;;  %v3053_v47 = vsel %vm3042_vm11, nan, %v3052_v55 }
 0x304   :  { %v1681_v15 = vsel %vm733_vm3, %v1529_v38, -inf  ;;  %v3156_v22 = vsel %vm3042_vm11, nan, %v3155_v48  ;;  %v3221_v57 = vshll.u32 %v7994_v17, 30  ;;  %3618 = vrot.lane.b32.xlu0 %v3053_v47, %s6343_s1  ;;  %v1635_v18 = vrot.slane %v7820_v23, 4  ;;  %s6346_s1 = smov 21  }
 0x305   :  { %v1682_v35 = vmax.f32 %v1678_v1, %v1681_v15  ;;  %v1684_v9 = vmax.f32 %v1680_v56, %v1683_v45  ;;  %3622 = vrot.lane.b32.xlu1 %v3156_v22, %s6344_s17  ;;  %v1841_v5 = vrot.slane %v8017_v40, %v8008_v16  ;;  %v8028_v15 = vsel %vm3897_vm4, %v6965_v0, %v7906_v30 }
 0x306   :  { %v5933_v63 = vpop.f32.mrb[120].mxu0  ;;  %v3222_v52 = vsub.s32 %v3218_v33, %v3221_v57  ;;  %vm3250_vm13 = vweird.f32 %v7634_v20  ;;  %vm3644_vm4 = vcmask 56320  }
 0x307   :  { %v1541_v3 = vpop.f32.mrb[121].mxu0  ;;  %v1686_v12 = vmax.f32 %v1682_v35, %v1685_v46  ;;  %v1550_v26 = vadd.f32 %v5933_v63, %v7476_v28  ;;  %v1636_v35 = vmax.f32 %v7820_v23, %v1635_v18 }
 0x308   :  { %v5934_v62 = vpop.f32.mrb[122].mxu0  ;;  %v1542_v19 = vadd.f32 %v1541_v3, %v7476_v28  ;;  %v3224_v61 = vsub.s32 0, %v3222_v52 }
 0x309   :  { %v1544_v39 = vpop.f32.mrb[123].mxu0  ;;  %v1553_v31 = vadd.f32 %v5934_v62, %v7476_v28  ;;  %v1691_v34 = vsel %vm733_vm3, %v1550_v26, -inf }
 0x30a   :  { %v1545_v29 = vadd.f32 %v1544_v39, %v7476_v28  ;;  %v1687_v37 = vsel %vm733_vm3, %v1542_v19, -inf  ;;  %v5360_v1 = vmin.u32 %v3224_v61, %v3222_v52  ;;  %v1637_v39 = vrot.slane %v1636_v35, 2 }
 0x30b   :  { %v1688_v11 = vmax.f32 %v1684_v9, %v1687_v37  ;;  %v1693_v38 = vsel %vm733_vm3, %v1553_v31, -inf  ;;  %v3214_v9 = vadd.s32 %v7953_v14, %v7948_v54 }
 0x30c   :  { %v1689_v44 = vsel %vm733_vm3, %v1545_v29, -inf  ;;  %v3226_v59 = vclz %v5360_v1 }
 0x30d   :  { %v1690_v6 = vmax.f32 %v1686_v12, %v1689_v44  ;;  %v1692_v2 = vmax.f32 %v1688_v11, %v1691_v34  ;;  %v1638_v44 = vmax.f32 %v1636_v35, %v1637_v39  ;;  %v6187_v35 = vld [vmem:[%s8406_s8 + $0x10] sm:$0xff]  }
 0x30e   :  { %v5937_v4 = vpop.f32.mrb[124].mxu0  ;;  %v5361_v32 = vadd.s32 4294967294, %v3226_v59 }
 0x30f   :  { %v1557_v58 = vpop.f32.mrb[125].mxu0  ;;  %v1566_v33 = vadd.f32 %v5937_v4, %v7476_v28  ;;  %v1694_v45 = vmax.f32 %v1690_v6, %v1693_v38  ;;  %v3244_v4 = vsub.s32 4, %v7994_v17 }
 0x310   :  { %v5938_v25 = vpop.f32.mrb[126].mxu0  ;;  %v1558_v7 = vadd.f32 %v1557_v58, %v7476_v28  ;;  %vm5362_vm0 = vcmp.lt.s32.totalorder %v5361_v32, 0 }
 0x311   :  { %v1569_v56 = vadd.f32 %v5938_v25, %v7476_v28  ;;  %v1560_v41 = vpop.f32.mrb[127].mxu0  ;;  %v1699_v63 = vsel %vm733_vm3, %v1566_v33, -inf  ;;  %v3229_v48 = vsel %vm5362_vm0, 0, %v5361_v32  ;;  %v6186_v32 = vld [vmem:[%s8406_s8 + $0x50] sm:$0xff]   ;;  %vm3647_vm0 = vcmask 72704  }
 0x312   :  { %v1561_v24 = vadd.f32 %v1560_v41, %v7476_v28  ;;  %v1903_v49 = vpop.f32.mrb[68].mxu1  ;;  %v1695_v53 = vsel %vm733_vm3, %v1558_v7, -inf  ;;  %v3230_v14 = vsub.s32 32, %v3229_v48  ;;  %v3231_v12 = vshll.u32 %v3222_v52, %v3229_v48  ;;  %v6184_v41 = vld [vmem:[%s8406_s8 + $0x48] sm:$0xff]  }
 0x313   :  { %v8035_v46 = vadd.f32 %v1903_v49, %v1841_v5  ;;  %v5969_v10 = vpop.f32.mrb[69].mxu1  ;;  %v1696_v55 = vmax.f32 %v1692_v2, %v1695_v53  ;;  %v1701_v28 = vsel %vm733_vm3, %v1569_v56, -inf  ;;  %v3234_v47 = vsub.s32 4294967266, %v3229_v48  ;;  %5652 = vmatprep.subr.bf16.mxu1 %v6184_v41  ;;  %v6189_v53 = vld [vmem:[%s8406_s8 + $0x18] sm:$0xff]   ;;  %v6191_v48 = vld [vmem:[%s8406_s8 + $0x20] sm:$0xff]  }
 0x314   :  { %v1697_v0 = vsel %vm733_vm3, %v1561_v24, -inf  ;;  %v1906_v30 = vpop.f32.mrb[70].mxu1  ;;  %v3232_v62 = vshrl.u32 %v3214_v9, %v3230_v14  ;;  %v1639_v52 = vrot.slane %v1638_v44, 1  ;;  %v3245_v5 = vsel %vm3160_vm5, %v3244_v4, %v7994_v17  ;;  %v6185_v17 = vld [vmem:[%s8406_s8 + $0x8] sm:$0xff]   ;;  %v6188_v9 = vld [vmem:[%s8406_s8 + $0x58] sm:$0xff]   ;;  %v6190_v10 = vld [vmem:[%s8406_s8 + $0x60] sm:$0xff]  }
 0x315   :  { %v1698_v3 = vmax.f32 %v1694_v45, %v1697_v0  ;;  %v6153_v23 = vpack.i.bf16 %v8035_v46, %v8028_v15  ;;  %v5970_v54 = vpop.f32.mrb[71].mxu1  ;;  %v1700_v22 = vmax.f32 %v1696_v55, %v1699_v63  ;;  %v3235_v19 = vadd.s32 127, %v3234_v47  ;;  %5653 = vmatpush3.bf16.msra.mxu1 %v6185_v17  ;;  %v3595_v15 = vpop.permute.xlu0 %3594 }
 0x316   :  { %v3233_v29 = vor.u32 %v3232_v62, %v3231_v12  ;;  %v3247_v25 = vsel %vm3159_vm8, 0, %v3245_v5  ;;  %v1640_v7 = vmax.f32 %v1638_v44, %v1639_v52  ;;  %5654 = vmatprep.subr.bf16.mxu1 %v6186_v32  ;;  %v6192_v12 = vld [vmem:[%s8406_s8 + $0x68] sm:$0xff]  }
 0x317   :  { %v1702_v57 = vmax.f32 %v1698_v3, %v1701_v28  ;;  %v3236_v37 = vshll.u32 %v3235_v19, 23  ;;  %v3251_v51 = vadd.s32 3, %v3247_v25  ;;  %v3355_v49 = vand.u32 3, %v3247_v25 }
 0x318   :  { %v3240_v31 = vcvt.s32.f32 %v3233_v29  ;;  %v6197_v29 = vld [vmem:[%s8406_s8 + $0x38] sm:$0xff]  }
 0x319   :  { %v1703_v26 = vmax.f32 %v1700_v22, %v1702_v57  ;;  %v3237_v11 = vor.u32 4788187, %v3236_v37  ;;  %v3252_v24 = vand.u32 3, %v3251_v51  ;;  %5655 = vmatpush3.bf16.msra.mxu1 %v6187_v35  ;;  %vm3360_vm14 = vcmp.eq.s32.totalorder %v3355_v49, 2  ;;  %v3591_v37 = vpop.permute.xlu1 %3590 }
 0x31a   :  { %5656 = vmatprep.subr.bf16.mxu1 %v6188_v9  ;;  %vm3357_vm1 = vcmp.eq.s32.totalorder %v3355_v49, 0  ;;  %vm3356_vm15 = vcmp.lt.s32.totalorder %v3355_v49, 2  ;;  %v3665_v22 = vsel %vm3635_vm6, %v7106_v27, %v7918_v60  ;;  %v6195_v27 = vld [vmem:[%s8406_s8 + $0x30] sm:$0xff]   ;;  %v6196_v60 = vld [vmem:[%s8406_s8 + $0x78] sm:$0xff]   ;;  %vm3640_vm6 = vcmask 39936   ;;  %v6198_v9 = vld [vmem:[%s8404_s6 + $0x80] sm:$0xff]  }
 0x31b   :  { %v1704_v61 = vrot.slane %v1703_v26, 4  ;;  %v3238_v34 = vand.u32 2147483647, %v3237_v11  ;;  %vm3257_vm11 = vcmp.eq.s32.totalorder %v3252_v24, 2  ;;  %vm3254_vm9 = vcmp.eq.s32.totalorder %v3252_v24, 0 }
 0x31c   :  { %vm3253_vm12 = vcmp.lt.s32.totalorder %v3252_v24, 2  ;;  %v3666_v39 = vsel %vm3638_vm7, %v3665_v22, 0.0  ;;  %vm3642_vm7 = vcmask 48128  }
 0x31d   :  { %v1705_v1 = vmax.f32 %v1703_v26, %v1704_v61  ;;  %v3241_v6 = vmul.f32 %v3240_v31, %v3238_v34  ;;  %5657 = vmatpush3.bf16.msra.mxu1 %v6189_v53  ;;  %v6194_v26 = vld [vmem:[%s8406_s8 + $0x70] sm:$0xff]   ;;  %v3641_v61 = vsel %vm3640_vm6, %v7977_v8, %v3591_v37 }
 0x31e   :  { %5658 = vmatprep.subr.bf16.mxu1 %v6190_v10  ;;  %v6200_v53 = vld [vmem:[%s8404_s6 + $0x90] sm:$0xff]   ;;  %v6201_v10 = vld [vmem:[%s8404_s6 + $0x98] sm:$0xff]  }
 0x31f   :  { %v1706_v18 = vrot.slane %v1705_v1, 2  ;;  %v3242_v2 = vxor.u32 2147483648, %v3241_v6 }
 0x321   :  { %v1707_v58 = vmax.f32 %v1705_v1, %v1706_v18  ;;  %v3243_v38 = vsel %vm3160_vm5, %v3242_v2, %v3241_v6  ;;  %5659 = vmatpush3.bf16.msra.mxu1 %v6191_v48  ;;  %vm3649_vm5 = vcmask 89088   ;;  %v8141_v48 = vsub.s32 5, %v6718_v42 }
 0x322   :  { %v3246_v33 = vsel %vm3159_vm8, %v7634_v20, %v3243_v38  ;;  %v6193_v20 = vld [vmem:[%s8406_s8 + $0x28] sm:$0xff]   ;;  %5660 = vmatprep.subr.bf16.mxu1 %v6192_v12  ;;  %vm3651_vm8 = vcmask 105472  }
 0x323   :  { %v1708_v59 = vrot.slane %v1707_v58, 1  ;;  %6272 = vcosq.f32 %v3246_v33 }
 0x324   :  { %6274 = vsinq.f32 %v3246_v33 }
 0x325   :  { %v1709_v56 = vmax.f32 %v1707_v58, %v1708_v59  ;;  %5661 = vmatpush3.bf16.msra.mxu1 %v6193_v20 }
 0x326   :  { %5662 = vmatprep.subr.bf16.mxu1 %v6194_v26 }
 0x327   :  { %v8051_v45 = vsel %vm3901_vm10, %v1709_v56, %v1640_v7  ;;  %vm3653_vm10 = vcmask 121856  }
 0x329   :  { %5663 = vmatpush3.bf16.msra.mxu1 %v6195_v27 }
 0x32a   :  { %5664 = vmatprep.subr.bf16.mxu1 %v6196_v60 }
 0x32d   :  { %v6273_v63 = vpop.eup %6272  ;;  %5665 = vmatpush3.bf16.msra.mxu1 %v6197_v29  ;;  %v3599_v46 = vpop.permute.xlu1 %3598 }
 0x32e   :  { %v6275_v55 = vpop.eup %6274  ;;  %v3258_v0 = vxor.u32 2147483648, %v6273_v63  ;;  %5971 = vmatprep.subr.bf16.mxu1 %v6322_v21  ;;  %v3603_v31 = vpop.permute.xlu0 %3602 }
 0x32f   :  { %v3255_v30 = vxor.u32 2147483648, %v6275_v55 }
 0x330   :  { %v3259_v28 = vsel %vm3257_vm11, %v3258_v0, %v6275_v55  ;;  %v3362_v3 = vsel %vm3360_vm14, %v3258_v0, %v6275_v55  ;;  %vm3655_vm11 = vcmask 138240   ;;  %vm3657_vm14 = vcmask 154624   ;;  %v6203_v55 = vld [vmem:[%s8404_s6 + $0xa8] sm:$0xff]   ;;  %v6204_v0 = vld [vmem:[%s8404_s6 + $0xb0] sm:$0xff]  }
 0x331   :  { %v3256_v54 = vsel %vm3254_vm9, %v6273_v63, %v3255_v30  ;;  %v3359_v14 = vsel %vm3357_vm1, %v6273_v63, %v3255_v30  ;;  %v3607_v44 = vpop.permute.xlu1 %3606  ;;  %vm3659_vm9 = vcmask 171008   ;;  %vm8428_vm1 = vmmov 0   ;;  %v6202_v63 = vld [vmem:[%s8404_s6 + $0xa0] sm:$0xff]   ;;  %v6205_v30 = vld [vmem:[%s8404_s6 + $0xb8] sm:$0xff]  }
 0x332   :  { %v3260_v47 = vsel %vm3253_vm12, %v3256_v54, %v3259_v28  ;;  %v3363_v57 = vsel %vm3356_vm15, %v3359_v14, %v3362_v3  ;;  %v3951_v3 = vrot.slane %v8017_v40, %v8141_v48  ;;  %vm4088_vm12 = vcmask 1041408  }
 0x333   :  { %v3261_v62 = vsel %vm3250_vm13, nan, %v3260_v47  ;;  %v3364_v19 = vsel %vm3250_vm13, nan, %v3363_v57  ;;  %vm4237_vm15 = vcmask 517120   ;;  %vm5190_vm13 = vcmask 17408  }
 0x334   :  { %3626 = vrot.lane.b32.xlu0 %v3261_v62, %s6345_s4  ;;  %3630 = vrot.lane.b32.xlu1 %v3364_v19, %s6346_s1 }
 0x338   :  { %3668 = vrot.lane.b32.xlu0 %v3666_v39, %s6347_s20  ;;  %6154 = vrot.lane.b32.xlu1 %v6153_v23, %s6348_s21  ;;  %v3643_v23 = vsel %vm3642_vm7, %v3641_v61, %v3595_v15 }
 0x339   :  { %v3645_v11 = vsel %vm3644_vm4, %v3643_v23, %v3599_v46 }
 0x33a   :  { %v3646_v1 = vsel %vm211_vm2, %v3645_v11, %v3603_v31  ;;  %vm3671_vm2 = vcmask 187392  }
 0x33b   :  { %v3648_v34 = vsel %vm3647_vm0, %v3646_v1, %v3607_v44 }
 0x34c   :  { %v3611_v4 = vpop.permute.xlu0 %3610 }
 0x34d   :  { %v3615_v18 = vpop.permute.xlu1 %3614  ;;  %v3650_v6 = vsel %vm3649_vm5, %v3648_v34, %v3611_v4 }
 0x34e   :  { %v3652_v52 = vsel %vm3651_vm8, %v3650_v6, %v3615_v18 }
 0x376   :  { %v3619_v8 = vpop.permute.xlu0 %3618 }
 0x377   :  { %v3623_v58 = vpop.permute.xlu1 %3622  ;;  %v3654_v2 = vsel %vm3653_vm10, %v3652_v52, %v3619_v8  ;;  %v8147_v52 = vsub.s32 6, %v6718_v42 }
 0x378   :  { %v3656_v5 = vsel %vm3655_vm11, %v3654_v2, %v3623_v58 }
 0x3a6   :  { %v3627_v59 = vpop.permute.xlu0 %3626  ;;  %v3631_v38 = vpop.permute.xlu1 %3630 }
 0x3a7   :  { %v3658_v33 = vsel %vm3657_vm14, %v3656_v5, %v3627_v59  ;;  %v8151_v5 = vsub.s32 7, %v6718_v42  ;;  %v6207_v42 = vld [vmem:[%s8407_s9 + $0x28] sm:$0xff]  }
 0x3a8   :  { %v3660_v25 = vsel %vm3659_vm9, %v3658_v33, %v3631_v38 }
 0x3aa   :  { %v3669_v7 = vpop.permute.xlu0 %3668  ;;  %v6155_v56 = vpop.permute.xlu1 %6154 }
 0x3ab   :  { %v6157_v41 = vunpack.i.h.bf16 %v6155_v56  ;;  %v6156_v51 = vunpack.i.l.bf16 %v6155_v56  ;;  %v3672_v17 = vsel %vm3671_vm2, %v3660_v25, %v3669_v7 }
 0x3ad   :  { %v3912_v32 = vsel %vm733_vm3, %v8051_v45, %v6157_v41  ;;  %v3913_v24 = vsel %vm733_vm3, %v3672_v17, %v6156_v51  ;;  %v6199_v45 = vld [vmem:[%s8404_s6 + $0x88] sm:$0xff]   ;;  %v6206_v41 = vld [vmem:[%s8407_s9 + $0x20] sm:$0xff]   ;;  %v6209_v51 = vld [vmem:[%s8407_s9 + $0x38] sm:$0xff]  }
 0x3ae   :  { %v3946_v49 = vpack.c.bf16 %v3912_v32, %v3912_v32  ;;  %v3947_v35 = vpack.c.bf16 %v3913_v24, %v3913_v24  ;;  %v8176_v17 = vld [vmem:[%s8408_s10 + $0x8] sm:$0xff] }
 0x3af   :  { %v4148_v32 = vrot.slane %v8176_v17, %v6721_v43 }
 0x3b0   :  { %4080 = vmatprep.mubr.bf16.mxu1 %v3947_v35 }
 0x3b1   :  { %4081 = vmatmul.mubr.bf16.vlgmr.msra.gmra.mrb[72].mxu1 %v3946_v49 }
 0x3b2   :  { %5987 = vmatprep.mubr.msk.bf16.mxu1 %vm8428_vm1, %v6322_v21  ;;  %5972 = vmatpush3.bf16.msra.mxu1 %v6198_v9 }
 0x3b3   :  { %5973 = vmatprep.subr.bf16.mxu1 %v6322_v21 }
 0x3b6   :  { %5974 = vmatpush3.bf16.msra.mxu1 %v6199_v45 }
 0x3b7   :  { %5975 = vmatprep.subr.bf16.mxu1 %v6322_v21 }
 0x3ba   :  { %5976 = vmatpush3.bf16.msra.mxu1 %v6200_v53 }
 0x3bb   :  { %5977 = vmatprep.subr.bf16.mxu1 %v6322_v21 }
 0x3be   :  { %5978 = vmatpush3.bf16.msra.mxu1 %v6201_v10 }
 0x3bf   :  { %5979 = vmatprep.subr.bf16.mxu1 %v6322_v21 }
 0x3c2   :  { %5980 = vmatpush3.bf16.msra.mxu1 %v6202_v63 }
 0x3c3   :  { %5981 = vmatprep.subr.bf16.mxu1 %v6322_v21 }
 0x3c6   :  { %5982 = vmatpush3.bf16.msra.mxu1 %v6203_v55 }
 0x3c7   :  { %5983 = vmatprep.subr.bf16.mxu1 %v6322_v21 }
 0x3ca   :  { %5984 = vmatpush3.bf16.msra.mxu1 %v6204_v0 }
 0x3cb   :  { %5985 = vmatprep.subr.bf16.mxu1 %v6322_v21 }
 0x3ce   :  { %5986 = vmatpush3.bf16.msra.mxu1 %v6205_v30 }
 0x3cf   :  { %5991 = vmatprep.subr.bf16.mxu1 %v6322_v21 }
 0x484   :  { %v5666_v28 = vpop.f32.mrb[72].mxu1 }
 0x485   :  { %v5667_v54 = vpop.f32.mrb[73].mxu1 }
 0x486   :  { %v5668_v14 = vadd.f32 %v5667_v54, %v5666_v28  ;;  %v5669_v12 = vpop.f32.mrb[74].mxu1 }
 0x487   :  { %v5670_v47 = vpop.f32.mrb[75].mxu1 }
 0x488   :  { %v4083_v22 = vadd.f32 %v5668_v14, %v3951_v3 }
 0x48a   :  { %v4089_v57 = vsel %vm4088_vm12, %v4083_v22, 0.0  ;;  %v4096_v62 = vmul.f32 %v4083_v22, %v4083_v22 }
 0x48b   :  { %v4090_v19 = vrot.slane %v4089_v57, 4 }
 0x48c   :  { %v4097_v20 = vsel %vm4088_vm12, %v4096_v62, 0.0 }
 0x48d   :  { %v4091_v39 = vadd.f32 %v4090_v19, %v4089_v57  ;;  %v4098_v26 = vrot.slane %v4097_v20, 4 }
 0x48f   :  { %v4092_v27 = vrot.slane %v4091_v39, 2  ;;  %v4099_v60 = vadd.f32 %v4098_v26, %v4097_v20 }
 0x491   :  { %v4093_v29 = vadd.f32 %v4092_v27, %v4091_v39  ;;  %v4100_v37 = vrot.slane %v4099_v60, 2 }
 0x493   :  { %v4094_v61 = vrot.slane %v4093_v29, 1  ;;  %v4101_v15 = vadd.f32 %v4100_v37, %v4099_v60 }
 0x495   :  { %v4095_v46 = vadd.f32 %v4094_v61, %v4093_v29  ;;  %v4102_v23 = vrot.slane %v4101_v15, 1 }
 0x497   :  { %v4103_v11 = vadd.f32 %v4102_v23, %v4101_v15  ;;  %v4104_v31 = vmul.f32 0.5, %v4095_v46 }
 0x499   :  { %v4105_v44 = vmul.f32 0.5, %v4103_v11  ;;  %v4106_v1 = vmul.f32 %v4104_v31, %v4104_v31 }
 0x49b   :  { %v4107_v34 = vsub.f32 %v4105_v44, %v4106_v1 }
 0x49d   :  { %v4108_v4 = vadd.f32 1e-05, %v4107_v34  ;;  %v6210_v34 = vld [vmem:[%s8407_s9 + $0x40] sm:$0xff]  }
 0x49f   :  { %6276 = vrsqrt.f32 %v4108_v4  ;;  %v6211_v4 = vld [vmem:[%s8407_s9 + $0x48] sm:$0xff]  }
 0x4a9   :  { %v6277_v18 = vpop.eup %6276 }
 0x4aa   :  { %v4110_v6 = vmul.f32 %v8017_v40, %v6277_v18  ;;  %v6214_v18 = vld [vmem:[%s8407_s9 + $0x60] sm:$0xff]  }
 0x4ab   :  { %6016 = vmatpush3.bf16.msra.mxu0 %v6214_v18 }
 0x4ac   :  { %v4116_v8 = vmul.f32 %v4110_v6, %v4104_v31  ;;  %v4114_v58 = vrot.slane %v4110_v6, %v8147_v52  ;;  %v6215_v6 = vld [vmem:[%s8407_s9 + $0x68] sm:$0xff]   ;;  %6017 = vmatprep.subr.bf16.mxu0 %v6322_v21 }
 0x4ae   :  { %v4118_v2 = vrot.slane %v4116_v8, 7  ;;  %v4115_v38 = vmul.f32 %v4114_v58, %v4083_v22  ;;  %v6212_v8 = vld [vmem:[%s8407_s9 + $0x50] sm:$0xff]  }
 0x4af   :  { %6018 = vmatpush3.bf16.msra.mxu0 %v6215_v6  ;;  %v6216_v58 = vld [vmem:[%s8407_s9 + $0x70] sm:$0xff]  }
 0x4b0   :  { %v4120_v59 = vsub.f32 %v8017_v40, %v4118_v2  ;;  %v6208_v40 = vld [vmem:[%s8407_s9 + $0x30] sm:$0xff]   ;;  %6019 = vmatprep.subr.bf16.mxu0 %v6322_v21  ;;  %v6213_v2 = vld [vmem:[%s8407_s9 + $0x58] sm:$0xff]  }
 0x4b2   :  { %v4124_v33 = vrot.slane %v4120_v59, %v8151_v5  ;;  %v4289_v59 = vrot.slane %v8176_v17, %v7127_v50 }
 0x4b3   :  { %6020 = vmatpush3.bf16.msra.mxu0 %v6216_v58 }
 0x4b4   :  { %v4125_v25 = vadd.f32 %v4124_v33, %v4115_v38  ;;  %6021 = vmatprep.subr.bf16.mxu0 %v6322_v21 }
 0x4b6   :  { %v4126_v7 = vmax.f32 %v4125_v25, 0.0 }
 0x4b8   :  { %v4144_v56 = vpack.c.bf16 %v4126_v7, %v4126_v7 }
 0x4ba   :  { %5988 = vmatmul.mubr.bf16.vlgmr.msra.gmra.mrb[76].mxu1 %v4144_v56 }
 0x4bb   :  { %5999 = vmatprep.mubr.msk.bf16.mxu1 %vm8428_vm1, %v6322_v21  ;;  %5992 = vmatpush3.bf16.msra.mxu1 %v6206_v41 }
 0x4bc   :  { %5993 = vmatprep.subr.bf16.mxu1 %v6322_v21 }
 0x4bf   :  { %5994 = vmatpush3.bf16.msra.mxu1 %v6207_v42 }
 0x4c0   :  { %5995 = vmatprep.subr.bf16.mxu1 %v6322_v21 }
 0x4c3   :  { %5996 = vmatpush3.bf16.msra.mxu1 %v6208_v40 }
 0x4c4   :  { %5997 = vmatprep.subr.bf16.mxu1 %v6322_v21 }
 0x4c7   :  { %5998 = vmatpush3.bf16.msra.mxu1 %v6209_v51 }
 0x4c8   :  { %6003 = vmatprep.subr.bf16.mxu1 %v6322_v21 }
 0x58d   :  { %v4231_v24 = vpop.f32.mrb[76].mxu1 }
 0x58e   :  { %v4232_v49 = vadd.f32 %v4231_v24, %v4148_v32  ;;  %v5989_v35 = vpop.f32.mrb[77].mxu1 }
 0x58f   :  { %v4234_v9 = vpop.f32.mrb[78].mxu1 }
 0x590   :  { %v4238_v45 = vsel %vm4237_vm15, %v4232_v49, 0.0  ;;  %v4245_v53 = vmul.f32 %v4232_v49, %v4232_v49  ;;  %v5990_v10 = vpop.f32.mrb[79].mxu1 }
 0x591   :  { %v4239_v63 = vrot.slane %v4238_v45, 4 }
 0x592   :  { %v4246_v55 = vsel %vm4237_vm15, %v4245_v53, 0.0 }
 0x593   :  { %v4240_v0 = vadd.f32 %v4239_v63, %v4238_v45  ;;  %v4247_v30 = vrot.slane %v4246_v55, 4 }
 0x595   :  { %v4241_v28 = vrot.slane %v4240_v0, 2  ;;  %v4248_v3 = vadd.f32 %v4247_v30, %v4246_v55 }
 0x597   :  { %v4242_v54 = vadd.f32 %v4241_v28, %v4240_v0  ;;  %v4249_v14 = vrot.slane %v4248_v3, 2 }
 0x599   :  { %v4243_v12 = vrot.slane %v4242_v54, 1  ;;  %v4250_v47 = vadd.f32 %v4249_v14, %v4248_v3 }
 0x59b   :  { %v4244_v22 = vadd.f32 %v4243_v12, %v4242_v54  ;;  %v4251_v57 = vrot.slane %v4250_v47, 1 }
 0x59d   :  { %v4252_v62 = vadd.f32 %v4251_v57, %v4250_v47  ;;  %v4253_v19 = vmul.f32 0.5, %v4244_v22 }
 0x59f   :  { %v4254_v20 = vmul.f32 0.5, %v4252_v62  ;;  %v4255_v39 = vmul.f32 %v4253_v19, %v4253_v19 }
 0x5a1   :  { %v4256_v26 = vsub.f32 %v4254_v20, %v4255_v39 }
 0x5a3   :  { %v4257_v27 = vadd.f32 1e-05, %v4256_v26 }
 0x5a5   :  { %6278 = vrsqrt.f32 %v4257_v27 }
 0x5af   :  { %v6279_v60 = vpop.eup %6278 }
 0x5b0   :  { %v4259_v29 = vmul.f32 %v6279_v60, %v8176_v17 }
 0x5b2   :  { %v4265_v37 = vmul.f32 %v4259_v29, %v4253_v19  ;;  %v4263_v61 = vrot.slane %v4259_v29, %v6971_v36  ;;  %v6217_v29 = vld [vmem:[%s8407_s9 + $0x78] sm:$0xff]  }
 0x5b3   :  { %6022 = vmatpush3.bf16.msra.mxu0 %v6217_v29 }
 0x5b4   :  { %v4267_v15 = vrot.slane %v4265_v37, 7  ;;  %v4264_v23 = vmul.f32 %v4263_v61, %v4232_v49  ;;  %6039 = vmatprep.subr.bf16.mxu0 %v6322_v21  ;;  %v4408_v37 = vrot.slane %v8176_v17, %v8147_v52 }
 0x5b6   :  { %v4269_v46 = vsub.f32 %v8176_v17, %v4267_v15 }
 0x5b8   :  { %v4273_v11 = vrot.slane %v4269_v46, %v7460_v13 }
 0x5ba   :  { %v4274_v31 = vadd.f32 %v4273_v11, %v4264_v23 }
 0x5bc   :  { %v4275_v44 = vmax.f32 %v4274_v31, 0.0 }
 0x5be   :  { %v4285_v1 = vpack.c.bf16 %v4275_v44, %v4275_v44 }
 0x5c0   :  { %6000 = vmatmul.mubr.msk.bf16.vlgmr.msra.gmra.mrb[80].mxu1 %vm733_vm3, %v4285_v1 }
 0x5c1   :  { %6011 = vmatprep.mubr.msk.bf16.mxu1 %vm8428_vm1, %v6322_v21  ;;  %6004 = vmatpush3.bf16.msra.mxu1 %v6210_v34 }
 0x5c2   :  { %6005 = vmatprep.subr.bf16.mxu1 %v6322_v21 }
 0x5c5   :  { %6006 = vmatpush3.bf16.msra.mxu1 %v6211_v4 }
 0x5c6   :  { %6007 = vmatprep.subr.bf16.mxu1 %v6322_v21 }
 0x5c9   :  { %6008 = vmatpush3.bf16.msra.mxu1 %v6212_v8 }
 0x5ca   :  { %6009 = vmatprep.subr.bf16.mxu1 %v6322_v21 }
 0x5cd   :  { %6010 = vmatpush3.bf16.msra.mxu1 %v6213_v2 }
 0x5ce   :  { %6027 = vmatprep.subr.bf16.mxu1 %v6322_v21 }
 0x693   :  { %v4351_v38 = vpop.f32.mrb[80].mxu1 }
 0x694   :  { %v4352_v33 = vadd.f32 %v4351_v38, %v4289_v59  ;;  %v6001_v25 = vpop.f32.mrb[81].mxu1 }
 0x695   :  { %v4354_v7 = vpop.f32.mrb[82].mxu1 }
 0x696   :  { %v4357_v56 = vsel %vm4237_vm15, %v4352_v33, 0.0  ;;  %v4364_v41 = vmul.f32 %v4352_v33, %v4352_v33  ;;  %v6002_v42 = vpop.f32.mrb[83].mxu1 }
 0x697   :  { %v4358_v40 = vrot.slane %v4357_v56, 4 }
 0x698   :  { %v4365_v51 = vsel %vm4237_vm15, %v4364_v41, 0.0 }
 0x699   :  { %v4359_v32 = vadd.f32 %v4358_v40, %v4357_v56  ;;  %v4366_v24 = vrot.slane %v4365_v51, 4 }
 0x69b   :  { %v4360_v49 = vrot.slane %v4359_v32, 2  ;;  %v4367_v35 = vadd.f32 %v4366_v24, %v4365_v51 }
 0x69d   :  { %v4361_v9 = vadd.f32 %v4360_v49, %v4359_v32  ;;  %v4368_v45 = vrot.slane %v4367_v35, 2 }
 0x69f   :  { %v4362_v53 = vrot.slane %v4361_v9, 1  ;;  %v4369_v10 = vadd.f32 %v4368_v45, %v4367_v35  ;;  %v8240_v35 = vld [vmem:[%s8408_s10 + $0x10] sm:$0xff] }
 0x6a1   :  { %v4363_v63 = vadd.f32 %v4362_v53, %v4361_v9  ;;  %v4370_v55 = vrot.slane %v4369_v10, 1 }
 0x6a3   :  { %v4371_v0 = vadd.f32 %v4370_v55, %v4369_v10  ;;  %v4372_v30 = vmul.f32 0.5, %v4363_v63 }
 0x6a5   :  { %v4373_v28 = vmul.f32 0.5, %v4371_v0  ;;  %v4374_v3 = vmul.f32 %v4372_v30, %v4372_v30 }
 0x6a7   :  { %v4375_v54 = vsub.f32 %v4373_v28, %v4374_v3  ;;  %v6219_v28 = vld [vmem:[%s8407_s9 + $0x88] sm:$0xff]   ;;  %v6220_v3 = vld [vmem:[%s8407_s9 + $0x90] sm:$0xff]  }
 0x6a9   :  { %v4376_v14 = vadd.f32 1e-05, %v4375_v54  ;;  %v6221_v54 = vld [vmem:[%s8407_s9 + $0x98] sm:$0xff]  }
 0x6ab   :  { %6280 = vrsqrt.f32 %v4376_v14  ;;  %v4527_v14 = vrot.slane %v8240_v35, %v6971_v36 }
 0x6b5   :  { %v6281_v12 = vpop.eup %6280 }
 0x6b6   :  { %v4378_v47 = vmul.f32 %v6281_v12, %v8176_v17 }
 0x6b8   :  { %v4384_v22 = vmul.f32 %v4378_v47, %v4372_v30  ;;  %v4382_v57 = vrot.slane %v4378_v47, %v8008_v16 }
 0x6ba   :  { %v4386_v62 = vrot.slane %v4384_v22, 7  ;;  %v4383_v20 = vmul.f32 %v4382_v57, %v4352_v33 }
 0x6bc   :  { %v4388_v19 = vsub.f32 %v8176_v17, %v4386_v62 }
 0x6be   :  { %v4392_v39 = vrot.slane %v4388_v19, %v8141_v48 }
 0x6c0   :  { %v4393_v26 = vadd.f32 %v4392_v39, %v4383_v20 }
 0x6c2   :  { %v4394_v27 = vmax.f32 %v4393_v26, 0.0 }
 0x6c4   :  { %v4404_v60 = vpack.c.bf16 %v4394_v27, %v4394_v27 }
 0x6c6   :  { %6012 = vmatmul.mubr.msk.bf16.vlgmr.msra.gmra.mrb[84].mxu1 %vm733_vm3, %v4404_v60 }
 0x6c7   :  { %6035 = vmatprep.mubr.msk.bf16.mxu1 %vm8428_vm1, %v6322_v21 }
 0x799   :  { %v4470_v61 = vpop.f32.mrb[84].mxu1 }
 0x79a   :  { %v4471_v15 = vadd.f32 %v4470_v61, %v4408_v37  ;;  %v6013_v46 = vpop.f32.mrb[85].mxu1 }
 0x79b   :  { %v4473_v23 = vpop.f32.mrb[86].mxu1 }
 0x79c   :  { %v4476_v11 = vsel %vm4237_vm15, %v4471_v15, 0.0  ;;  %v4483_v31 = vmul.f32 %v4471_v15, %v4471_v15  ;;  %v6014_v44 = vpop.f32.mrb[87].mxu1 }
 0x79d   :  { %v4477_v1 = vrot.slane %v4476_v11, 4 }
 0x79e   :  { %v4484_v34 = vsel %vm4237_vm15, %v4483_v31, 0.0 }
 0x79f   :  { %v4478_v4 = vadd.f32 %v4477_v1, %v4476_v11  ;;  %v4485_v18 = vrot.slane %v4484_v34, 4 }
 0x7a1   :  { %v4479_v6 = vrot.slane %v4478_v4, 2  ;;  %v4486_v8 = vadd.f32 %v4485_v18, %v4484_v34 }
 0x7a3   :  { %v4480_v58 = vadd.f32 %v4479_v6, %v4478_v4  ;;  %v4487_v2 = vrot.slane %v4486_v8, 2 }
 0x7a5   :  { %v4481_v59 = vrot.slane %v4480_v58, 1  ;;  %v4488_v38 = vadd.f32 %v4487_v2, %v4486_v8 }
 0x7a7   :  { %v4482_v33 = vadd.f32 %v4481_v59, %v4480_v58  ;;  %v4489_v25 = vrot.slane %v4488_v38, 1 }
 0x7a9   :  { %v4490_v7 = vadd.f32 %v4489_v25, %v4488_v38  ;;  %v4491_v56 = vmul.f32 0.5, %v4482_v33 }
 0x7ab   :  { %v4492_v41 = vmul.f32 0.5, %v4490_v7  ;;  %v4493_v42 = vmul.f32 %v4491_v56, %v4491_v56 }
 0x7ad   :  { %v4494_v40 = vsub.f32 %v4492_v41, %v4493_v42 }
 0x7af   :  { %v4495_v51 = vadd.f32 1e-05, %v4494_v40  ;;  %v6222_v40 = vld [vmem:[%s8407_s9 + $0xa0] sm:$0xff]  }
 0x7b1   :  { %6282 = vrsqrt.f32 %v4495_v51  ;;  %v6223_v51 = vld [vmem:[%s8407_s9 + $0xa8] sm:$0xff]  }
 0x7bb   :  { %v6283_v32 = vpop.eup %6282 }
 0x7bc   :  { %v4497_v24 = vmul.f32 %v6283_v32, %v8176_v17  ;;  %v6218_v17 = vld [vmem:[%s8407_s9 + $0x80] sm:$0xff]   ;;  %v6224_v32 = vld [vmem:[%s8407_s9 + $0xb0] sm:$0xff]  }
 0x7bd   :  { %6028 = vmatpush3.bf16.msra.mxu1 %v6218_v17 }
 0x7be   :  { %v4503_v49 = vmul.f32 %v4497_v24, %v4491_v56  ;;  %v4501_v9 = vrot.slane %v4497_v24, %v8151_v5  ;;  %6029 = vmatprep.subr.bf16.mxu1 %v6322_v21  ;;  %v6225_v24 = vld [vmem:[%s8407_s9 + $0xb8] sm:$0xff]  }
 0x7c0   :  { %v4505_v45 = vrot.slane %v4503_v49, 7  ;;  %v4502_v10 = vmul.f32 %v4501_v9, %v4471_v15  ;;  %v4646_v49 = vrot.slane %v8240_v35, %v8008_v16 }
 0x7c1   :  { %6030 = vmatpush3.bf16.msra.mxu1 %v6219_v28 }
 0x7c2   :  { %v4507_v53 = vsub.f32 %v8240_v35, %v4505_v45  ;;  %6031 = vmatprep.subr.bf16.mxu1 %v6322_v21 }
 0x7c4   :  { %v4511_v63 = vrot.slane %v4507_v53, %v6721_v43 }
 0x7c5   :  { %6032 = vmatpush3.bf16.msra.mxu1 %v6220_v3 }
 0x7c6   :  { %v4512_v55 = vadd.f32 %v4511_v63, %v4502_v10  ;;  %6033 = vmatprep.subr.bf16.mxu1 %v6322_v21 }
 0x7c8   :  { %v4513_v0 = vmax.f32 %v4512_v55, 0.0 }
 0x7c9   :  { %6034 = vmatpush3.bf16.msra.mxu1 %v6221_v54 }
 0x7ca   :  { %v4523_v30 = vpack.c.bf16 %v4513_v0, %v4513_v0  ;;  %6051 = vmatprep.subr.bf16.mxu1 %v6322_v21 }
 0x7cc   :  { %6024 = vmatmul.mubr.msk.bf16.vlgmr.msra.gmra.mrb[128].mxu0 %vm733_vm3, %v4523_v30 }
 0x7cd   :  { %6047 = vmatprep.mubr.msk.bf16.mxu0 %vm8428_vm1, %v6322_v21  ;;  %6040 = vmatpush3.bf16.msra.mxu0 %v6222_v40 }
 0x7ce   :  { %6041 = vmatprep.subr.bf16.mxu0 %v6322_v21 }
 0x7d1   :  { %6042 = vmatpush3.bf16.msra.mxu0 %v6223_v51 }
 0x7d2   :  { %6043 = vmatprep.subr.bf16.mxu0 %v6322_v21 }
 0x7d5   :  { %6044 = vmatpush3.bf16.msra.mxu0 %v6224_v32 }
 0x7d6   :  { %6045 = vmatprep.subr.bf16.mxu0 %v6322_v21 }
 0x7d9   :  { %6046 = vmatpush3.bf16.msra.mxu0 %v6225_v24 }
 0x7da   :  { %6063 = vmatprep.subr.bf16.mxu0 %v6322_v21 }
 0x89f   :  { %v4589_v12 = vpop.f32.mrb[128].mxu0 }
 0x8a0   :  { %v4590_v47 = vadd.f32 %v4589_v12, %v4527_v14  ;;  %v6025_v22 = vpop.f32.mrb[129].mxu0 }
 0x8a1   :  { %v4592_v57 = vpop.f32.mrb[130].mxu0 }
 0x8a2   :  { %v4595_v62 = vsel %vm4237_vm15, %v4590_v47, 0.0  ;;  %v4602_v19 = vmul.f32 %v4590_v47, %v4590_v47  ;;  %v6026_v20 = vpop.f32.mrb[131].mxu0 }
 0x8a3   :  { %v4596_v39 = vrot.slane %v4595_v62, 4 }
 0x8a4   :  { %v4603_v26 = vsel %vm4237_vm15, %v4602_v19, 0.0 }
 0x8a5   :  { %v4597_v27 = vadd.f32 %v4596_v39, %v4595_v62  ;;  %v4604_v60 = vrot.slane %v4603_v26, 4 }
 0x8a7   :  { %v4598_v29 = vrot.slane %v4597_v27, 2  ;;  %v4605_v37 = vadd.f32 %v4604_v60, %v4603_v26 }
 0x8a9   :  { %v4599_v61 = vadd.f32 %v4598_v29, %v4597_v27  ;;  %v4606_v15 = vrot.slane %v4605_v37, 2 }
 0x8ab   :  { %v4600_v46 = vrot.slane %v4599_v61, 1  ;;  %v4607_v23 = vadd.f32 %v4606_v15, %v4605_v37 }
 0x8ad   :  { %v4601_v11 = vadd.f32 %v4600_v46, %v4599_v61  ;;  %v4608_v31 = vrot.slane %v4607_v23, 1 }
 0x8af   :  { %v4609_v44 = vadd.f32 %v4608_v31, %v4607_v23  ;;  %v4610_v1 = vmul.f32 0.5, %v4601_v11 }
 0x8b1   :  { %v4611_v34 = vmul.f32 0.5, %v4609_v44  ;;  %v4612_v4 = vmul.f32 %v4610_v1, %v4610_v1 }
 0x8b3   :  { %v4613_v18 = vsub.f32 %v4611_v34, %v4612_v4 }
 0x8b5   :  { %v4614_v6 = vadd.f32 1e-05, %v4613_v18  ;;  %v6226_v18 = vld [vmem:[%s8407_s9 + $0xc0] sm:$0xff]  }
 0x8b7   :  { %6284 = vrsqrt.f32 %v4614_v6  ;;  %v6227_v6 = vld [vmem:[%s8407_s9 + $0xc8] sm:$0xff]  }
 0x8c1   :  { %v6285_v8 = vpop.eup %6284 }
 0x8c2   :  { %v4616_v58 = vmul.f32 %v6285_v8, %v8240_v35  ;;  %v6228_v8 = vld [vmem:[%s8407_s9 + $0xd0] sm:$0xff]  }
 0x8c4   :  { %v4622_v2 = vmul.f32 %v4616_v58, %v4610_v1  ;;  %v4620_v59 = vrot.slane %v4616_v58, %v7460_v13  ;;  %v6229_v58 = vld [vmem:[%s8407_s9 + $0xd8] sm:$0xff]  }
 0x8c6   :  { %v4624_v38 = vrot.slane %v4622_v2, 7  ;;  %v4621_v25 = vmul.f32 %v4620_v59, %v4590_v47  ;;  %v4765_v2 = vrot.slane %v8240_v35, %v8151_v5 }
 0x8c8   :  { %v4626_v33 = vsub.f32 %v8240_v35, %v4624_v38 }
 0x8ca   :  { %v4630_v7 = vrot.slane %v4626_v33, %v7127_v50 }
 0x8cc   :  { %v4631_v56 = vadd.f32 %v4630_v7, %v4621_v25 }
 0x8ce   :  { %v4632_v41 = vmax.f32 %v4631_v56, 0.0 }
 0x8d0   :  { %v4642_v42 = vpack.c.bf16 %v4632_v41, %v4632_v41 }
 0x8d2   :  { %6036 = vmatmul.mubr.msk.bf16.vlgmr.msra.gmra.mrb[88].mxu1 %vm733_vm3, %v4642_v42 }
 0x8d3   :  { %6059 = vmatprep.mubr.msk.bf16.mxu1 %vm8428_vm1, %v6322_v21  ;;  %6052 = vmatpush3.bf16.msra.mxu1 %v6226_v18 }
 0x8d4   :  { %6053 = vmatprep.subr.bf16.mxu1 %v6322_v21 }
 0x8d7   :  { %6054 = vmatpush3.bf16.msra.mxu1 %v6227_v6 }
 0x8d8   :  { %6055 = vmatprep.subr.bf16.mxu1 %v6322_v21 }
 0x8db   :  { %6056 = vmatpush3.bf16.msra.mxu1 %v6228_v8 }
 0x8dc   :  { %6057 = vmatprep.subr.bf16.mxu1 %v6322_v21 }
 0x8df   :  { %6058 = vmatpush3.bf16.msra.mxu1 %v6229_v58 }
 0x8e0   :  { %6075 = vmatprep.subr.bf16.mxu1 %v6322_v21 }
 0x9a5   :  { %v4708_v9 = vpop.f32.mrb[88].mxu1 }
 0x9a6   :  { %v4709_v45 = vadd.f32 %v4708_v9, %v4646_v49  ;;  %v6037_v53 = vpop.f32.mrb[89].mxu1 }
 0x9a7   :  { %v4711_v10 = vpop.f32.mrb[90].mxu1 }
 0x9a8   :  { %v4714_v63 = vsel %vm4237_vm15, %v4709_v45, 0.0  ;;  %v4721_v55 = vmul.f32 %v4709_v45, %v4709_v45  ;;  %v6038_v0 = vpop.f32.mrb[91].mxu1 }
 0x9a9   :  { %v4715_v30 = vrot.slane %v4714_v63, 4 }
 0x9aa   :  { %v4722_v17 = vsel %vm4237_vm15, %v4721_v55, 0.0 }
 0x9ab   :  { %v4716_v28 = vadd.f32 %v4715_v30, %v4714_v63  ;;  %v4723_v3 = vrot.slane %v4722_v17, 4 }
 0x9ad   :  { %v4717_v54 = vrot.slane %v4716_v28, 2  ;;  %v4724_v14 = vadd.f32 %v4723_v3, %v4722_v17 }
 0x9af   :  { %v4718_v12 = vadd.f32 %v4717_v54, %v4716_v28  ;;  %v4725_v47 = vrot.slane %v4724_v14, 2  ;;  %v8325_v54 = vld [vmem:[%s8408_s10 + $0x18] sm:$0xff] }
 0x9b1   :  { %v4719_v22 = vrot.slane %v4718_v12, 1  ;;  %v4726_v57 = vadd.f32 %v4725_v47, %v4724_v14 }
 0x9b3   :  { %v4720_v62 = vadd.f32 %v4719_v22, %v4718_v12  ;;  %v4727_v19 = vrot.slane %v4726_v57, 1 }
 0x9b5   :  { %v4728_v20 = vadd.f32 %v4727_v19, %v4726_v57  ;;  %v4729_v39 = vmul.f32 0.5, %v4720_v62 }
 0x9b7   :  { %v4730_v26 = vmul.f32 0.5, %v4728_v20  ;;  %v4731_v27 = vmul.f32 %v4729_v39, %v4729_v39 }
 0x9b9   :  { %v4732_v60 = vsub.f32 %v4730_v26, %v4731_v27 }
 0x9bb   :  { %v4733_v29 = vadd.f32 1e-05, %v4732_v60  ;;  %v6230_v60 = vld [vmem:[%s8407_s9 + $0xe0] sm:$0xff]  }
 0x9bd   :  { %6286 = vrsqrt.f32 %v4733_v29  ;;  %v6231_v29 = vld [vmem:[%s8407_s9 + $0xe8] sm:$0xff]  }
 0x9c7   :  { %v6287_v37 = vpop.eup %6286 }
 0x9c8   :  { %v4735_v61 = vmul.f32 %v6287_v37, %v8240_v35  ;;  %v6233_v37 = vld [vmem:[%s8407_s9 + $0xf8] sm:$0xff]  }
 0x9ca   :  { %v4741_v15 = vmul.f32 %v4735_v61, %v4729_v39  ;;  %v4739_v46 = vrot.slane %v4735_v61, %v8141_v48  ;;  %v4884_v61 = vrot.slane %v8325_v54, %v7460_v13 }
 0x9cc   :  { %v4743_v23 = vrot.slane %v4741_v15, 7  ;;  %v4740_v31 = vmul.f32 %v4739_v46, %v4709_v45 }
 0x9ce   :  { %v4745_v11 = vsub.f32 %v8240_v35, %v4743_v23 }
 0x9d0   :  { %v4749_v44 = vrot.slane %v4745_v11, %v8147_v52 }
 0x9d2   :  { %v4750_v1 = vadd.f32 %v4749_v44, %v4740_v31 }
 0x9d4   :  { %v4751_v34 = vmax.f32 %v4750_v1, 0.0 }
 0x9d6   :  { %v4761_v4 = vpack.c.bf16 %v4751_v34, %v4751_v34 }
 0x9d8   :  { %6048 = vmatmul.mubr.msk.bf16.vlgmr.msra.gmra.mrb[132].mxu0 %vm733_vm3, %v4761_v4 }
 0x9d9   :  { %6071 = vmatprep.mubr.msk.bf16.mxu0 %vm8428_vm1, %v6322_v21  ;;  %6064 = vmatpush3.bf16.msra.mxu0 %v6230_v60 }
 0x9da   :  { %6065 = vmatprep.subr.bf16.mxu0 %v6322_v21 }
 0x9dd   :  { %6066 = vmatpush3.bf16.msra.mxu0 %v6231_v29 }
 0x9de   :  { %6067 = vmatprep.subr.bf16.mxu0 %v6322_v21 }
 0xaab   :  { %v4827_v59 = vpop.f32.mrb[132].mxu0 }
 0xaac   :  { %v4828_v38 = vadd.f32 %v4827_v59, %v4765_v2  ;;  %v6049_v33 = vpop.f32.mrb[133].mxu0 }
 0xaad   :  { %v4830_v25 = vpop.f32.mrb[134].mxu0 }
 0xaae   :  { %v4833_v7 = vsel %vm4237_vm15, %v4828_v38, 0.0  ;;  %v4840_v56 = vmul.f32 %v4828_v38, %v4828_v38  ;;  %v6050_v41 = vpop.f32.mrb[135].mxu0 }
 0xaaf   :  { %v4834_v42 = vrot.slane %v4833_v7, 4 }
 0xab0   :  { %v4841_v40 = vsel %vm4237_vm15, %v4840_v56, 0.0 }
 0xab1   :  { %v4835_v51 = vadd.f32 %v4834_v42, %v4833_v7  ;;  %v4842_v32 = vrot.slane %v4841_v40, 4 }
 0xab3   :  { %v4836_v24 = vrot.slane %v4835_v51, 2  ;;  %v4843_v49 = vadd.f32 %v4842_v32, %v4841_v40 }
 0xab5   :  { %v4837_v9 = vadd.f32 %v4836_v24, %v4835_v51  ;;  %v4844_v45 = vrot.slane %v4843_v49, 2 }
 0xab7   :  { %v4838_v53 = vrot.slane %v4837_v9, 1  ;;  %v4845_v10 = vadd.f32 %v4844_v45, %v4843_v49 }
 0xab9   :  { %v4839_v35 = vadd.f32 %v4838_v53, %v4837_v9  ;;  %v4846_v63 = vrot.slane %v4845_v10, 1 }
 0xabb   :  { %v4847_v55 = vadd.f32 %v4846_v63, %v4845_v10  ;;  %v4848_v0 = vmul.f32 0.5, %v4839_v35 }
 0xabd   :  { %v4849_v30 = vmul.f32 0.5, %v4847_v55  ;;  %v4850_v17 = vmul.f32 %v4848_v0, %v4848_v0 }
 0xabf   :  { %v4851_v28 = vsub.f32 %v4849_v30, %v4850_v17  ;;  %v6234_v30 = vld [vmem:[%s8405_s7 + $0x20] sm:$0xff]   ;;  %v6237_v17 = vld [vmem:[%s8405_s7 + $0x38] sm:$0xff]  }
 0xac1   :  { %v4852_v3 = vadd.f32 1e-05, %v4851_v28  ;;  %v5003_v28 = vrot.slane %v8325_v54, %v8141_v48 }
 0xac3   :  { %6288 = vrsqrt.f32 %v4852_v3 }
 0xacd   :  { %v6289_v14 = vpop.eup %6288 }
 0xace   :  { %v4854_v12 = vmul.f32 %v6289_v14, %v8325_v54 }
 0xad0   :  { %v4860_v47 = vmul.f32 %v4854_v12, %v4848_v0  ;;  %v4858_v22 = vrot.slane %v4854_v12, %v6721_v43 }
 0xad2   :  { %v4862_v57 = vrot.slane %v4860_v47, 7  ;;  %v4859_v19 = vmul.f32 %v4858_v22, %v4828_v38 }
 0xad4   :  { %v4864_v62 = vsub.f32 %v8325_v54, %v4862_v57 }
 0xad6   :  { %v4868_v20 = vrot.slane %v4864_v62, %v6971_v36  ;;  %v6232_v36 = vld [vmem:[%s8407_s9 + $0xf0] sm:$0xff]  }
 0xad7   :  { %6068 = vmatpush3.bf16.msra.mxu0 %v6232_v36 }
 0xad8   :  { %v4869_v39 = vadd.f32 %v4868_v20, %v4859_v19  ;;  %6069 = vmatprep.subr.bf16.mxu0 %v6322_v21 }
 0xada   :  { %v4870_v26 = vmax.f32 %v4869_v39, 0.0 }
 0xadb   :  { %6070 = vmatpush3.bf16.msra.mxu0 %v6233_v37 }
 0xadc   :  { %v4880_v27 = vpack.c.bf16 %v4870_v26, %v4870_v26 }
 0xade   :  { %6060 = vmatmul.mubr.msk.bf16.vlgmr.msra.gmra.mrb[92].mxu1 %vm733_vm3, %v4880_v27 }
 0xadf   :  { %6083 = vmatprep.mubr.msk.bf16.mxu1 %vm8428_vm1, %v6322_v21  ;;  %6076 = vmatpush3.bf16.msra.mxu1 %v6234_v30 }
 0xae0   :  { %6077 = vmatprep.subr.bf16.mxu1 %v6322_v21 }
 0xbb1   :  { %v4946_v15 = vpop.f32.mrb[92].mxu1 }
 0xbb2   :  { %v4947_v46 = vadd.f32 %v4946_v15, %v4884_v61  ;;  %v6061_v23 = vpop.f32.mrb[93].mxu1 }
 0xbb3   :  { %v4949_v11 = vpop.f32.mrb[94].mxu1 }
 0xbb4   :  { %v4952_v31 = vsel %vm4237_vm15, %v4947_v46, 0.0  ;;  %v4959_v44 = vmul.f32 %v4947_v46, %v4947_v46  ;;  %v6062_v1 = vpop.f32.mrb[95].mxu1 }
 0xbb5   :  { %v4953_v34 = vrot.slane %v4952_v31, 4 }
 0xbb6   :  { %v4960_v4 = vsel %vm4237_vm15, %v4959_v44, 0.0 }
 0xbb7   :  { %v4954_v18 = vadd.f32 %v4953_v34, %v4952_v31  ;;  %v4961_v6 = vrot.slane %v4960_v4, 4 }
 0xbb9   :  { %v4955_v8 = vrot.slane %v4954_v18, 2  ;;  %v4962_v58 = vadd.f32 %v4961_v6, %v4960_v4 }
 0xbbb   :  { %v4956_v2 = vadd.f32 %v4955_v8, %v4954_v18  ;;  %v4963_v59 = vrot.slane %v4962_v58, 2 }
 0xbbd   :  { %v4957_v38 = vrot.slane %v4956_v2, 1  ;;  %v4964_v33 = vadd.f32 %v4963_v59, %v4962_v58 }
 0xbbf   :  { %v4958_v13 = vadd.f32 %v4957_v38, %v4956_v2  ;;  %v4965_v25 = vrot.slane %v4964_v33, 1 }
 0xbc1   :  { %v4966_v7 = vadd.f32 %v4965_v25, %v4964_v33  ;;  %v4967_v56 = vmul.f32 0.5, %v4958_v13  ;;  %v44_v13 = vld [vmem:[%s8408_s10 + $0x20] sm:$0xff] }
 0xbc2   :  { %v5122_v25 = vrot.slane %v44_v13, %v6721_v43 }
 0xbc3   :  { %v4968_v41 = vmul.f32 0.5, %v4966_v7  ;;  %v4969_v42 = vmul.f32 %v4967_v56, %v4967_v56 }
 0xbc5   :  { %v4970_v40 = vsub.f32 %v4968_v41, %v4969_v42 }
 0xbc7   :  { %v4971_v51 = vadd.f32 1e-05, %v4970_v40 }
 0xbc9   :  { %6290 = vrsqrt.f32 %v4971_v51 }
 0xbd3   :  { %v6291_v32 = vpop.eup %6290 }
 0xbd4   :  { %v4973_v24 = vmul.f32 %v6291_v32, %v8325_v54 }
 0xbd6   :  { %v4979_v49 = vmul.f32 %v4973_v24, %v4967_v56  ;;  %v4977_v9 = vrot.slane %v4973_v24, %v7127_v50  ;;  %v6235_v50 = vld [vmem:[%s8405_s7 + $0x28] sm:$0xff]  }
 0xbd7   :  { %6078 = vmatpush3.bf16.msra.mxu1 %v6235_v50 }
 0xbd8   :  { %v4981_v45 = vrot.slane %v4979_v49, 7  ;;  %v4978_v10 = vmul.f32 %v4977_v9, %v4947_v46  ;;  %6079 = vmatprep.subr.bf16.mxu1 %v6322_v21 }
 0xbda   :  { %v4983_v53 = vsub.f32 %v8325_v54, %v4981_v45 }
 0xbdc   :  { %v4987_v35 = vrot.slane %v4983_v53, %v8008_v16  ;;  %v6236_v16 = vld [vmem:[%s8405_s7 + $0x30] sm:$0xff]  }
 0xbdd   :  { %6080 = vmatpush3.bf16.msra.mxu1 %v6236_v16 }
 0xbde   :  { %v4988_v63 = vadd.f32 %v4987_v35, %v4978_v10  ;;  %6081 = vmatprep.subr.bf16.mxu1 %v6322_v21 }
 0xbe0   :  { %v4989_v55 = vmax.f32 %v4988_v63, 0.0 }
 0xbe1   :  { %6082 = vmatpush3.bf16.msra.mxu1 %v6237_v17 }
 0xbe2   :  { %v4999_v0 = vpack.c.bf16 %v4989_v55, %v4989_v55 }
 0xbe4   :  { %6072 = vmatmul.mubr.msk.bf16.vlgmr.msra.gmra.mrb[136].mxu0 %vm733_vm3, %v4999_v0 }
 0xcb7   :  { %v5065_v3 = vpop.f32.mrb[136].mxu0 }
 0xcb8   :  { %v5066_v14 = vadd.f32 %v5065_v3, %v5003_v28  ;;  %v6073_v12 = vpop.f32.mrb[137].mxu0 }
 0xcb9   :  { %v5068_v47 = vpop.f32.mrb[138].mxu0 }
 0xcba   :  { %v5071_v22 = vsel %vm4237_vm15, %v5066_v14, 0.0  ;;  %v5078_v57 = vmul.f32 %v5066_v14, %v5066_v14  ;;  %v6074_v62 = vpop.f32.mrb[139].mxu0 }
 0xcbb   :  { %v5072_v19 = vrot.slane %v5071_v22, 4 }
 0xcbc   :  { %v5079_v20 = vsel %vm4237_vm15, %v5078_v57, 0.0 }
 0xcbd   :  { %v5073_v39 = vadd.f32 %v5072_v19, %v5071_v22  ;;  %v5080_v26 = vrot.slane %v5079_v20, 4 }
 0xcbf   :  { %v5074_v27 = vrot.slane %v5073_v39, 2  ;;  %v5081_v60 = vadd.f32 %v5080_v26, %v5079_v20 }
 0xcc1   :  { %v5075_v21 = vadd.f32 %v5074_v27, %v5073_v39  ;;  %v5082_v29 = vrot.slane %v5081_v60, 2 }
 0xcc3   :  { %v5076_v36 = vrot.slane %v5075_v21, 1  ;;  %v5083_v37 = vadd.f32 %v5082_v29, %v5081_v60 }
 0xcc5   :  { %v5077_v48 = vadd.f32 %v5076_v36, %v5075_v21  ;;  %v5084_v61 = vrot.slane %v5083_v37, 1 }
 0xcc7   :  { %v5085_v15 = vadd.f32 %v5084_v61, %v5083_v37  ;;  %v5086_v46 = vmul.f32 0.5, %v5077_v48 }
 0xcc9   :  { %v5087_v23 = vmul.f32 0.5, %v5085_v15  ;;  %v5088_v11 = vmul.f32 %v5086_v46, %v5086_v46 }
 0xccb   :  { %v5089_v31 = vsub.f32 %v5087_v23, %v5088_v11 }
 0xccd   :  { %v5090_v44 = vadd.f32 1e-05, %v5089_v31 }
 0xccf   :  { %6292 = vrsqrt.f32 %v5090_v44 }
 0xcd9   :  { %v6293_v1 = vpop.eup %6292 }
 0xcda   :  { %v5092_v34 = vmul.f32 %v6293_v1, %v8325_v54 }
 0xcdc   :  { %v5098_v4 = vmul.f32 %v5092_v34, %v5086_v46  ;;  %v5096_v18 = vrot.slane %v5092_v34, %v8147_v52 }
 0xcde   :  { %v5100_v6 = vrot.slane %v5098_v4, 7  ;;  %v5097_v58 = vmul.f32 %v5096_v18, %v5066_v14 }
 0xce0   :  { %v5102_v8 = vsub.f32 %v8325_v54, %v5100_v6 }
 0xce2   :  { %v5106_v2 = vrot.slane %v5102_v8, %v8151_v5 }
 0xce4   :  { %v5107_v59 = vadd.f32 %v5106_v2, %v5097_v58 }
 0xce6   :  { %v5108_v38 = vmax.f32 %v5107_v59, 0.0 }
 0xce8   :  { %v5118_v33 = vpack.c.bf16 %v5108_v38, %v5108_v38 }
 0xcea   :  { %6084 = vmatmul.mubr.msk.bf16.vlgmr.msra.gmra.mrb[96].mxu1 %vm733_vm3, %v5118_v33 }
 0xdbd   :  { %v5184_v52 = vpop.f32.mrb[96].mxu1 }
 0xdbe   :  { %v5185_v7 = vadd.f32 %v5184_v52, %v5122_v25  ;;  %v6085_v54 = vpop.f32.mrb[97].mxu1 }
 0xdbf   :  { %v5187_v56 = vpop.f32.mrb[98].mxu1 }
 0xdc0   :  { %v6086_v5 = vpop.f32.mrb[99].mxu1  ;;  %5191 = vst.msk [vmem:[#allocation2] sm:$0x3] %vm5190_vm13, %v5185_v7 }
 0xdc1   :  { %6309 = shalt.err (!%p6306_p4)
}
 0xdc2   :  { %s6310_s12 = scalar_lea.hbm %s8409_s11, 32 }
 0xdc3   :  { %p6311_p5 = scmp.ne.s32.totalorder %s8409_s11, %s6310_s12  ;;  %p6314_p6 = scmp.lt.u32.totalorder %s6310_s12, %s8409_s11 }
 0xdc5   :  { %p6316_p7 = pnand %p6314_p6, %p6311_p5 }
 0xdc7   :  { %6319 = shalt.err (!%p6316_p7)
}
 0xdc8   :  { %5201 = dma.vmem_to_hbm [thread:$0]  %s5199_s28, 32, %s8409_s11, [#allocation3]  }
 0xdc9   :  { %6320 = dma.done.wait [#allocation3], 32  }
 0xdca   :  { %6321 = vsyncadd [#allocation3], 4294967264 }
 0xdcb   :  { %5205 = vsyncpa [#allocation3], 1 }

</bundles_post_ra>
